<compile_context>
chip_gen: v5e
topology: v5e:2x2
jax: 0.10.0
libtpu: 0.0.40
codegen_flags: <defaults>
</compile_context>

<pallas_src>
import functools

import jax
import jax.numpy as jnp
import numpy as np
from jax.experimental import pallas as pl
from jax.experimental.pallas import tpu as pltpu


def _round_up(x, m):
    return ((x + m - 1) // m) * m


def _vmem_capacity_bytes():
    try:
        info = pltpu.get_tpu_info()
        cap = getattr(info, "vmem_capacity_bytes", None)
        if cap:
            return int(cap)
    except Exception:
        pass
    return 64 * 1024 * 1024   # conservative default (v7x per-core VMEM)


def _is_v5e():
    try:
        kind = jax.devices()[0].device_kind.lower()
    except Exception:
        return False
    return ("v5 lite" in kind) or ("v5e" in kind) or ("v5litepod" in kind)


# ---------------------------------------------------------------------------
# Kernel 1: one-shot weight-norm prep (tiled over 128 output columns).
#   vt_ref: (K, 128) f32 unnormalized weight, rows = tap*C_pad + c
#   g_ref : (1, 128) f32 gain (padded cols = 0)
#   wt_ref: (K, 128) bf16 normalized weight (padded cols exactly 0)
# ---------------------------------------------------------------------------
def _wn_prep_kernel(vt_ref, g_ref, wt_ref):
    vt = vt_ref[...]
    inv = jax.lax.rsqrt(jnp.sum(vt * vt, axis=0, keepdims=True))
    wt_ref[...] = (vt * (g_ref[...] * inv)).astype(wt_ref.dtype)


# ---------------------------------------------------------------------------
# Kernel 2 (stride==1): fused im2col + conv, shifted-matmul accumulation.
#   x_ref: (1, Lx, C_pad)        bf16 whole padded image, rows flattened (stride Wpad)
#   w_ref: (T, C_pad, O_pad)     bf16 normalized weight, resident
#   b_ref: (1, O_pad)            f32 bias, resident
#   o_ref: (1, TQ, TO)           f32 output tile (also the accumulator)
# ---------------------------------------------------------------------------
def _make_fused_kernel(KH, KW, C_pad, Wpad, TQ, TO, O_pad):
    multi_j = (O_pad != TO)
    seg_len = TQ + KW - 1

    def kernel(x_ref, w_ref, b_ref, o_ref):
        q0 = pl.program_id(2) * TQ
        if multi_j:
            col0 = pl.multiple_of(pl.program_id(1) * TO, 128)
            bias = b_ref[:, pl.ds(col0, TO)]
        else:
            bias = b_ref[...]
        o_ref[0] = jnp.broadcast_to(bias, (TQ, TO)).astype(jnp.float32)
        for di in range(KH):
            start = pl.multiple_of(q0 + di * Wpad, 8)
            seg = x_ref[0, pl.ds(start, seg_len), :]              # (seg_len, C_pad) bf16
            for dj in range(KW):
                t = di * KW + dj
                if multi_j:
                    w_tap = w_ref[t, :, pl.ds(col0, TO)]          # (C_pad, TO) bf16
                else:
                    w_tap = w_ref[t]
                z = jnp.dot(seg, w_tap, preferred_element_type=jnp.float32)
                o_ref[0] += z[dj:dj + TQ, :]

    return kernel


# ---------------------------------------------------------------------------
# Kernel 3 (fallback): im2col patches @ weight, K-tiled, bias fused.
# ---------------------------------------------------------------------------
def _matmul_bias_kernel(p_ref, w_ref, b_ref, o_ref, acc_ref):
    k = pl.program_id(2)

    @pl.when(k == 0)
    def _init():
        acc_ref[...] = jnp.zeros_like(acc_ref)

    acc_ref[...] += jnp.dot(p_ref[...], w_ref[...],
                            preferred_element_type=jnp.float32)

    @pl.when(k == pl.num_programs(2) - 1)
    def _fin():
        o_ref[...] = (acc_ref[...] + b_ref[...]).astype(o_ref.dtype)


# ---------------------------------------------------------------------------
# Tile selection (layout-aware VMEM budgeting).
# ---------------------------------------------------------------------------
def _choose_tq(flat_out, Wpad, KH, KW, C_pad, T, O_pad, TO, budget):
    halo = (KH - 1) * Wpad + KW - 1
    lane_c = _round_up(C_pad, 128)
    w_bytes = 2 * T * _round_up(C_pad, 16) * O_pad * 2
    for cand in (65536, 32768, 16384, 8192, 4096, 2048, 1024,
                 512, 256, 128, 64, 32, 16, 8):
        tq = min(cand, flat_out)
        rq = _round_up(flat_out, tq)
        lx = rq + halo
        need = (2 * _round_up(lx, 16) * lane_c * 2        # resident image (2 bufs)
                + w_bytes                                 # resident weight (2 bufs)
                + 2 * 8 * O_pad * 4                       # bias
                + 2 * tq * TO * 4                         # output block (2 bufs)
                + 2 * _round_up(tq + KW, 16) * TO * 4     # f32 tap result + temps
                + _round_up(tq + KW, 16) * lane_c * 2)    # current seg
        if need <= budget:
            return tq
    return None


def _choose_matmul_tiles(M, K, TO, budget):
    k_cap = _round_up(K, 128)
    m_cap = _round_up(M, 8)
    for tm in (1024, 512, 256, 128, 64, 32, 16, 8):
        tm = min(tm, m_cap)
        for tk in (4096, 2048, 1024, 512, 256, 128):
            tk = min(tk, k_cap)
            need = 2 * (tm * tk * 2 + tk * TO * 2 + 8 * TO * 4 + tm * TO * 4) \
                   + tm * TO * 4
            if need <= budget:
                return tm, tk
    return min(8, m_cap), min(128, k_cap)


# ---------------------------------------------------------------------------
# Conv paths.
# ---------------------------------------------------------------------------
def _fused_conv(xc, w2d, b_row, O, KH, KW, padding, TO, TQ, vmem_limit):
    """stride==1 fused path. xc: (N, C_pad, H, W) NCHW, channel-padded."""
    N, C_pad, H, W = xc.shape
    T = KH * KW
    O_pad = b_row.shape[1]
    Hp, Wp = H + 2 * padding, W + 2 * padding
    Ho, Wo = Hp - KH + 1, Wp - KW + 1
    Wpad = _round_up(Wp, 8)

    # NHWC, spatial pad, width padded to a multiple of 8, rows flattened.
    xn = jnp.pad(xc.transpose(0, 2, 3, 1),
                 ((0, 0), (padding, padding),
                  (padding, Wpad - Wp + padding), (0, 0)))
    flat_out = Ho * Wpad
    R = pl.cdiv(flat_out, TQ)
    RQ = R * TQ
    Lx = RQ + (KH - 1) * Wpad + KW - 1
    xf = xn.reshape(N, Hp * Wpad, C_pad)
    xf = jnp.pad(xf, ((0, 0), (0, Lx - Hp * Wpad), (0, 0))).astype(jnp.bfloat16)

    w3d = w2d.reshape(T, C_pad, O_pad)
    J = O_pad // TO
    kernel = _make_fused_kernel(KH, KW, C_pad, Wpad, TQ, TO, O_pad)

    out = pl.pallas_call(
        kernel,
        out_shape=jax.ShapeDtypeStruct((N, RQ, O_pad), jnp.float32),
        grid=(N, J, R),
        in_specs=[
            pl.BlockSpec((1, Lx, C_pad), lambda n, j, r: (n, 0, 0)),
            pl.BlockSpec((T, C_pad, O_pad), lambda n, j, r: (0, 0, 0)),
            pl.BlockSpec((1, O_pad), lambda n, j, r: (0, 0)),
        ],
        out_specs=pl.BlockSpec((1, TQ, TO), lambda n, j, r: (n, r, j)),
        compiler_params=pltpu.CompilerParams(
            dimension_semantics=("parallel", "parallel", "parallel"),
            vmem_limit_bytes=vmem_limit),
        cost_estimate=pl.CostEstimate(
            flops=2 * N * RQ * T * C_pad * O_pad,
            transcendentals=0,
            bytes_accessed=int(N * Lx * C_pad * 2 + T * C_pad * O_pad * 2
                               + O_pad * 4 + N * RQ * O_pad * 4)),
    )(xf, w3d, b_row)

    out = out[:, :Ho * Wpad, :O].reshape(N, Ho, Wpad, O)[:, :, :Wo, :]
    # TODO(synk): emit (O, spatial) tiles from the kernel so this final
    # lane-crossing NHWC->NCHW transpose becomes a leading-axis swap.
    return out.transpose(0, 3, 1, 2)


def _im2col_conv(xc, w2d, b_row, O, KH, KW, stride, padding, TO, budget, vmem_limit):
    """General fallback: im2col (XLA glue) + K-tiled bf16 matmul kernel."""
    N, C_pad, H, W = xc.shape
    K = KH * KW * C_pad
    O_pad = b_row.shape[1]
    Ho = (H + 2 * padding - KH) // stride + 1
    Wo = (W + 2 * padding - KW) // stride + 1

    xp = jnp.pad(xc, ((0, 0), (0, 0), (padding, padding), (padding, padding)))
    slabs = []
    for di in range(KH):
        for dj in range(KW):
            slabs.append(xp[:, :, di:di + stride * Ho:stride,
                             dj:dj + stride * Wo:stride])
    p = jnp.stack(slabs, axis=1)                               # (N, T, C_pad, Ho, Wo)
    p = p.reshape(N, K, Ho, Wo).transpose(0, 2, 3, 1).reshape(N * Ho * Wo, K)
    M = N * Ho * Wo

    TM, TK = _choose_matmul_tiles(M, K, TO, budget)
    M_pad, K_pad = _round_up(M, TM), _round_up(K, TK)
    p = jnp.pad(p, ((0, M_pad - M), (0, K_pad - K))).astype(jnp.bfloat16)
    w = jnp.pad(w2d, ((0, K_pad - K), (0, 0)))                 # zero rows: no-op in dot

    out = pl.pallas_call(
        _matmul_bias_kernel,
        out_shape=jax.ShapeDtypeStruct((M_pad, O_pad), jnp.float32),
        grid=(M_pad // TM, O_pad // TO, K_pad // TK),
        in_specs=[
            pl.BlockSpec((TM, TK), lambda i, j, k: (i, k)),
            pl.BlockSpec((TK, TO), lambda i, j, k: (k, j)),
            pl.BlockSpec((1, TO), lambda i, j, k: (0, j)),
        ],
        out_specs=pl.BlockSpec((TM, TO), lambda i, j, k: (i, j)),
        scratch_shapes=[pltpu.VMEM((TM, TO), jnp.float32)],
        compiler_params=pltpu.CompilerParams(
            dimension_semantics=("parallel", "parallel", "arbitrary"),
            vmem_limit_bytes=vmem_limit),
        cost_estimate=pl.CostEstimate(
            flops=2 * M_pad * K_pad * O_pad,
            transcendentals=0,
            bytes_accessed=int((M_pad * K_pad + K_pad * O_pad) * 2
                               + M_pad * O_pad * 4)),
    )(p, w, b_row)

    return out[:M, :O].reshape(N, Ho, Wo, O).transpose(0, 3, 1, 2)


# ---------------------------------------------------------------------------
# Public entry point: WeightNormConv2d forward.
# ---------------------------------------------------------------------------
@functools.partial(jax.jit, static_argnames=("stride", "padding"))
def weight_norm_conv2d(x, v, g, bias=None, stride=1, padding=0):
    """x: (N, C, H, W) NCHW.  v: (O, C, KH, KW).  g: (O,).  bias: (O,) or None.
    Returns (N, O, Ho, Wo) float32 (PyTorch nn.utils.weight_norm(Conv2d) fwd)."""
    N, C, H, W = x.shape
    O, _, KH, KW = v.shape
    if bias is None:
        bias = jnp.zeros((O,), jnp.float32)

    cap = _vmem_capacity_bytes()
    budget = int(cap * 0.55)
    vmem_limit = int(cap * 0.85)
    TO = 256 if (O > 128 and not _is_v5e()) else 128
    O_pad = _round_up(O, TO)

    # Pad channels to a multiple of 8 (zero rows: no effect on norm or conv).
    C_pad = _round_up(C, 8)
    if C_pad != C:
        x = jnp.pad(x, ((0, 0), (0, C_pad - C), (0, 0), (0, 0)))
        v = jnp.pad(v, ((0, 0), (0, C_pad - C), (0, 0), (0, 0)))
    T = KH * KW
    K = T * C_pad

    # --- kernel 1: normalize the weight once (tap-major rows, lane-dense cols).
    # Pad v columns with 1.0 and g/bias with 0.0 -> padded weight/output cols = 0.
    v_t = v.transpose(2, 3, 1, 0).reshape(K, O).astype(jnp.float32)
    v_t = jnp.pad(v_t, ((0, 0), (0, O_pad - O)), constant_values=1.0)
    g_row = jnp.pad(g.reshape(1, O).astype(jnp.float32), ((0, 0), (0, O_pad - O)))
    b_row = jnp.pad(bias.reshape(1, O).astype(jnp.float32), ((0, 0), (0, O_pad - O)))

    w2d = pl.pallas_call(
        _wn_prep_kernel,
        out_shape=jax.ShapeDtypeStruct((K, O_pad), jnp.bfloat16),
        grid=(O_pad // 128,),
        in_specs=[pl.BlockSpec((K, 128), lambda j: (0, j)),
                  pl.BlockSpec((1, 128), lambda j: (0, j))],
        out_specs=pl.BlockSpec((K, 128), lambda j: (0, j)),
        compiler_params=pltpu.CompilerParams(vmem_limit_bytes=vmem_limit),
    )(v_t, g_row)

    if stride == 1:
        Hp, Wp = H + 2 * padding, W + 2 * padding
        Ho = Hp - KH + 1
        Wpad = _round_up(Wp, 8)
        TQ = _choose_tq(Ho * Wpad, Wpad, KH, KW, C_pad, T, O_pad, TO, budget)
        if TQ is not None:
            return _fused_conv(x, w2d, b_row, O, KH, KW, padding, TO, TQ, vmem_limit)
    # TODO(synk): fuse strided convs too (strided shifted-matmul); for now they
    # take the im2col + K-tiled matmul fallback.
    return _im2col_conv(x, w2d, b_row, O, KH, KW, stride, padding, TO,
                        budget, vmem_limit)


def _reference(x, v, g, bias, stride, padding):
    norm = jnp.sqrt(jnp.sum(v * v, axis=(1, 2, 3), keepdims=True))
    w = v * (g.reshape(-1, 1, 1, 1) / norm)
    y = jax.lax.conv_general_dilated(
        x, w, window_strides=(stride, stride),
        padding=[(padding, padding), (padding, padding)],
        dimension_numbers=("NCHW", "OIHW", "NCHW"))
    return y + bias.reshape(1, -1, 1, 1)


if __name__ == "__main__":
    # WeightNormConv2d(in_dim=4, out_dim=8, kernel_size=3, stride=1, padding=1)
    N, C, H, W = 2, 4, 16, 16
    O, KH, KW = 8, 3, 3

    key = jax.random.PRNGKey(0)
    kx, kv, kg, kb = jax.random.split(key, 4)
    x = jax.random.normal(kx, (N, C, H, W), dtype=jnp.float32)
    v = jax.random.normal(kv, (O, C, KH, KW), dtype=jnp.float32) * 0.1
    g = jax.random.normal(kg, (O,), dtype=jnp.float32) + 1.0
    b = jax.random.normal(kb, (O,), dtype=jnp.float32) * 0.05

    # Fused stride-1 path.
    y = jax.block_until_ready(weight_norm_conv2d(x, v, g, b, stride=1, padding=1))
    y_ref = jax.block_until_ready(_reference(x, v, g, b, 1, 1))
    assert y.shape == (N, O, H, W), y.shape
    np.testing.assert_allclose(np.asarray(y), np.asarray(y_ref),
                               rtol=2e-2, atol=5e-2)

    # Strided fallback path (im2col + K-tiled matmul).
    y2 = jax.block_until_ready(weight_norm_conv2d(x, v, g, b, stride=2, padding=1))
    y2_ref = jax.block_until_ready(_reference(x, v, g, b, 2, 1))
    assert y2.shape == y2_ref.shape, (y2.shape, y2_ref.shape)
    np.testing.assert_allclose(np.asarray(y2), np.asarray(y2_ref),
                               rtol=2e-2, atol=5e-2)

    print("KERNEL_OK")
</pallas_src>

<mosaic_0001>
module attributes {stable_mosaic.version = 11 : i64} {
  func.func @_wn_prep_kernel(%arg0: i32, %arg1: memref<72x128xf32, #tpu.memory_space<vmem>>, %arg2: memref<1x128xf32, #tpu.memory_space<vmem>>, %arg3: memref<72x128xbf16, #tpu.memory_space<vmem>>) attributes {dimension_semantics = [#tpu.dimension_semantics<arbitrary>], iteration_bounds = array<i64: 1>, scalar_prefetch = 0 : i64, scratch_operands = 0 : i64, tpu.core_type = #tpu.core_type<tc>, window_params = [{transform_indices = @transform_0, window_bounds = array<i64: 72, 128>}, {transform_indices = @transform_1, window_bounds = array<i64: 1, 128>}, {transform_indices = @transform_2, window_bounds = array<i64: 72, 128>}]} {
    %c0 = arith.constant 0 : index
    %c0_0 = arith.constant 0 : index
    %0 = vector.load %arg1[%c0, %c0_0] : memref<72x128xf32, #tpu.memory_space<vmem>>, vector<72x128xf32>
    %1 = arith.mulf %0, %0 : vector<72x128xf32>
    %cst = arith.constant dense<0.000000e+00> : vector<128xf32>
    %2 = vector.multi_reduction <add>, %1, %cst [0] : vector<72x128xf32> to vector<128xf32>
    %3 = vector.shape_cast %2 : vector<128xf32> to vector<1x128xf32>
    %4 = math.rsqrt %3 : vector<1x128xf32>
    %c0_1 = arith.constant 0 : index
    %c0_2 = arith.constant 0 : index
    %5 = vector.load %arg2[%c0_1, %c0_2] : memref<1x128xf32, #tpu.memory_space<vmem>>, vector<1x128xf32>
    %6 = arith.mulf %5, %4 : vector<1x128xf32>
    %7 = vector.broadcast %6 : vector<1x128xf32> to vector<72x128xf32>
    %8 = arith.mulf %0, %7 : vector<72x128xf32>
    %9 = arith.truncf %8 : vector<72x128xf32> to vector<72x128xbf16>
    %c0_3 = arith.constant 0 : index
    %c0_4 = arith.constant 0 : index
    %10 = vector.load %arg3[%c0_3, %c0_4] : memref<72x128xbf16, #tpu.memory_space<vmem>>, vector<72x128xbf16>
    tpu.vector_store %arg3[%c0_3, %c0_4], %9 {strides = array<i32>} : memref<72x128xbf16, #tpu.memory_space<vmem>>, vector<72x128xbf16>,
    return
  }
  func.func @transform_0(%arg0: i32) -> (i32, i32) {
    %c0_i32 = arith.constant 0 : i32
    %c0_i32_0 = arith.constant 0 : i32
    return %c0_i32, %arg0 : i32, i32
  }
  func.func @transform_1(%arg0: i32) -> (i32, i32) {
    %c0_i32 = arith.constant 0 : i32
    %c0_i32_0 = arith.constant 0 : i32
    return %c0_i32, %arg0 : i32, i32
  }
  func.func @transform_2(%arg0: i32) -> (i32, i32) {
    %c0_i32 = arith.constant 0 : i32
    %c0_i32_0 = arith.constant 0 : i32
    return %c0_i32, %arg0 : i32, i32
  }
}

module attributes {stable_mosaic.version = 11 : i64} {
  func.func @kernel(%arg0: i32, %arg1: i32, %arg2: i32, %arg3: memref<1x434x8xbf16, #tpu.memory_space<vmem>>, %arg4: memref<9x8x128xbf16, #tpu.memory_space<vmem>>, %arg5: memref<1x128xf32, #tpu.memory_space<vmem>>, %arg6: memref<1x384x128xf32, #tpu.memory_space<vmem>>) attributes {dimension_semantics = [#tpu.dimension_semantics<parallel>, #tpu.dimension_semantics<parallel>, #tpu.dimension_semantics<parallel>], iteration_bounds = array<i64: 2, 1, 1>, scalar_prefetch = 0 : i64, scratch_operands = 0 : i64, tpu.core_type = #tpu.core_type<tc>, window_params = [{transform_indices = @transform_0, window_bounds = array<i64: 1, 434, 8>}, {pipeline_mode = #tpu.pipeline_mode<synchronous>, transform_indices = @transform_1, window_bounds = array<i64: 9, 8, 128>}, {pipeline_mode = #tpu.pipeline_mode<synchronous>, transform_indices = @transform_2, window_bounds = array<i64: 1, 128>}, {transform_indices = @transform_3, window_bounds = array<i64: 1, 384, 128>}]} {
    %c384_i32 = arith.constant 384 : i32
    %0 = arith.muli %arg2, %c384_i32 : i32
    %c0 = arith.constant 0 : index
    %c0_0 = arith.constant 0 : index
    %1 = vector.load %arg5[%c0, %c0_0] : memref<1x128xf32, #tpu.memory_space<vmem>>, vector<1x128xf32>
    %2 = vector.shape_cast %1 : vector<1x128xf32> to vector<1x128xf32>
    %3 = vector.broadcast %2 : vector<1x128xf32> to vector<384x128xf32>
    %c0_1 = arith.constant 0 : index
    %c0_2 = arith.constant 0 : index
    %c0_3 = arith.constant 0 : index
    %4 = vector.load %arg6[%c0_1, %c0_2, %c0_3] : memref<1x384x128xf32, #tpu.memory_space<vmem>>, vector<1x384x128xf32>
    %5 = vector.shape_cast %4 : vector<1x384x128xf32> to vector<384x128xf32>
    %6 = vector.shape_cast %3 : vector<384x128xf32> to vector<1x384x128xf32>
    tpu.vector_store %arg6[%c0_1, %c0_2, %c0_3], %6 {strides = array<i32>} : memref<1x384x128xf32, #tpu.memory_space<vmem>>, vector<1x384x128xf32>,
    %c0_i32 = arith.constant 0 : i32
    %7 = arith.addi %0, %c0_i32 : i32
    %8 = tpu.assume_multiple %7, 8 : i32
    %c0_4 = arith.constant 0 : index
    %9 = arith.index_cast %8 : i32 to index
    %c0_5 = arith.constant 0 : index
    %10 = vector.load %arg3[%c0_4, %9, %c0_5] : memref<1x434x8xbf16, #tpu.memory_space<vmem>>, vector<1x386x8xbf16>
    %11 = vector.shape_cast %10 : vector<1x386x8xbf16> to vector<386x8xbf16>
    %c0_6 = arith.constant 0 : index
    %c0_7 = arith.constant 0 : index
    %c0_8 = arith.constant 0 : index
    %12 = vector.load %arg4[%c0_6, %c0_7, %c0_8] : memref<9x8x128xbf16, #tpu.memory_space<vmem>>, vector<1x8x128xbf16>
    %13 = vector.shape_cast %12 : vector<1x8x128xbf16> to vector<8x128xbf16>
    %cst = arith.constant dense<0.000000e+00> : vector<386x128xf32>
    %14 = tpu.matmul %11, %13, %cst {dimension_numbers = #tpu.dot_dimension_numbers<[1], [0], [0], [1], [0, 0, 1, 1], [], []>} : vector<386x8xbf16>, vector<8x128xbf16>, vector<386x128xf32> -> vector<386x128xf32>
    %c0_9 = arith.constant 0 : index
    %c0_10 = arith.constant 0 : index
    %c0_11 = arith.constant 0 : index
    %15 = vector.load %arg6[%c0_9, %c0_10, %c0_11] : memref<1x384x128xf32, #tpu.memory_space<vmem>>, vector<1x384x128xf32>
    %16 = vector.shape_cast %15 : vector<1x384x128xf32> to vector<384x128xf32>
    %17 = vector.extract_strided_slice %14 {offsets = [0, 0], sizes = [384, 128], strides = [1, 1]} : vector<386x128xf32> to vector<384x128xf32>
    %18 = arith.addf %16, %17 : vector<384x128xf32>
    %c0_12 = arith.constant 0 : index
    %c0_13 = arith.constant 0 : index
    %c0_14 = arith.constant 0 : index
    %19 = vector.load %arg6[%c0_12, %c0_13, %c0_14] : memref<1x384x128xf32, #tpu.memory_space<vmem>>, vector<1x384x128xf32>
    %20 = vector.shape_cast %19 : vector<1x384x128xf32> to vector<384x128xf32>
    %21 = vector.shape_cast %18 : vector<384x128xf32> to vector<1x384x128xf32>
    tpu.vector_store %arg6[%c0_12, %c0_13, %c0_14], %21 {strides = array<i32>} : memref<1x384x128xf32, #tpu.memory_space<vmem>>, vector<1x384x128xf32>,
    %c1 = arith.constant 1 : index
    %c0_15 = arith.constant 0 : index
    %c0_16 = arith.constant 0 : index
    %22 = vector.load %arg4[%c1, %c0_15, %c0_16] : memref<9x8x128xbf16, #tpu.memory_space<vmem>>, vector<1x8x128xbf16>
    %23 = vector.shape_cast %22 : vector<1x8x128xbf16> to vector<8x128xbf16>
    %cst_17 = arith.constant dense<0.000000e+00> : vector<386x128xf32>
    %24 = tpu.matmul %11, %23, %cst_17 {dimension_numbers = #tpu.dot_dimension_numbers<[1], [0], [0], [1], [0, 0, 1, 1], [], []>} : vector<386x8xbf16>, vector<8x128xbf16>, vector<386x128xf32> -> vector<386x128xf32>
    %c0_18 = arith.constant 0 : index
    %c0_19 = arith.constant 0 : index
    %c0_20 = arith.constant 0 : index
    %25 = vector.load %arg6[%c0_18, %c0_19, %c0_20] : memref<1x384x128xf32, #tpu.memory_space<vmem>>, vector<1x384x128xf32>
    %26 = vector.shape_cast %25 : vector<1x384x128xf32> to vector<384x128xf32>
    %27 = vector.extract_strided_slice %24 {offsets = [1, 0], sizes = [384, 128], strides = [1, 1]} : vector<386x128xf32> to vector<384x128xf32>
    %28 = arith.addf %26, %27 : vector<384x128xf32>
    %c0_21 = arith.constant 0 : index
    %c0_22 = arith.constant 0 : index
    %c0_23 = arith.constant 0 : index
    %29 = vector.load %arg6[%c0_21, %c0_22, %c0_23] : memref<1x384x128xf32, #tpu.memory_space<vmem>>, vector<1x384x128xf32>
    %30 = vector.shape_cast %29 : vector<1x384x128xf32> to vector<384x128xf32>
    %31 = vector.shape_cast %28 : vector<384x128xf32> to vector<1x384x128xf32>
    tpu.vector_store %arg6[%c0_21, %c0_22, %c0_23], %31 {strides = array<i32>} : memref<1x384x128xf32, #tpu.memory_space<vmem>>, vector<1x384x128xf32>,
    %c2 = arith.constant 2 : index
    %c0_24 = arith.constant 0 : index
    %c0_25 = arith.constant 0 : index
    %32 = vector.load %arg4[%c2, %c0_24, %c0_25] : memref<9x8x128xbf16, #tpu.memory_space<vmem>>, vector<1x8x128xbf16>
    %33 = vector.shape_cast %32 : vector<1x8x128xbf16> to vector<8x128xbf16>
    %cst_26 = arith.constant dense<0.000000e+00> : vector<386x128xf32>
    %34 = tpu.matmul %11, %33, %cst_26 {dimension_numbers = #tpu.dot_dimension_numbers<[1], [0], [0], [1], [0, 0, 1, 1], [], []>} : vector<386x8xbf16>, vector<8x128xbf16>, vector<386x128xf32> -> vector<386x128xf32>
    %c0_27 = arith.constant 0 : index
    %c0_28 = arith.constant 0 : index
    %c0_29 = arith.constant 0 : index
    %35 = vector.load %arg6[%c0_27, %c0_28, %c0_29] : memref<1x384x128xf32, #tpu.memory_space<vmem>>, vector<1x384x128xf32>
    %36 = vector.shape_cast %35 : vector<1x384x128xf32> to vector<384x128xf32>
    %37 = vector.extract_strided_slice %34 {offsets = [2, 0], sizes = [384, 128], strides = [1, 1]} : vector<386x128xf32> to vector<384x128xf32>
    %38 = arith.addf %36, %37 : vector<384x128xf32>
    %c0_30 = arith.constant 0 : index
    %c0_31 = arith.constant 0 : index
    %c0_32 = arith.constant 0 : index
    %39 = vector.load %arg6[%c0_30, %c0_31, %c0_32] : memref<1x384x128xf32, #tpu.memory_space<vmem>>, vector<1x384x128xf32>
    %40 = vector.shape_cast %39 : vector<1x384x128xf32> to vector<384x128xf32>
    %41 = vector.shape_cast %38 : vector<384x128xf32> to vector<1x384x128xf32>
    tpu.vector_store %arg6[%c0_30, %c0_31, %c0_32], %41 {strides = array<i32>} : memref<1x384x128xf32, #tpu.memory_space<vmem>>, vector<1x384x128xf32>,
    %c24_i32 = arith.constant 24 : i32
    %42 = arith.addi %0, %c24_i32 : i32
    %43 = tpu.assume_multiple %42, 8 : i32
    %c0_33 = arith.constant 0 : index
    %44 = arith.index_cast %43 : i32 to index
    %c0_34 = arith.constant 0 : index
    %45 = vector.load %arg3[%c0_33, %44, %c0_34] : memref<1x434x8xbf16, #tpu.memory_space<vmem>>, vector<1x386x8xbf16>
    %46 = vector.shape_cast %45 : vector<1x386x8xbf16> to vector<386x8xbf16>
    %c3 = arith.constant 3 : index
    %c0_35 = arith.constant 0 : index
    %c0_36 = arith.constant 0 : index
    %47 = vector.load %arg4[%c3, %c0_35, %c0_36] : memref<9x8x128xbf16, #tpu.memory_space<vmem>>, vector<1x8x128xbf16>
    %48 = vector.shape_cast %47 : vector<1x8x128xbf16> to vector<8x128xbf16>
    %cst_37 = arith.constant dense<0.000000e+00> : vector<386x128xf32>
    %49 = tpu.matmul %46, %48, %cst_37 {dimension_numbers = #tpu.dot_dimension_numbers<[1], [0], [0], [1], [0, 0, 1, 1], [], []>} : vector<386x8xbf16>, vector<8x128xbf16>, vector<386x128xf32> -> vector<386x128xf32>
    %c0_38 = arith.constant 0 : index
    %c0_39 = arith.constant 0 : index
    %c0_40 = arith.constant 0 : index
    %50 = vector.load %arg6[%c0_38, %c0_39, %c0_40] : memref<1x384x128xf32, #tpu.memory_space<vmem>>, vector<1x384x128xf32>
    %51 = vector.shape_cast %50 : vector<1x384x128xf32> to vector<384x128xf32>
    %52 = vector.extract_strided_slice %49 {offsets = [0, 0], sizes = [384, 128], strides = [1, 1]} : vector<386x128xf32> to vector<384x128xf32>
    %53 = arith.addf %51, %52 : vector<384x128xf32>
    %c0_41 = arith.constant 0 : index
    %c0_42 = arith.constant 0 : index
    %c0_43 = arith.constant 0 : index
    %54 = vector.load %arg6[%c0_41, %c0_42, %c0_43] : memref<1x384x128xf32, #tpu.memory_space<vmem>>, vector<1x384x128xf32>
    %55 = vector.shape_cast %54 : vector<1x384x128xf32> to vector<384x128xf32>
    %56 = vector.shape_cast %53 : vector<384x128xf32> to vector<1x384x128xf32>
    tpu.vector_store %arg6[%c0_41, %c0_42, %c0_43], %56 {strides = array<i32>} : memref<1x384x128xf32, #tpu.memory_space<vmem>>, vector<1x384x128xf32>,
    %c4 = arith.constant 4 : index
    %c0_44 = arith.constant 0 : index
    %c0_45 = arith.constant 0 : index
    %57 = vector.load %arg4[%c4, %c0_44, %c0_45] : memref<9x8x128xbf16, #tpu.memory_space<vmem>>, vector<1x8x128xbf16>
    %58 = vector.shape_cast %57 : vector<1x8x128xbf16> to vector<8x128xbf16>
    %cst_46 = arith.constant dense<0.000000e+00> : vector<386x128xf32>
    %59 = tpu.matmul %46, %58, %cst_46 {dimension_numbers = #tpu.dot_dimension_numbers<[1], [0], [0], [1], [0, 0, 1, 1], [], []>} : vector<386x8xbf16>, vector<8x128xbf16>, vector<386x128xf32> -> vector<386x128xf32>
    %c0_47 = arith.constant 0 : index
    %c0_48 = arith.constant 0 : index
    %c0_49 = arith.constant 0 : index
    %60 = vector.load %arg6[%c0_47, %c0_48, %c0_49] : memref<1x384x128xf32, #tpu.memory_space<vmem>>, vector<1x384x128xf32>
    %61 = vector.shape_cast %60 : vector<1x384x128xf32> to vector<384x128xf32>
    %62 = vector.extract_strided_slice %59 {offsets = [1, 0], sizes = [384, 128], strides = [1, 1]} : vector<386x128xf32> to vector<384x128xf32>
    %63 = arith.addf %61, %62 : vector<384x128xf32>
    %c0_50 = arith.constant 0 : index
    %c0_51 = arith.constant 0 : index
    %c0_52 = arith.constant 0 : index
    %64 = vector.load %arg6[%c0_50, %c0_51, %c0_52] : memref<1x384x128xf32, #tpu.memory_space<vmem>>, vector<1x384x128xf32>
    %65 = vector.shape_cast %64 : vector<1x384x128xf32> to vector<384x128xf32>
    %66 = vector.shape_cast %63 : vector<384x128xf32> to vector<1x384x128xf32>
    tpu.vector_store %arg6[%c0_50, %c0_51, %c0_52], %66 {strides = array<i32>} : memref<1x384x128xf32, #tpu.memory_space<vmem>>, vector<1x384x128xf32>,
    %c5 = arith.constant 5 : index
    %c0_53 = arith.constant 0 : index
    %c0_54 = arith.constant 0 : index
    %67 = vector.load %arg4[%c5, %c0_53, %c0_54] : memref<9x8x128xbf16, #tpu.memory_space<vmem>>, vector<1x8x128xbf16>
    %68 = vector.shape_cast %67 : vector<1x8x128xbf16> to vector<8x128xbf16>
    %cst_55 = arith.constant dense<0.000000e+00> : vector<386x128xf32>
    %69 = tpu.matmul %46, %68, %cst_55 {dimension_numbers = #tpu.dot_dimension_numbers<[1], [0], [0], [1], [0, 0, 1, 1], [], []>} : vector<386x8xbf16>, vector<8x128xbf16>, vector<386x128xf32> -> vector<386x128xf32>
    %c0_56 = arith.constant 0 : index
    %c0_57 = arith.constant 0 : index
    %c0_58 = arith.constant 0 : index
    %70 = vector.load %arg6[%c0_56, %c0_57, %c0_58] : memref<1x384x128xf32, #tpu.memory_space<vmem>>, vector<1x384x128xf32>
    %71 = vector.shape_cast %70 : vector<1x384x128xf32> to vector<384x128xf32>
    %72 = vector.extract_strided_slice %69 {offsets = [2, 0], sizes = [384, 128], strides = [1, 1]} : vector<386x128xf32> to vector<384x128xf32>
    %73 = arith.addf %71, %72 : vector<384x128xf32>
    %c0_59 = arith.constant 0 : index
    %c0_60 = arith.constant 0 : index
    %c0_61 = arith.constant 0 : index
    %74 = vector.load %arg6[%c0_59, %c0_60, %c0_61] : memref<1x384x128xf32, #tpu.memory_space<vmem>>, vector<1x384x128xf32>
    %75 = vector.shape_cast %74 : vector<1x384x128xf32> to vector<384x128xf32>
    %76 = vector.shape_cast %73 : vector<384x128xf32> to vector<1x384x128xf32>
    tpu.vector_store %arg6[%c0_59, %c0_60, %c0_61], %76 {strides = array<i32>} : memref<1x384x128xf32, #tpu.memory_space<vmem>>, vector<1x384x128xf32>,
    %c48_i32 = arith.constant 48 : i32
    %77 = arith.addi %0, %c48_i32 : i32
    %78 = tpu.assume_multiple %77, 8 : i32
    %c0_62 = arith.constant 0 : index
    %79 = arith.index_cast %78 : i32 to index
    %c0_63 = arith.constant 0 : index
    %80 = vector.load %arg3[%c0_62, %79, %c0_63] : memref<1x434x8xbf16, #tpu.memory_space<vmem>>, vector<1x386x8xbf16>
    %81 = vector.shape_cast %80 : vector<1x386x8xbf16> to vector<386x8xbf16>
    %c6 = arith.constant 6 : index
    %c0_64 = arith.constant 0 : index
    %c0_65 = arith.constant 0 : index
    %82 = vector.load %arg4[%c6, %c0_64, %c0_65] : memref<9x8x128xbf16, #tpu.memory_space<vmem>>, vector<1x8x128xbf16>
    %83 = vector.shape_cast %82 : vector<1x8x128xbf16> to vector<8x128xbf16>
    %cst_66 = arith.constant dense<0.000000e+00> : vector<386x128xf32>
    %84 = tpu.matmul %81, %83, %cst_66 {dimension_numbers = #tpu.dot_dimension_numbers<[1], [0], [0], [1], [0, 0, 1, 1], [], []>} : vector<386x8xbf16>, vector<8x128xbf16>, vector<386x128xf32> -> vector<386x128xf32>
    %c0_67 = arith.constant 0 : index
    %c0_68 = arith.constant 0 : index
    %c0_69 = arith.constant 0 : index
    %85 = vector.load %arg6[%c0_67, %c0_68, %c0_69] : memref<1x384x128xf32, #tpu.memory_space<vmem>>, vector<1x384x128xf32>
    %86 = vector.shape_cast %85 : vector<1x384x128xf32> to vector<384x128xf32>
    %87 = vector.extract_strided_slice %84 {offsets = [0, 0], sizes = [384, 128], strides = [1, 1]} : vector<386x128xf32> to vector<384x128xf32>
    %88 = arith.addf %86, %87 : vector<384x128xf32>
    %c0_70 = arith.constant 0 : index
    %c0_71 = arith.constant 0 : index
    %c0_72 = arith.constant 0 : index
    %89 = vector.load %arg6[%c0_70, %c0_71, %c0_72] : memref<1x384x128xf32, #tpu.memory_space<vmem>>, vector<1x384x128xf32>
    %90 = vector.shape_cast %89 : vector<1x384x128xf32> to vector<384x128xf32>
    %91 = vector.shape_cast %88 : vector<384x128xf32> to vector<1x384x128xf32>
    tpu.vector_store %arg6[%c0_70, %c0_71, %c0_72], %91 {strides = array<i32>} : memref<1x384x128xf32, #tpu.memory_space<vmem>>, vector<1x384x128xf32>,
    %c7 = arith.constant 7 : index
    %c0_73 = arith.constant 0 : index
    %c0_74 = arith.constant 0 : index
    %92 = vector.load %arg4[%c7, %c0_73, %c0_74] : memref<9x8x128xbf16, #tpu.memory_space<vmem>>, vector<1x8x128xbf16>
    %93 = vector.shape_cast %92 : vector<1x8x128xbf16> to vector<8x128xbf16>
    %cst_75 = arith.constant dense<0.000000e+00> : vector<386x128xf32>
    %94 = tpu.matmul %81, %93, %cst_75 {dimension_numbers = #tpu.dot_dimension_numbers<[1], [0], [0], [1], [0, 0, 1, 1], [], []>} : vector<386x8xbf16>, vector<8x128xbf16>, vector<386x128xf32> -> vector<386x128xf32>
    %c0_76 = arith.constant 0 : index
    %c0_77 = arith.constant 0 : index
    %c0_78 = arith.constant 0 : index
    %95 = vector.load %arg6[%c0_76, %c0_77, %c0_78] : memref<1x384x128xf32, #tpu.memory_space<vmem>>, vector<1x384x128xf32>
    %96 = vector.shape_cast %95 : vector<1x384x128xf32> to vector<384x128xf32>
    %97 = vector.extract_strided_slice %94 {offsets = [1, 0], sizes = [384, 128], strides = [1, 1]} : vector<386x128xf32> to vector<384x128xf32>
    %98 = arith.addf %96, %97 : vector<384x128xf32>
    %c0_79 = arith.constant 0 : index
    %c0_80 = arith.constant 0 : index
    %c0_81 = arith.constant 0 : index
    %99 = vector.load %arg6[%c0_79, %c0_80, %c0_81] : memref<1x384x128xf32, #tpu.memory_space<vmem>>, vector<1x384x128xf32>
    %100 = vector.shape_cast %99 : vector<1x384x128xf32> to vector<384x128xf32>
    %101 = vector.shape_cast %98 : vector<384x128xf32> to vector<1x384x128xf32>
    tpu.vector_store %arg6[%c0_79, %c0_80, %c0_81], %101 {strides = array<i32>} : memref<1x384x128xf32, #tpu.memory_space<vmem>>, vector<1x384x128xf32>,
    %c8 = arith.constant 8 : index
    %c0_82 = arith.constant 0 : index
    %c0_83 = arith.constant 0 : index
    %102 = vector.load %arg4[%c8, %c0_82, %c0_83] : memref<9x8x128xbf16, #tpu.memory_space<vmem>>, vector<1x8x128xbf16>
    %103 = vector.shape_cast %102 : vector<1x8x128xbf16> to vector<8x128xbf16>
    %cst_84 = arith.constant dense<0.000000e+00> : vector<386x128xf32>
    %104 = tpu.matmul %81, %103, %cst_84 {dimension_numbers = #tpu.dot_dimension_numbers<[1], [0], [0], [1], [0, 0, 1, 1], [], []>} : vector<386x8xbf16>, vector<8x128xbf16>, vector<386x128xf32> -> vector<386x128xf32>
    %c0_85 = arith.constant 0 : index
    %c0_86 = arith.constant 0 : index
    %c0_87 = arith.constant 0 : index
    %105 = vector.load %arg6[%c0_85, %c0_86, %c0_87] : memref<1x384x128xf32, #tpu.memory_space<vmem>>, vector<1x384x128xf32>
    %106 = vector.shape_cast %105 : vector<1x384x128xf32> to vector<384x128xf32>
    %107 = vector.extract_strided_slice %104 {offsets = [2, 0], sizes = [384, 128], strides = [1, 1]} : vector<386x128xf32> to vector<384x128xf32>
    %108 = arith.addf %106, %107 : vector<384x128xf32>
    %c0_88 = arith.constant 0 : index
    %c0_89 = arith.constant 0 : index
    %c0_90 = arith.constant 0 : index
    %109 = vector.load %arg6[%c0_88, %c0_89, %c0_90] : memref<1x384x128xf32, #tpu.memory_space<vmem>>, vector<1x384x128xf32>
    %110 = vector.shape_cast %109 : vector<1x384x128xf32> to vector<384x128xf32>
    %111 = vector.shape_cast %108 : vector<384x128xf32> to vector<1x384x128xf32>
    tpu.vector_store %arg6[%c0_88, %c0_89, %c0_90], %111 {strides = array<i32>} : memref<1x384x128xf32, #tpu.memory_space<vmem>>, vector<1x384x128xf32>,
    return
  }
  func.func @transform_0(%arg0: i32, %arg1: i32, %arg2: i32) -> (i32, i32, i32) {
    %c0_i32 = arith.constant 0 : i32
    %c0_i32_0 = arith.constant 0 : i32
    %c0_i32_1 = arith.constant 0 : i32
    return %arg0, %c0_i32, %c0_i32_0 : i32, i32, i32
  }
  func.func @transform_1(%arg0: i32, %arg1: i32, %arg2: i32) -> (i32, i32, i32) {
    %c0_i32 = arith.constant 0 : i32
    %c0_i32_0 = arith.constant 0 : i32
    %c0_i32_1 = arith.constant 0 : i32
    %c0_i32_2 = arith.constant 0 : i32
    return %c0_i32, %c0_i32_0, %c0_i32_1 : i32, i32, i32
  }
  func.func @transform_2(%arg0: i32, %arg1: i32, %arg2: i32) -> (i32, i32) {
    %c0_i32 = arith.constant 0 : i32
    %c0_i32_0 = arith.constant 0 : i32
    %c0_i32_1 = arith.constant 0 : i32
    return %c0_i32, %c0_i32_0 : i32, i32
  }
  func.func @transform_3(%arg0: i32, %arg1: i32, %arg2: i32) -> (i32, i32, i32) {
    %c0_i32 = arith.constant 0 : i32
    return %arg0, %arg2, %arg1 : i32, i32, i32
  }
}

</mosaic_0001>

<bundles_post_ra>
// kernel: weight_norm_conv2d.2
= control target key start
LH: loop header
LB: loop body
LE: loop exit
PB: predicated region body
PF: predicated region fallthrough
CT: control target
= control target key end

     0   :  { %s174_s0 = inlined_call_operand.vmem [shape: f32[72,128], index: 0, kind: input, shape index: {}]   ;;  %s175_s1 = inlined_call_operand.vmem [shape: f32[1,128], index: 1, kind: input, shape index: {}]   ;;  %s176_s2 = inlined_call_operand.vmem [shape: bf16[72,128], index: 2, kind: output, shape index: {}]  }
   0x1   :  { %v11_v0 = vld [vmem:[%s174_s0] sm:$0xff]  ;;  %v12_v1 = vld [vmem:[%s174_s0 + $0x8] sm:$0xff]  ;;  %v13_v2 = vld [vmem:[%s174_s0 + $0x10] sm:$0xff] }
   0x2   :  { %v14_v3 = vld [vmem:[%s174_s0 + $0x18] sm:$0xff]  ;;  %v20_v4 = vmul.f32 %v11_v0, %v11_v0  ;;  %v21_v5 = vmul.f32 %v12_v1, %v12_v1  ;;  %v22_v6 = vmul.f32 %v13_v2, %v13_v2  ;;  %v15_v7 = vld [vmem:[%s174_s0 + $0x20] sm:$0xff]  ;;  %v16_v10 = vld [vmem:[%s174_s0 + $0x28] sm:$0xff] }
   0x3   :  { %v23_v8 = vmul.f32 %v14_v3, %v14_v3  ;;  %v24_v11 = vmul.f32 %v15_v7, %v15_v7  ;;  %v17_v13 = vld [vmem:[%s174_s0 + $0x30] sm:$0xff]  ;;  %v25_v14 = vmul.f32 %v16_v10, %v16_v10  ;;  %v18_v16 = vld [vmem:[%s174_s0 + $0x38] sm:$0xff]  ;;  %v19_v19 = vld [vmem:[%s174_s0 + $0x40] sm:$0xff] }
   0x4   :  { %v29_v9 = vadd.f32 %v21_v5, %v20_v4  ;;  %v26_v17 = vmul.f32 %v17_v13, %v17_v13  ;;  %v27_v20 = vmul.f32 %v18_v16, %v18_v16  ;;  %v28_v22 = vmul.f32 %v19_v19, %v19_v19  ;;  %v53_v38 = vld [vmem:[%s175_s1] sm:$0x1] }
   0x6   :  { %v30_v12 = vadd.f32 %v29_v9, %v22_v6 }
   0x8   :  { %v31_v15 = vadd.f32 %v30_v12, %v23_v8 }
   0xa   :  { %v32_v18 = vadd.f32 %v31_v15, %v24_v11 }
   0xc   :  { %v33_v21 = vadd.f32 %v32_v18, %v25_v14 }
   0xe   :  { %v34_v23 = vadd.f32 %v33_v21, %v26_v17 }
  0x10   :  { %v35_v24 = vadd.f32 %v34_v23, %v27_v20 }
  0x12   :  { %v36_v25 = vadd.f32 %v35_v24, %v28_v22 }
  0x14   :  { %v37_v26 = vrot.slane %v36_v25, 4 }
  0x16   :  { %v38_v27 = vadd.f32 %v37_v26, %v36_v25 }
  0x18   :  { %v39_v28 = vrot.slane %v38_v27, 2 }
  0x1a   :  { %v40_v29 = vadd.f32 %v39_v28, %v38_v27 }
  0x1c   :  { %v41_v30 = vrot.slane %v40_v29, 1 }
  0x1e   :  { %v42_v31 = vadd.f32 %v41_v30, %v40_v29 }
  0x20   :  { %112 = vrsqrt.f32 %v42_v31  ;;  %vm49_vm0 = vweird.f32 %v42_v31 }
  0x26   :  { %v113_v32 = vpop.eup %112 }
  0x27   :  { %v44_v33 = vmul.f32 %v113_v32, %v42_v31  ;;  %vm50_vm1 = vweird.f32 %v113_v32 }
  0x28   :  { %vm51_vm2 = vmor %vm49_vm0, %vm50_vm1 }
  0x29   :  { %v45_v34 = vmul.f32 %v113_v32, %v44_v33 }
  0x2b   :  { %v46_v35 = vmul.f32 0.5, %v45_v34 }
  0x2d   :  { %v47_v36 = vsub.f32 1.5, %v46_v35 }
  0x2f   :  { %v48_v37 = vmul.f32 %v113_v32, %v47_v36 }
  0x31   :  { %v52_v39 = vsel %vm51_vm2, %v113_v32, %v48_v37 }
  0x32   :  { %v54_v40 = vmul.f32 %v53_v38, %v52_v39 }
  0x34   :  { %v56_v41 = vperm.slane %v54_v40, 0 }
  0x36   :  { %v58_v42 = vmul.f32 %v56_v41, %v11_v0  ;;  %v59_v43 = vmul.f32 %v56_v41, %v12_v1  ;;  %v60_v44 = vmul.f32 %v56_v41, %v13_v2  ;;  %v61_v45 = vmul.f32 %v56_v41, %v14_v3 }
  0x37   :  { %v62_v46 = vmul.f32 %v56_v41, %v15_v7  ;;  %v63_v47 = vmul.f32 %v56_v41, %v16_v10  ;;  %v64_v48 = vmul.f32 %v56_v41, %v17_v13  ;;  %v65_v49 = vmul.f32 %v56_v41, %v18_v16 }
  0x38   :  { %v92_v50 = vpack.c.bf16 %v59_v43, %v58_v42  ;;  %v97_v51 = vpack.c.bf16 %v61_v45, %v60_v44  ;;  %v66_v52 = vmul.f32 %v56_v41, %v19_v19 }
  0x39   :  { %v102_v53 = vpack.c.bf16 %v63_v47, %v62_v46  ;;  %v107_v54 = vpack.c.bf16 %v65_v49, %v64_v48 }
  0x3a   :  { %93 = vst [vmem:[%s176_s2] sm:$0xff] %v92_v50   ;;  %v75_v55 = vpack.c.bf16 %v66_v52, %v66_v52 }
  0x3b   :  { %109 = vst [vmem:[%s176_s2 + $0x8] sm:$0xff] %v97_v51  }
  0x3c   :  { %110 = vst [vmem:[%s176_s2 + $0x10] sm:$0xff] %v102_v53  }
  0x3d   :  { %111 = vst [vmem:[%s176_s2 + $0x18] sm:$0xff] %v107_v54  }
  0x3e   :  { %84 = vst [vmem:[%s176_s2 + $0x20] sm:$0xf] %v75_v55 }

// kernel: weight_norm_conv2d.3
= control target key start
LH: loop header
LB: loop body
LE: loop exit
PB: predicated region body
PF: predicated region fallthrough
CT: control target
= control target key end

     0   :  { %s5625_s12 = smov 0   ;;  %s5627_s13 = smov 0   ;;  %s7223_s0 = inlined_call_operand.vmem [shape: bf16[2,434,8], index: 0, kind: input, shape index: {}]   ;;  %s7224_s1 = inlined_call_operand.vmem [shape: bf16[9,8,128], index: 1, kind: input, shape index: {}]   ;;  %s7225_s2 = inlined_call_operand.vmem [shape: f32[1,128], index: 2, kind: input, shape index: {}]   ;;  %s7226_s3 = inlined_call_operand.vmem [shape: f32[2,384,128], index: 3, kind: output, shape index: {}]  }
   0x1   :  { %s5629_s14 = smov 0  }
   0x2 LB: > { %s32_s15 = sadd.s32 1, %s5599_s13  ;;  %p4824_p0 = scmp.ge.s32.totalorder %s5603_s14, 1  ;;  %s5603_s14 = sphi %s5629_s14, %s13_s14   ;;  %s5599_s13 = sphi %s5627_s13, %s7228_s13   ;;  %s5595_s12 = sphi %s5625_s12, %s7227_s12  }
   0x3   : > { %p34_p1 = scmp.ge.s32.totalorder %s32_s15, 2  ;;  %p160_p2 = scmp.lt.s32.totalorder %s5603_s14, 3 }
   0x5   : > { %s7230_s15 = smov (%p34_p1, %s32_s15), 0  ;;  %p161_p3 = pnand %p4824_p0, %p160_p2 }
   0x6   : > { %p191_p4 = scmp.lt.s32.totalorder (!%p161_p3), %s5595_s12, 1 }
   0x7   : > { %164 = sbr.rel (%p161_p3) target bundleno = 1056 (0x420), region = 32 }
   0xc   : > { %v316_v0 = vld [vmem:[%s7224_s1] sm:$0xf]  ;;  %vm516_vm0 = vcmask 1043456   ;;  %v4948_v2 = vld [vmem:[%s7224_s1 + $0x4] sm:$0xf]  ;;  %s7232_s12 = smov (!%p191_p4, %s5595_s12), 1 }
   0xd   : > { %v518_v1 = vsel %vm516_vm0, %v316_v0, 0  ;;  %v4974_v3 = vld [vmem:[%s7224_s1 + $0x8] sm:$0xf]  ;;  %v799_v4 = vsel %vm516_vm0, %v4948_v2, 0  ;;  %v5171_v6 = vld [vmem:[%s7224_s1 + $0x10] sm:$0xf] }
   0xe   : > { %5520 = vmatpush.bf16.msra.mxu1 %v518_v1  ;;  %5521 = vmatpush.bf16.msra.mxu2 %v518_v1  ;;  %v1276_v5 = vsel %vm516_vm0, %v4974_v3, 0  ;;  %v2286_v7 = vsel %vm516_vm0, %v5171_v6, 0  ;;  %s5523_s24 = smul.u32 220, %s7232_s12  ;;  %vm440_vm1 = vcmask 64512   ;;  %v5049_v16 = vld [vmem:[%s7224_s1 + $0xc] sm:$0xf] }
   0xf   : > { %527 = vmatpush.bf16.msra.mxu0 %v518_v1  ;;  %5522 = vmatpush.bf16.msra.mxu3 %v518_v1  ;;  %v2005_v17 = vsel %vm516_vm0, %v5049_v16, 0  ;;  %v5197_v36 = vld [vmem:[%s7224_s1 + $0x14] sm:$0xf]  ;;  %v5394_v42 = vld [vmem:[%s7224_s1 + $0x1c] sm:$0xf]  ;;  %s5524_s11 = smul.u32 384, %s7232_s12 }
  0x10   : > { %s5665_s27 = scalar_lea.vmem %s7223_s0, %s5523_s24  ;;  %v2762_v37 = vsel %vm516_vm0, %v5197_v36, 0  ;;  %v5272_v43 = vld [vmem:[%s7224_s1 + $0x18] sm:$0xf]  ;;  %v3771_v44 = vsel %vm516_vm0, %v5394_v42, 0  ;;  %v5420_v46 = vld [vmem:[%s7224_s1 + $0x20] sm:$0xf] }
  0x11   : > { %v5668_v8 = vld [vmem:[%s5665_s27 + $0x38] sm:$0xff]  ;;  %v5671_v9 = vld [vmem:[%s5665_s27 + $0x70] sm:$0xff]  ;;  %v5674_v10 = vld [vmem:[%s5665_s27] sm:$0xff]  ;;  %v3490_v45 = vsel %vm516_vm0, %v5272_v43, 0  ;;  %v4247_v47 = vsel %vm516_vm0, %v5420_v46, 0  ;;  %s5816_s20 = scalar_lea.vmem %s7226_s3, %s5524_s11  ;;  %vm1031_vm2 = vcmask 1046528  }
  0x12   : > { %808 = vmatpush.bf16.msrb.mxu1 %v799_v4  ;;  %1285 = vmatpush.bf16.msrb.mxu2 %v1276_v5  ;;  %v5469_v11 = vld [vmem:[%s5665_s27 + $0xa8] sm:$0xff]  ;;  %v5685_v12 = vld [vmem:[%s5665_s27 + $0x40] sm:$0xff]  ;;  %v5688_v13 = vld [vmem:[%s5665_s27 + $0x78] sm:$0xff]  ;;  %vm1508_vm3 = vcmask 1045504  }
  0x13   : > { %2295 = vmatpush.bf16.msrb.mxu0 %v2286_v7  ;;  %4930 = vmatmul.msk.bf16.vlgmr.msra.gmra.mxu1 %vm440_vm1, %v5668_v8  ;;  %v5691_v14 = vld [vmem:[%s5665_s27 + $0x8] sm:$0xff]  ;;  %v5470_v15 = vld [vmem:[%s5665_s27 + $0xb0] sm:$0xff]  ;;  %v5709_v19 = vld [vmem:[%s5665_s27 + $0x80] sm:$0xff] }
  0x14   : > { %4937 = vmatmul.msk.bf16.vlgmr.msra.gmra.mxu2 %vm440_vm1, %v5671_v9  ;;  %4923 = vmatmul.msk.bf16.vlgmr.msra.gmra.mxu0 %vm440_vm1, %v5674_v10  ;;  %v5706_v18 = vld [vmem:[%s5665_s27 + $0x48] sm:$0xff]  ;;  %v5712_v20 = vld [vmem:[%s5665_s27 + $0x10] sm:$0xff]  ;;  %v5471_v21 = vld [vmem:[%s5665_s27 + $0xb8] sm:$0xff] }
  0x15   : > { %4944 = vmatmul.msk.bf16.vlgmr.msra.gmra.mxu3 %vm440_vm1, %v5469_v11  ;;  %v5723_v22 = vld [vmem:[%s5665_s27 + $0x50] sm:$0xff]  ;;  %v5465_v23 = vld [vmem:[%s5665_s27 + $0x88] sm:$0xff]  ;;  %v315_v24 = vld [vmem:[%s5665_s27 + $0xc0] sm:$0x1] }
  0x16   : > { %2014 = vmatpush.bf16.msrb.mxu3 %v2005_v17  ;;  %v5728_v25 = vld [vmem:[%s5665_s27 + $0x18] sm:$0xff]  ;;  %v414_v26 = vunpack.c.l.b16 %v315_v24  ;;  %v5466_v29 = vld [vmem:[%s5665_s27 + $0x90] sm:$0xff]  ;;  %v5744_v30 = vld [vmem:[%s5665_s27 + $0x20] sm:$0xff]  ;;  %2771 = vmatpush.bf16.msra.mxu1 %v2762_v37 }
  0x17   : > { %v5740_v28 = vld [vmem:[%s5665_s27 + $0x58] sm:$0xff]  ;;  %v5472_v31 = vld [vmem:[%s5665_s27 + $0xc] sm:$0xff]  ;;  %v5754_v32 = vld [vmem:[%s5665_s27 + $0x60] sm:$0xff]  ;;  %3499 = vmatpush.bf16.msra.mxu2 %v3490_v45  ;;  %4256 = vmatpush.bf16.msra.mxu0 %v4247_v47 }
  0x18   : > { %v5730_v27 = vpack.c.b16 %v414_v26, %v414_v26  ;;  %v5467_v33 = vld [vmem:[%s5665_s27 + $0x98] sm:$0xff]  ;;  %v5758_v34 = vld [vmem:[%s5665_s27 + $0x28] sm:$0xff]  ;;  %v5468_v39 = vld [vmem:[%s5665_s27 + $0xa0] sm:$0xff] }
  0x19   : > { %v5473_v35 = vld [vmem:[%s5665_s27 + $0x14] sm:$0xff]  ;;  %v5772_v38 = vld [vmem:[%s5665_s27 + $0x68] sm:$0xff]  ;;  %v5474_v41 = vld [vmem:[%s5665_s27 + $0x1c] sm:$0xff] }
  0x1a   : > { %v5776_v40 = vld [vmem:[%s5665_s27 + $0x30] sm:$0xff]  ;;  %3780 = vmatpush.bf16.msra.mxu3 %v3771_v44  ;;  %v5798_v48 = vld [vmem:[%s5665_s27 + $0x24] sm:$0xff]  ;;  %v5811_v49 = vld [vmem:[%s7225_s2] ss:$0 sm:$0xff] }
  0x1b   : > { %v5822_v53 = vld [vmem:[%s5665_s27 + $0x2c] sm:$0xff]  ;;  %v5844_v2 = vld [vmem:[%s5665_s27 + $0x34] sm:$0xff]  ;;  %v5870_v24 = vld [vmem:[%s5665_s27 + $0x3c] sm:$0xff] }
  0x1c   : > { %v5897_v46 = vld [vmem:[%s5665_s27 + $0x44] sm:$0xff] }
  0x23   : > { %4931 = vmatmul.msk.bf16.gmra.mxu1 %vm440_vm1, %v5685_v12 }
  0x24   : > { %4938 = vmatmul.msk.bf16.gmra.mxu2 %vm440_vm1, %v5688_v13  ;;  %4924 = vmatmul.msk.bf16.gmra.mxu0 %vm440_vm1, %v5691_v14 }
  0x25   : > { %4945 = vmatmul.msk.bf16.gmra.mxu3 %vm440_vm1, %v5470_v15 }
  0x33   : > { %4932 = vmatmul.msk.bf16.gmra.mxu1 %vm440_vm1, %v5706_v18 }
  0x34   : > { %4939 = vmatmul.msk.bf16.gmra.mxu2 %vm440_vm1, %v5709_v19  ;;  %4925 = vmatmul.msk.bf16.gmra.mxu0 %vm440_vm1, %v5712_v20 }
  0x35   : > { %4946 = vmatmul.msk.bf16.gmra.mxu3 %vm440_vm1, %v5471_v21 }
  0x43   : > { %4933 = vmatmul.msk.bf16.gmra.mxu1 %vm440_vm1, %v5723_v22 }
  0x44   : > { %4940 = vmatmul.msk.bf16.gmra.mxu2 %vm440_vm1, %v5465_v23  ;;  %4926 = vmatmul.msk.bf16.gmra.mxu0 %vm440_vm1, %v5728_v25 }
  0x45   : > { %4947 = vmatmul.msk.bf16.gmra.mxu3 %vm440_vm1, %v5730_v27 }
  0x53   : > { %4934 = vmatmul.msk.bf16.gmra.mxu1 %vm440_vm1, %v5740_v28 }
  0x54   : > { %4941 = vmatmul.msk.bf16.gmra.mxu2 %vm440_vm1, %v5466_v29  ;;  %4927 = vmatmul.msk.bf16.gmra.mxu0 %vm440_vm1, %v5744_v30 }
  0x55   : > { %5146 = vmatmul.msk.bf16.vlgmr.msrb.gmra.mxu3 %vm440_vm1, %v5472_v31 }
  0x63   : > { %4935 = vmatmul.msk.bf16.gmra.mxu1 %vm440_vm1, %v5754_v32 }
  0x64   : > { %4942 = vmatmul.msk.bf16.gmra.mxu2 %vm440_vm1, %v5467_v33  ;;  %4928 = vmatmul.msk.bf16.gmra.mxu0 %vm440_vm1, %v5758_v34 }
  0x65   : > { %5147 = vmatmul.msk.bf16.gmra.mxu3 %vm440_vm1, %v5473_v35 }
  0x73   : > { %4936 = vmatmul.msk.bf16.gmra.mxu1 %vm440_vm1, %v5772_v38 }
  0x74   : > { %4943 = vmatmul.msk.bf16.gmra.mxu2 %vm440_vm1, %v5468_v39  ;;  %4929 = vmatmul.msk.bf16.gmra.mxu0 %vm440_vm1, %v5776_v40 }
  0x75   : > { %5148 = vmatmul.msk.bf16.gmra.mxu3 %vm440_vm1, %v5474_v41 }
  0x83   : > { %4949 = vmatmul.msk.bf16.vlgmr.msrb.gmra.mxu1 %vm440_vm1, %v5674_v10 }
  0x84   : > { %4975 = vmatmul.msk.bf16.vlgmr.msrb.gmra.mxu2 %vm440_vm1, %v5674_v10  ;;  %5172 = vmatmul.msk.bf16.vlgmr.msrb.gmra.mxu0 %vm440_vm1, %v5472_v31 }
  0x85   : > { %5149 = vmatmul.msk.bf16.gmra.mxu3 %vm440_vm1, %v5798_v48 }
  0x90   : > { %v564_v50 = vpop.f32.mrf.mxu1 }
  0x91   : > { %v714_v51 = vadd.f32 %v5811_v49, %v564_v50  ;;  %v5819_v52 = vpop.f32.mrf.mxu0 }
  0x93   : > { %762 = vst [vmem:[%s5816_s20 + $0x70] sm:$0xff] %v714_v51  ;;  %4950 = vmatmul.msk.bf16.gmra.mxu1 %vm440_vm1, %v5691_v14 }
  0x94   : > { %4976 = vmatmul.msk.bf16.gmra.mxu2 %vm440_vm1, %v5691_v14  ;;  %5173 = vmatmul.msk.bf16.gmra.mxu0 %vm440_vm1, %v5473_v35 }
  0x95   : > { %5150 = vmatmul.msk.bf16.gmra.mxu3 %vm440_vm1, %v5822_v53 }
  0x97   : > { %v599_v54 = vpop.f32.mrf.mxu2 }
  0x98   : > { %v728_v55 = vadd.f32 %v5811_v49, %v599_v54  ;;  %v566_v56 = vpop.f32.mrf.mxu1  ;;  %v634_v59 = vpop.f32.mrf.mxu3 }
  0x99   : > { %v715_v57 = vadd.f32 %v5811_v49, %v566_v56  ;;  %v5835_v58 = vpop.f32.mrf.mxu0  ;;  %v742_v3 = vadd.f32 %v5811_v49, %v634_v59 }
  0x9a   : > { %776 = vst [vmem:[%s5816_s20 + $0xe0] sm:$0xff] %v728_v55 }
  0x9b   : > { %763 = vst [vmem:[%s5816_s20 + $0x78] sm:$0xff] %v715_v57 }
  0x9c   : > { %790 = vst [vmem:[%s5816_s20 + $0x150] sm:$0xff] %v742_v3 }
  0x9f   : > { %v601_v60 = vpop.f32.mrf.mxu2 }
  0xa0   : > { %v729_v61 = vadd.f32 %v5811_v49, %v601_v60  ;;  %v569_v62 = vpop.f32.mrf.mxu1  ;;  %v636_v1 = vpop.f32.mrf.mxu3 }
  0xa1   : > { %v716_v63 = vadd.f32 %v5811_v49, %v569_v62  ;;  %v5841_v0 = vpop.f32.mrf.mxu0  ;;  %v743_v7 = vadd.f32 %v5811_v49, %v636_v1 }
  0xa2   : > { %777 = vst [vmem:[%s5816_s20 + $0xe8] sm:$0xff] %v729_v61 }
  0xa3   : > { %764 = vst [vmem:[%s5816_s20 + $0x80] sm:$0xff] %v716_v63  ;;  %4951 = vmatmul.msk.bf16.gmra.mxu1 %vm440_vm1, %v5712_v20  ;;  %v5924_v63 = vld [vmem:[%s5665_s27 + $0x4c] sm:$0xff] }
  0xa4   : > { %4977 = vmatmul.msk.bf16.gmra.mxu2 %vm440_vm1, %v5712_v20  ;;  %5174 = vmatmul.msk.bf16.gmra.mxu0 %vm440_vm1, %v5474_v41  ;;  %791 = vst [vmem:[%s5816_s20 + $0x158] sm:$0xff] %v743_v7 }
  0xa5   : > { %5151 = vmatmul.msk.bf16.gmra.mxu3 %vm440_vm1, %v5844_v2 }
  0xa7   : > { %v604_v4 = vpop.f32.mrf.mxu2 }
  0xa8   : > { %v730_v5 = vadd.f32 %v5811_v49, %v604_v4  ;;  %v571_v6 = vpop.f32.mrf.mxu1  ;;  %v639_v14 = vpop.f32.mrf.mxu3 }
  0xa9   : > { %v717_v10 = vadd.f32 %v5811_v49, %v571_v6  ;;  %v5860_v11 = vpop.f32.mrf.mxu0  ;;  %v744_v26 = vadd.f32 %v5811_v49, %v639_v14 }
  0xaa   : > { %778 = vst [vmem:[%s5816_s20 + $0xf0] sm:$0xff] %v730_v5 }
  0xab   : > { %765 = vst [vmem:[%s5816_s20 + $0x88] sm:$0xff] %v717_v10 }
  0xac   : > { %792 = vst [vmem:[%s5816_s20 + $0x160] sm:$0xff] %v744_v26 }
  0xaf   : > { %v606_v15 = vpop.f32.mrf.mxu2 }
  0xb0   : > { %v731_v16 = vadd.f32 %v5811_v49, %v606_v15  ;;  %v574_v17 = vpop.f32.mrf.mxu1  ;;  %v641_v23 = vpop.f32.mrf.mxu3 }
  0xb1   : > { %v718_v20 = vadd.f32 %v5811_v49, %v574_v17  ;;  %v5867_v21 = vpop.f32.mrf.mxu0  ;;  %v745_v35 = vadd.f32 %v5811_v49, %v641_v23  ;;  %v5951_v17 = vld [vmem:[%s5665_s27 + $0x54] sm:$0xff] }
  0xb2   : > { %779 = vst [vmem:[%s5816_s20 + $0xf8] sm:$0xff] %v731_v16 }
  0xb3   : > { %766 = vst [vmem:[%s5816_s20 + $0x90] sm:$0xff] %v718_v20  ;;  %4952 = vmatmul.msk.bf16.gmra.mxu1 %vm440_vm1, %v5728_v25 }
  0xb4   : > { %4978 = vmatmul.msk.bf16.gmra.mxu2 %vm440_vm1, %v5728_v25  ;;  %5175 = vmatmul.msk.bf16.gmra.mxu0 %vm440_vm1, %v5798_v48  ;;  %793 = vst [vmem:[%s5816_s20 + $0x168] sm:$0xff] %v745_v35 }
  0xb5   : > { %5152 = vmatmul.msk.bf16.gmra.mxu3 %vm440_vm1, %v5870_v24 }
  0xb7   : > { %v609_v29 = vpop.f32.mrf.mxu2 }
  0xb8   : > { %v732_v31 = vadd.f32 %v5811_v49, %v609_v29  ;;  %v576_v33 = vpop.f32.mrf.mxu1  ;;  %v644_v37 = vpop.f32.mrf.mxu3 }
  0xb9   : > { %v719_v25 = vadd.f32 %v5811_v49, %v576_v33  ;;  %v5887_v36 = vpop.f32.mrf.mxu0  ;;  %v746_v47 = vadd.f32 %v5811_v49, %v644_v37 }
  0xba   : > { %780 = vst [vmem:[%s5816_s20 + $0x100] sm:$0xff] %v732_v31 }
  0xbb   : > { %767 = vst [vmem:[%s5816_s20 + $0x98] sm:$0xff] %v719_v25 }
  0xbc   : > { %794 = vst [vmem:[%s5816_s20 + $0x170] sm:$0xff] %v746_v47 }
  0xbf   : > { %v611_v39 = vpop.f32.mrf.mxu2 }
  0xc0   : > { %v733_v41 = vadd.f32 %v5811_v49, %v611_v39  ;;  %v579_v42 = vpop.f32.mrf.mxu1  ;;  %v646_v45 = vpop.f32.mrf.mxu3 }
  0xc1   : > { %v720_v43 = vadd.f32 %v5811_v49, %v579_v42  ;;  %v5894_v44 = vpop.f32.mrf.mxu0  ;;  %v747_v54 = vadd.f32 %v5811_v49, %v646_v45 }
  0xc2   : > { %781 = vst [vmem:[%s5816_s20 + $0x108] sm:$0xff] %v733_v41  ;;  %v5978_v41 = vld [vmem:[%s5665_s27 + $0x5c] sm:$0xff] }
  0xc3   : > { %768 = vst [vmem:[%s5816_s20 + $0xa0] sm:$0xff] %v720_v43  ;;  %4953 = vmatmul.msk.bf16.gmra.mxu1 %vm440_vm1, %v5744_v30 }
  0xc4   : > { %4979 = vmatmul.msk.bf16.gmra.mxu2 %vm440_vm1, %v5744_v30  ;;  %5176 = vmatmul.msk.bf16.gmra.mxu0 %vm440_vm1, %v5822_v53  ;;  %795 = vst [vmem:[%s5816_s20 + $0x178] sm:$0xff] %v747_v54 }
  0xc5   : > { %5153 = vmatmul.msk.bf16.gmra.mxu3 %vm440_vm1, %v5897_v46 }
  0xc7   : > { %v614_v48 = vpop.f32.mrf.mxu2 }
  0xc8   : > { %v734_v50 = vadd.f32 %v5811_v49, %v614_v48  ;;  %v581_v51 = vpop.f32.mrf.mxu1  ;;  %v649_v56 = vpop.f32.mrf.mxu3 }
  0xc9   : > { %v721_v30 = vadd.f32 %v5811_v49, %v581_v51  ;;  %v5914_v55 = vpop.f32.mrf.mxu0  ;;  %v6002_v56 = vld [vmem:[%s5665_s27 + $0x64] sm:$0xff] }
  0xca   : > { %782 = vst [vmem:[%s5816_s20 + $0x110] sm:$0xff] %v734_v50 }
  0xcb   : > { %769 = vst [vmem:[%s5816_s20 + $0xa8] sm:$0xff] %v721_v30 }
  0xcf   : > { %v616_v53 = vpop.f32.mrf.mxu2 }
  0xd0   : > { %v735_v57 = vadd.f32 %v5811_v49, %v616_v53  ;;  %v584_v59 = vpop.f32.mrf.mxu1  ;;  %v650_v62 = vpop.f32.mrf.mxu3 }
  0xd1   : > { %v722_v60 = vadd.f32 %v5811_v49, %v584_v59  ;;  %v5921_v61 = vpop.f32.mrf.mxu0 }
  0xd2   : > { %783 = vst [vmem:[%s5816_s20 + $0x118] sm:$0xff] %v735_v57 }
  0xd3   : > { %770 = vst [vmem:[%s5816_s20 + $0xb0] sm:$0xff] %v722_v60  ;;  %4954 = vmatmul.msk.bf16.gmra.mxu1 %vm440_vm1, %v5758_v34 }
  0xd4   : > { %4980 = vmatmul.msk.bf16.gmra.mxu2 %vm440_vm1, %v5758_v34  ;;  %5177 = vmatmul.msk.bf16.gmra.mxu0 %vm440_vm1, %v5844_v2 }
  0xd5   : > { %5154 = vmatmul.msk.bf16.gmra.mxu3 %vm440_vm1, %v5924_v63 }
  0xd7   : > { %v619_v1 = vpop.f32.mrf.mxu2 }
  0xd8   : > { %v736_v3 = vadd.f32 %v5811_v49, %v619_v1  ;;  %v586_v4 = vpop.f32.mrf.mxu1  ;;  %v5940_v7 = vpop.f32.mrf.mxu3 }
  0xd9   : > { %v723_v5 = vadd.f32 %v5811_v49, %v586_v4  ;;  %v5938_v6 = vpop.f32.mrf.mxu0 }
  0xda   : > { %784 = vst [vmem:[%s5816_s20 + $0x120] sm:$0xff] %v736_v3 }
  0xdb   : > { %771 = vst [vmem:[%s5816_s20 + $0xb8] sm:$0xff] %v723_v5 }
  0xdf   : > { %v621_v34 = vpop.f32.mrf.mxu2 }
  0xe0   : > { %v737_v2 = vadd.f32 %v5811_v49, %v621_v34  ;;  %v589_v10 = vpop.f32.mrf.mxu1  ;;  %v5948_v16 = vpop.f32.mrf.mxu3 }
  0xe1   : > { %v724_v14 = vadd.f32 %v5811_v49, %v589_v10  ;;  %v5946_v15 = vpop.f32.mrf.mxu0 }
  0xe2   : > { %785 = vst [vmem:[%s5816_s20 + $0x128] sm:$0xff] %v737_v2 }
  0xe3   : > { %772 = vst [vmem:[%s5816_s20 + $0xc0] sm:$0xff] %v724_v14  ;;  %4955 = vmatmul.msk.bf16.gmra.mxu1 %vm440_vm1, %v5776_v40 }
  0xe4   : > { %4981 = vmatmul.msk.bf16.gmra.mxu2 %vm440_vm1, %v5776_v40  ;;  %5178 = vmatmul.msk.bf16.gmra.mxu0 %vm440_vm1, %v5870_v24 }
  0xe5   : > { %5155 = vmatmul.msk.bf16.gmra.mxu3 %vm440_vm1, %v5951_v17 }
  0xe7   : > { %v624_v20 = vpop.f32.mrf.mxu2 }
  0xe8   : > { %v738_v23 = vadd.f32 %v5811_v49, %v624_v20  ;;  %v591_v26 = vpop.f32.mrf.mxu1  ;;  %v5967_v33 = vpop.f32.mrf.mxu3 }
  0xe9   : > { %v725_v29 = vadd.f32 %v5811_v49, %v591_v26  ;;  %v5965_v31 = vpop.f32.mrf.mxu0 }
  0xea   : > { %786 = vst [vmem:[%s5816_s20 + $0x130] sm:$0xff] %v738_v23 }
  0xeb   : > { %773 = vst [vmem:[%s5816_s20 + $0xc8] sm:$0xff] %v725_v29 }
  0xef   : > { %v626_v40 = vpop.f32.mrf.mxu2 }
  0xf0   : > { %v739_v24 = vadd.f32 %v5811_v49, %v626_v40  ;;  %v594_v35 = vpop.f32.mrf.mxu1  ;;  %v5975_v39 = vpop.f32.mrf.mxu3  ;;  %v6021_v40 = vld [vmem:[%s5665_s27 + $0x6c] sm:$0xff] }
  0xf1   : > { %v726_v25 = vadd.f32 %v5811_v49, %v594_v35  ;;  %v5973_v37 = vpop.f32.mrf.mxu0 }
  0xf2   : > { %787 = vst [vmem:[%s5816_s20 + $0x138] sm:$0xff] %v739_v24 }
  0xf3   : > { %774 = vst [vmem:[%s5816_s20 + $0xd0] sm:$0xff] %v726_v25  ;;  %4956 = vmatmul.msk.bf16.gmra.mxu1 %vm440_vm1, %v5668_v8 }
  0xf4   : > { %4982 = vmatmul.msk.bf16.gmra.mxu2 %vm440_vm1, %v5668_v8  ;;  %5179 = vmatmul.msk.bf16.gmra.mxu0 %vm440_vm1, %v5897_v46 }
  0xf5   : > { %5156 = vmatmul.msk.bf16.gmra.mxu3 %vm440_vm1, %v5978_v41 }
  0xf7   : > { %v629_v42 = vpop.f32.mrf.mxu2 }
  0xf8   : > { %v740_v43 = vadd.f32 %v5811_v49, %v629_v42  ;;  %v596_v45 = vpop.f32.mrf.mxu1  ;;  %v5994_v50 = vpop.f32.mrf.mxu3  ;;  %v701_v42 = vadd.f32 %v5811_v49, %v5835_v58 }
  0xf9   : > { %v727_v47 = vadd.f32 %v5811_v49, %v596_v45  ;;  %v5992_v48 = vpop.f32.mrf.mxu0 }
  0xfa   : > { %788 = vst [vmem:[%s5816_s20 + $0x140] sm:$0xff] %v740_v43 }
  0xfb   : > { %775 = vst [vmem:[%s5816_s20 + $0xd8] sm:$0xff] %v727_v47 }
  0xff   : > { %v631_v8 = vpop.f32.mrf.mxu2 }
 0x100   : > { %v741_v51 = vadd.f32 %v5811_v49, %v631_v8  ;;  %v810_v46 = vpop.f32.mrf.mxu1  ;;  %v5999_v30 = vpop.f32.mrf.mxu3 }
 0x101   : > { %v2297_v54 = vpop.f32.mrf.mxu0  ;;  %v1032_v1 = vrot.slane %v810_v46, 1 }
 0x102   : > { %789 = vst [vmem:[%s5816_s20 + $0x148] sm:$0xff] %v741_v51  ;;  %v2518_v24 = vrot.slane %v2297_v54, 1 }
 0x103   : > { %4957 = vmatmul.msk.bf16.gmra.mxu1 %vm440_vm1, %v5685_v12 }
 0x104   : > { %4983 = vmatmul.msk.bf16.gmra.mxu2 %vm440_vm1, %v5685_v12  ;;  %5180 = vmatmul.msk.bf16.gmra.mxu0 %vm440_vm1, %v5924_v63  ;;  %v700_v12 = vadd.f32 %v5811_v49, %v5819_v52 }
 0x105   : > { %5157 = vmatmul.msk.bf16.gmra.mxu3 %vm440_vm1, %v6002_v56 }
 0x107   : > { %v1287_v53 = vpop.f32.mrf.mxu2 }
 0x108   : > { %v812_v57 = vpop.f32.mrf.mxu1  ;;  %v6012_v62 = vpop.f32.mrf.mxu3  ;;  %v1509_v63 = vrot.slane %v1287_v53, 2 }
 0x109   : > { %v1033_v59 = vrot.slane %v812_v57, 1  ;;  %v2299_v60 = vpop.f32.mrf.mxu0 }
 0x10a   : > { %v2519_v20 = vrot.slane %v2299_v60, 1  ;;  %v702_v60 = vadd.f32 %v5811_v49, %v5841_v0 }
 0x10b   : > { %v1034_v3 = vsel %vm1031_vm2, %v1032_v1, %v1033_v59 }
 0x10c   : > { %v1177_v34 = vadd.f32 %v1034_v3, %v700_v12  ;;  %v2520_v25 = vsel %vm1031_vm2, %v2518_v24, %v2519_v20  ;;  %v703_v24 = vadd.f32 %v5811_v49, %v5860_v11 }
 0x10f   : > { %v1289_v4 = vpop.f32.mrf.mxu2 }
 0x110   : > { %v1510_v5 = vrot.slane %v1289_v4, 2  ;;  %v815_v2 = vpop.f32.mrf.mxu1  ;;  %v6018_v26 = vpop.f32.mrf.mxu3 }
 0x111   : > { %v1035_v14 = vrot.slane %v815_v2, 1  ;;  %v2302_v23 = vpop.f32.mrf.mxu0 }
 0x112   : > { %v1511_v10 = vsel %vm1508_vm3, %v1509_v63, %v1510_v5  ;;  %v2521_v51 = vrot.slane %v2302_v23, 1  ;;  %v6050_v23 = vld [vmem:[%s5665_s27 + $0x74] sm:$0xff] }
 0x113   : > { %v1654_v29 = vadd.f32 %v1511_v10, %v1177_v34  ;;  %4958 = vmatmul.msk.bf16.gmra.mxu1 %vm440_vm1, %v5706_v18  ;;  %v1036_v35 = vsel %vm1031_vm2, %v1033_v59, %v1035_v14 }
 0x114   : > { %4984 = vmatmul.msk.bf16.gmra.mxu2 %vm440_vm1, %v5706_v18  ;;  %5181 = vmatmul.msk.bf16.gmra.mxu0 %vm440_vm1, %v5951_v17  ;;  %v1178_v8 = vadd.f32 %v1036_v35, %v701_v42  ;;  %v2522_v59 = vsel %vm1031_vm2, %v2519_v20, %v2521_v51 }
 0x115   : > { %v2187_v52 = vadd.f32 %v5940_v7, %v1654_v29  ;;  %5158 = vmatmul.msk.bf16.gmra.mxu3 %vm440_vm1, %v6021_v40 }
 0x117   : > { %v2663_v43 = vadd.f32 %v2520_v25, %v2187_v52  ;;  %v1292_v45 = vpop.f32.mrf.mxu2 }
 0x118   : > { %v1512_v47 = vrot.slane %v1292_v45, 2  ;;  %v817_v18 = vpop.f32.mrf.mxu1  ;;  %v6038_v54 = vpop.f32.mrf.mxu3 }
 0x119   : > { %2711 = vst [vmem:[%s5816_s20] sm:$0xff] %v2663_v43  ;;  %v1037_v17 = vrot.slane %v817_v18, 1  ;;  %v2304_v46 = vpop.f32.mrf.mxu0 }
 0x11a   : > { %v1513_v7 = vsel %vm1508_vm3, %v1510_v5, %v1512_v47  ;;  %v2523_v2 = vrot.slane %v2304_v46, 1 }
 0x11b   : > { %v1655_v53 = vadd.f32 %v1513_v7, %v1178_v8  ;;  %v1038_v57 = vsel %vm1031_vm2, %v1035_v14, %v1037_v17 }
 0x11c   : > { %v1179_v4 = vadd.f32 %v1038_v57, %v702_v60  ;;  %v2524_v29 = vsel %vm1031_vm2, %v2521_v51, %v2523_v2 }
 0x11d   : > { %v2188_v58 = vadd.f32 %v5948_v16, %v1655_v53 }
 0x11f   : > { %v2664_v1 = vadd.f32 %v2522_v59, %v2188_v58  ;;  %v1294_v3 = vpop.f32.mrf.mxu2 }
 0x120   : > { %v1514_v12 = vrot.slane %v1294_v3, 2  ;;  %v820_v63 = vpop.f32.mrf.mxu1  ;;  %v6047_v16 = vpop.f32.mrf.mxu3 }
 0x121   : > { %2712 = vst [vmem:[%s5816_s20 + $0x8] sm:$0xff] %v2664_v1  ;;  %v1039_v34 = vrot.slane %v820_v63, 1  ;;  %v2307_v10 = vpop.f32.mrf.mxu0 }
 0x122   : > { %v1515_v5 = vsel %vm1508_vm3, %v1512_v47, %v1514_v12  ;;  %v2525_v43 = vrot.slane %v2307_v10, 1 }
 0x123   : > { %v1656_v14 = vadd.f32 %v1515_v5, %v1179_v4  ;;  %4959 = vmatmul.msk.bf16.gmra.mxu1 %vm440_vm1, %v5723_v22  ;;  %v1040_v20 = vsel %vm1031_vm2, %v1037_v17, %v1039_v34  ;;  %v704_v17 = vadd.f32 %v5811_v49, %v5867_v21  ;;  %v6079_v4 = vld [vmem:[%s5665_s27 + $0x7c] sm:$0xff] }
 0x124   : > { %4985 = vmatmul.msk.bf16.gmra.mxu2 %vm440_vm1, %v5723_v22  ;;  %5182 = vmatmul.msk.bf16.gmra.mxu0 %vm440_vm1, %v5978_v41  ;;  %v1180_v42 = vadd.f32 %v1040_v20, %v703_v24  ;;  %v2526_v7 = vsel %vm1031_vm2, %v2523_v2, %v2525_v43 }
 0x125   : > { %v2189_v0 = vadd.f32 %v5967_v33, %v1656_v14  ;;  %5159 = vmatmul.msk.bf16.gmra.mxu3 %vm440_vm1, %v6050_v23 }
 0x127   : > { %v2665_v52 = vadd.f32 %v2524_v29, %v2189_v0  ;;  %v1297_v35 = vpop.f32.mrf.mxu2 }
 0x128   : > { %v1516_v25 = vrot.slane %v1297_v35, 2  ;;  %v822_v22 = vpop.f32.mrf.mxu1  ;;  %v6067_v47 = vpop.f32.mrf.mxu3 }
 0x129   : > { %2713 = vst [vmem:[%s5816_s20 + $0x10] sm:$0xff] %v2665_v52  ;;  %v1041_v41 = vrot.slane %v822_v22, 1  ;;  %v2309_v45 = vpop.f32.mrf.mxu0 }
 0x12a   : > { %v1517_v33 = vsel %vm1508_vm3, %v1514_v12, %v1516_v25  ;;  %v2527_v1 = vrot.slane %v2309_v45, 1 }
 0x12b   : > { %v1657_v8 = vadd.f32 %v1517_v33, %v1180_v42  ;;  %v1042_v18 = vsel %vm1031_vm2, %v1039_v34, %v1041_v41  ;;  %v705_v34 = vadd.f32 %v5811_v49, %v5887_v36  ;;  %v706_v42 = vadd.f32 %v5811_v49, %v5894_v44 }
 0x12c   : > { %v1181_v58 = vadd.f32 %v1042_v18, %v704_v17  ;;  %v2528_v5 = vsel %vm1031_vm2, %v2525_v43, %v2527_v1 }
 0x12d   : > { %v2190_v11 = vadd.f32 %v5975_v39, %v1657_v8 }
 0x12f   : > { %v2666_v51 = vadd.f32 %v2526_v7, %v2190_v11  ;;  %v1299_v46 = vpop.f32.mrf.mxu2 }
 0x130   : > { %v1518_v53 = vrot.slane %v1299_v46, 2  ;;  %v825_v57 = vpop.f32.mrf.mxu1  ;;  %v6076_v39 = vpop.f32.mrf.mxu3 }
 0x131   : > { %2714 = vst [vmem:[%s5816_s20 + $0x18] sm:$0xff] %v2666_v51  ;;  %v1043_v60 = vrot.slane %v825_v57, 1  ;;  %v2312_v3 = vpop.f32.mrf.mxu0  ;;  %v6108_v51 = vld [vmem:[%s5665_s27 + $0x84] sm:$0xff] }
 0x132   : > { %v1519_v59 = vsel %vm1508_vm3, %v1516_v25, %v1518_v53  ;;  %v2529_v20 = vrot.slane %v2312_v3, 1 }
 0x133   : > { %v1658_v12 = vadd.f32 %v1519_v59, %v1181_v58  ;;  %4960 = vmatmul.msk.bf16.gmra.mxu1 %vm440_vm1, %v5740_v28  ;;  %v1044_v63 = vsel %vm1031_vm2, %v1041_v41, %v1043_v60  ;;  %v707_v58 = vadd.f32 %v5811_v49, %v5914_v55 }
 0x134   : > { %4986 = vmatmul.msk.bf16.gmra.mxu2 %vm440_vm1, %v5740_v28  ;;  %5183 = vmatmul.msk.bf16.gmra.mxu0 %vm440_vm1, %v6002_v56  ;;  %v1182_v0 = vadd.f32 %v1044_v63, %v705_v34  ;;  %v2530_v25 = vsel %vm1031_vm2, %v2527_v1, %v2529_v20 }
 0x135   : > { %v2191_v21 = vadd.f32 %v5994_v50, %v1658_v12  ;;  %5160 = vmatmul.msk.bf16.gmra.mxu3 %vm440_vm1, %v6079_v4 }
 0x137   : > { %v2667_v2 = vadd.f32 %v2528_v5, %v2191_v21  ;;  %v1302_v10 = vpop.f32.mrf.mxu2 }
 0x138   : > { %v1520_v14 = vrot.slane %v1302_v10, 2  ;;  %v827_v28 = vpop.f32.mrf.mxu1  ;;  %v6096_v24 = vpop.f32.mrf.mxu3 }
 0x139   : > { %2715 = vst [vmem:[%s5816_s20 + $0x20] sm:$0xff] %v2667_v2  ;;  %v1045_v56 = vrot.slane %v827_v28, 1  ;;  %v2314_v29 = vpop.f32.mrf.mxu0  ;;  %v708_v2 = vadd.f32 %v5811_v49, %v5921_v61 }
 0x13a   : > { %v1521_v50 = vsel %vm1508_vm3, %v1518_v53, %v1520_v14  ;;  %v2531_v18 = vrot.slane %v2314_v29, 1 }
 0x13b   : > { %v1659_v52 = vadd.f32 %v1521_v50, %v1182_v0  ;;  %v1046_v35 = vsel %vm1031_vm2, %v1043_v60, %v1045_v56 }
 0x13c   : > { %v1183_v43 = vadd.f32 %v1046_v35, %v706_v42  ;;  %v2532_v53 = vsel %vm1031_vm2, %v2529_v20, %v2531_v18  ;;  %v6137_v35 = vld [vmem:[%s5665_s27 + $0x8c] sm:$0xff] }
 0x13d   : > { %v2192_v36 = vadd.f32 %v5999_v30, %v1659_v52 }
 0x13f   : > { %v2668_v22 = vadd.f32 %v2530_v25, %v2192_v36  ;;  %v1304_v33 = vpop.f32.mrf.mxu2 }
 0x140   : > { %v1522_v41 = vrot.slane %v1304_v33, 2  ;;  %v830_v45 = vpop.f32.mrf.mxu1  ;;  %v6105_v30 = vpop.f32.mrf.mxu3 }
 0x141   : > { %2716 = vst [vmem:[%s5816_s20 + $0x28] sm:$0xff] %v2668_v22  ;;  %v1047_v11 = vrot.slane %v830_v45, 1  ;;  %v2317_v7 = vpop.f32.mrf.mxu0  ;;  %v709_v22 = vadd.f32 %v5811_v49, %v5938_v6 }
 0x142   : > { %v1523_v8 = vsel %vm1508_vm3, %v1520_v14, %v1522_v41  ;;  %v2533_v3 = vrot.slane %v2317_v7, 1 }
 0x143   : > { %v1660_v17 = vadd.f32 %v1523_v8, %v1183_v43  ;;  %4961 = vmatmul.msk.bf16.gmra.mxu1 %vm440_vm1, %v5754_v32  ;;  %v1048_v46 = vsel %vm1031_vm2, %v1045_v56, %v1047_v11 }
 0x144   : > { %4987 = vmatmul.msk.bf16.gmra.mxu2 %vm440_vm1, %v5754_v32  ;;  %5184 = vmatmul.msk.bf16.gmra.mxu0 %vm440_vm1, %v6021_v40  ;;  %v1184_v1 = vadd.f32 %v1048_v46, %v707_v58  ;;  %v2534_v34 = vsel %vm1031_vm2, %v2531_v18, %v2533_v3  ;;  %v710_v46 = vadd.f32 %v5811_v49, %v5946_v15 }
 0x145   : > { %v2193_v44 = vadd.f32 %v6012_v62, %v1660_v17  ;;  %5161 = vmatmul.msk.bf16.gmra.mxu3 %vm440_vm1, %v6108_v51 }
 0x147   : > { %v2669_v57 = vadd.f32 %v2532_v53, %v2193_v44  ;;  %v1307_v59 = vpop.f32.mrf.mxu2 }
 0x148   : > { %v1524_v60 = vrot.slane %v1307_v59, 2  ;;  %v832_v32 = vpop.f32.mrf.mxu1  ;;  %v6125_v21 = vpop.f32.mrf.mxu3 }
 0x149   : > { %2717 = vst [vmem:[%s5816_s20 + $0x30] sm:$0xff] %v2669_v57  ;;  %v1049_v40 = vrot.slane %v832_v32, 1  ;;  %v2319_v12 = vpop.f32.mrf.mxu0 }
 0x14a   : > { %v1525_v62 = vsel %vm1508_vm3, %v1522_v41, %v1524_v60  ;;  %v2535_v29 = vrot.slane %v2319_v12, 1  ;;  %v6166_v12 = vld [vmem:[%s5665_s27 + $0x94] sm:$0xff] }
 0x14b   : > { %v1661_v63 = vadd.f32 %v1525_v62, %v1184_v1  ;;  %v1050_v5 = vsel %vm1031_vm2, %v1047_v11, %v1049_v40 }
 0x14c   : > { %v1185_v28 = vadd.f32 %v1050_v5, %v708_v2  ;;  %v2536_v42 = vsel %vm1031_vm2, %v2533_v3, %v2535_v29  ;;  %v711_v5 = vadd.f32 %v5811_v49, %v5965_v31 }
 0x14d   : > { %v2194_v55 = vadd.f32 %v6018_v26, %v1661_v63 }
 0x14f   : > { %v2670_v10 = vadd.f32 %v2534_v34, %v2194_v55  ;;  %v1309_v14 = vpop.f32.mrf.mxu2 }
 0x150   : > { %v1526_v0 = vrot.slane %v1309_v14, 2  ;;  %v835_v50 = vpop.f32.mrf.mxu1  ;;  %v6134_v26 = vpop.f32.mrf.mxu3 }
 0x151   : > { %2718 = vst [vmem:[%s5816_s20 + $0x38] sm:$0xff] %v2670_v10  ;;  %v1051_v20 = vrot.slane %v835_v50, 1  ;;  %v2322_v52 = vpop.f32.mrf.mxu0 }
 0x152   : > { %v1527_v56 = vsel %vm1508_vm3, %v1524_v60, %v1526_v0  ;;  %v2537_v8 = vrot.slane %v2322_v52, 1  ;;  %v712_v52 = vadd.f32 %v5811_v49, %v5973_v37 }
 0x153   : > { %v1662_v36 = vadd.f32 %v1527_v56, %v1185_v28  ;;  %4962 = vmatmul.msk.bf16.gmra.mxu1 %vm440_vm1, %v5772_v38  ;;  %v1052_v25 = vsel %vm1031_vm2, %v1049_v40, %v1051_v20 }
 0x154   : > { %4988 = vmatmul.msk.bf16.gmra.mxu2 %vm440_vm1, %v5772_v38  ;;  %5185 = vmatmul.msk.bf16.gmra.mxu0 %vm440_vm1, %v6050_v23  ;;  %v1186_v45 = vadd.f32 %v1052_v25, %v709_v22  ;;  %v2538_v44 = vsel %vm1031_vm2, %v2535_v29, %v2537_v8 }
 0x155   : > { %v2195_v61 = vadd.f32 %v6038_v54, %v1662_v36  ;;  %5162 = vmatmul.msk.bf16.gmra.mxu3 %vm440_vm1, %v6137_v35 }
 0x157   : > { %v2671_v33 = vadd.f32 %v2536_v42, %v2195_v61  ;;  %v1312_v41 = vpop.f32.mrf.mxu2 }
 0x158   : > { %v1528_v43 = vrot.slane %v1312_v41, 2  ;;  %v837_v38 = vpop.f32.mrf.mxu1  ;;  %v6154_v18 = vpop.f32.mrf.mxu3 }
 0x159   : > { %2719 = vst [vmem:[%s5816_s20 + $0x40] sm:$0xff] %v2671_v33  ;;  %v1053_v23 = vrot.slane %v837_v38, 1  ;;  %v2324_v11 = vpop.f32.mrf.mxu0 }
 0x15a   : > { %v1529_v54 = vsel %vm1508_vm3, %v1526_v0, %v1528_v43  ;;  %v2539_v62 = vrot.slane %v2324_v11, 1  ;;  %v713_v11 = vadd.f32 %v5811_v49, %v5992_v48 }
 0x15b   : > { %v1663_v7 = vadd.f32 %v1529_v54, %v1186_v45  ;;  %v1054_v17 = vsel %vm1031_vm2, %v1051_v20, %v1053_v23  ;;  %v6195_v54 = vld [vmem:[%s5665_s27 + $0x9c] sm:$0xff] }
 0x15c   : > { %v1187_v59 = vadd.f32 %v1054_v17, %v710_v46  ;;  %v2540_v55 = vsel %vm1031_vm2, %v2537_v8, %v2539_v62 }
 0x15d   : > { %v2196_v6 = vadd.f32 %v6047_v16, %v1663_v7 }
 0x15f   : > { %v2672_v53 = vadd.f32 %v2538_v44, %v2196_v6  ;;  %v1314_v58 = vpop.f32.mrf.mxu2 }
 0x160   : > { %v1530_v57 = vrot.slane %v1314_v58, 2  ;;  %v840_v60 = vpop.f32.mrf.mxu1  ;;  %v6163_v16 = vpop.f32.mrf.mxu3 }
 0x161   : > { %2720 = vst [vmem:[%s5816_s20 + $0x48] sm:$0xff] %v2672_v53  ;;  %v1055_v32 = vrot.slane %v840_v60, 1  ;;  %v2327_v40 = vpop.f32.mrf.mxu0 }
 0x162   : > { %v1531_v1 = vsel %vm1508_vm3, %v1528_v43, %v1530_v57  ;;  %v2541_v0 = vrot.slane %v2327_v40, 1 }
 0x163   : > { %v1664_v3 = vadd.f32 %v1531_v1, %v1187_v59  ;;  %4963 = vmatmul.msk.bf16.gmra.mxu1 %vm440_vm1, %v5671_v9  ;;  %v1056_v63 = vsel %vm1031_vm2, %v1053_v23, %v1055_v32 }
 0x164   : > { %4989 = vmatmul.msk.bf16.gmra.mxu2 %vm440_vm1, %v5671_v9  ;;  %5186 = vmatmul.msk.bf16.gmra.mxu0 %vm440_vm1, %v6079_v4  ;;  %v1188_v14 = vadd.f32 %v1056_v63, %v711_v5  ;;  %v2542_v29 = vsel %vm1031_vm2, %v2539_v62, %v2541_v0 }
 0x165   : > { %v2197_v15 = vadd.f32 %v6067_v47, %v1664_v3  ;;  %5163 = vmatmul.msk.bf16.gmra.mxu3 %vm440_vm1, %v6166_v12 }
 0x167   : > { %v2673_v34 = vadd.f32 %v2540_v55, %v2197_v15  ;;  %v1317_v2 = vpop.f32.mrf.mxu2 }
 0x168   : > { %v1532_v10 = vrot.slane %v1317_v2, 2  ;;  %v842_v9 = vpop.f32.mrf.mxu1  ;;  %v6183_v50 = vpop.f32.mrf.mxu3  ;;  %v6223_v2 = vld [vmem:[%s5665_s27 + $0xa4] sm:$0xff] }
 0x169   : > { %2721 = vst [vmem:[%s5816_s20 + $0x50] sm:$0xff] %v2673_v34  ;;  %v1057_v4 = vrot.slane %v842_v9, 1  ;;  %v2329_v28 = vpop.f32.mrf.mxu0 }
 0x16a   : > { %v1533_v47 = vsel %vm1508_vm3, %v1530_v57, %v1532_v10  ;;  %v2543_v43 = vrot.slane %v2329_v28, 1 }
 0x16b   : > { %v1665_v56 = vadd.f32 %v1533_v47, %v1188_v14  ;;  %v1058_v20 = vsel %vm1031_vm2, %v1055_v32, %v1057_v4  ;;  %v948_v32 = vld [vmem:[%s5816_s20 + $0x70] sm:$0xff] }
 0x16c   : > { %v1189_v42 = vadd.f32 %v1058_v20, %v712_v52  ;;  %v2544_v8 = vsel %vm1031_vm2, %v2541_v0, %v2543_v43  ;;  %v949_v0 = vld [vmem:[%s5816_s20 + $0x78] sm:$0xff] }
 0x16d   : > { %v2198_v31 = vadd.f32 %v6076_v39, %v1665_v56 }
 0x16f   : > { %v2674_v36 = vadd.f32 %v2542_v29, %v2198_v31  ;;  %v1319_v61 = vpop.f32.mrf.mxu2 }
 0x170   : > { %v1534_v25 = vrot.slane %v1319_v61, 2  ;;  %v845_v22 = vpop.f32.mrf.mxu1  ;;  %v6192_v39 = vpop.f32.mrf.mxu3 }
 0x171   : > { %2722 = vst [vmem:[%s5816_s20 + $0x58] sm:$0xff] %v2674_v36  ;;  %v1059_v41 = vrot.slane %v845_v22, 1  ;;  %v2332_v45 = vpop.f32.mrf.mxu0 }
 0x172   : > { %v1535_v33 = vsel %vm1508_vm3, %v1532_v10, %v1534_v25  ;;  %v2545_v46 = vrot.slane %v2332_v45, 1 }
 0x173   : > { %v1666_v38 = vadd.f32 %v1535_v33, %v1189_v42  ;;  %4964 = vmatmul.msk.bf16.gmra.mxu1 %vm440_vm1, %v5688_v13  ;;  %v1060_v23 = vsel %vm1031_vm2, %v1057_v4, %v1059_v41  ;;  %v950_v33 = vld [vmem:[%s5816_s20 + $0x80] sm:$0xff] }
 0x174   : > { %4990 = vmatmul.msk.bf16.gmra.mxu2 %vm440_vm1, %v5688_v13  ;;  %5187 = vmatmul.msk.bf16.gmra.mxu0 %vm440_vm1, %v6108_v51  ;;  %v1190_v13 = vadd.f32 %v1060_v23, %v713_v11  ;;  %v2546_v59 = vsel %vm1031_vm2, %v2543_v43, %v2545_v46 }
 0x175   : > { %v2199_v37 = vadd.f32 %v6096_v24, %v1666_v38  ;;  %5164 = vmatmul.msk.bf16.gmra.mxu3 %vm440_vm1, %v6195_v54 }
 0x177   : > { %v2675_v7 = vadd.f32 %v2544_v8, %v2199_v37  ;;  %v1322_v6 = vpop.f32.mrf.mxu2 }
 0x178   : > { %v1536_v17 = vrot.slane %v1322_v6, 2  ;;  %v847_v24 = vpop.f32.mrf.mxu1  ;;  %v6212_v58 = vpop.f32.mrf.mxu3  ;;  %v5550_v6 = vld [vmem:[%s5665_s27 + $0x88] sm:$0xff] }
 0x179   : > { %2723 = vst [vmem:[%s5816_s20 + $0x60] sm:$0xff] %v2675_v7  ;;  %v1061_v44 = vrot.slane %v847_v24, 1  ;;  %v2334_v53 = vpop.f32.mrf.mxu0  ;;  %v6250_v7 = vld [vmem:[%s5665_s27 + $0xac] sm:$0xff] }
 0x17a   : > { %v1537_v51 = vsel %vm1508_vm3, %v1534_v25, %v1536_v17  ;;  %v2547_v55 = vrot.slane %v2334_v53, 1 }
 0x17b   : > { %v1667_v57 = vadd.f32 %v1537_v51, %v1190_v13  ;;  %v1062_v48 = vsel %vm1031_vm2, %v1059_v41, %v1061_v44 }
 0x17c   : > { %v1191_v40 = vadd.f32 %v1062_v48, %v948_v32  ;;  %v2548_v9 = vsel %vm1031_vm2, %v2545_v46, %v2547_v55  ;;  %v951_v46 = vld [vmem:[%s5816_s20 + $0x88] sm:$0xff] }
 0x17d   : > { %v2200_v49 = vadd.f32 %v6105_v30, %v1667_v57 }
 0x17f   : > { %v2676_v60 = vadd.f32 %v2546_v59, %v2200_v49  ;;  %v1324_v1 = vpop.f32.mrf.mxu2 }
 0x180   : > { %v1538_v62 = vrot.slane %v1324_v1, 2  ;;  %v850_v3 = vpop.f32.mrf.mxu1  ;;  %v6220_v30 = vpop.f32.mrf.mxu3 }
 0x181   : > { %2724 = vst [vmem:[%s5816_s20 + $0x68] sm:$0xff] %v2676_v60  ;;  %v1063_v63 = vrot.slane %v850_v3, 1  ;;  %v2337_v5 = vpop.f32.mrf.mxu0 }
 0x182   : > { %v1539_v15 = vsel %vm1508_vm3, %v1536_v17, %v1538_v62 }
 0x183   : > { %v1668_v34 = vadd.f32 %v1539_v15, %v1191_v40  ;;  %4965 = vmatmul.msk.bf16.gmra.mxu1 %vm440_vm1, %v5709_v19  ;;  %v1064_v14 = vsel %vm1031_vm2, %v1061_v44, %v1063_v63 }
 0x184   : > { %4991 = vmatmul.msk.bf16.gmra.mxu2 %vm440_vm1, %v5709_v19  ;;  %5188 = vmatmul.msk.bf16.gmra.mxu0 %vm440_vm1, %v6137_v35  ;;  %v1192_v56 = vadd.f32 %v1064_v14, %v949_v0  ;;  %v2549_v35 = vrot.slane %v2337_v5, 1  ;;  %v6276_v0 = vld [vmem:[%s5665_s27 + $0xb4] sm:$0xff] }
 0x185   : > { %v2201_v10 = vadd.f32 %v6125_v21, %v1668_v34  ;;  %5165 = vmatmul.msk.bf16.gmra.mxu3 %vm440_vm1, %v6223_v2 }
 0x186   : > { %v2550_v25 = vsel %vm1031_vm2, %v2547_v55, %v2549_v35 }
 0x187   : > { %v2677_v47 = vadd.f32 %v2548_v9, %v2201_v10  ;;  %v1327_v4 = vpop.f32.mrf.mxu2 }
 0x188   : > { %v1540_v28 = vrot.slane %v1327_v4, 2  ;;  %v852_v19 = vpop.f32.mrf.mxu1  ;;  %v6239_v29 = vpop.f32.mrf.mxu3 }
 0x189   : > { %2725 = vst [vmem:[%s5816_s20 + $0x70] sm:$0xff] %v2677_v47  ;;  %v1065_v31 = vrot.slane %v852_v19, 1  ;;  %v2339_v20 = vpop.f32.mrf.mxu0 }
 0x18a   : > { %v1541_v21 = vsel %vm1508_vm3, %v1538_v62, %v1540_v28  ;;  %v2551_v23 = vrot.slane %v2339_v20, 1  ;;  %v953_v20 = vld [vmem:[%s5816_s20 + $0x98] sm:$0xff] }
 0x18b   : > { %v1669_v52 = vadd.f32 %v1541_v21, %v1192_v56  ;;  %v1066_v61 = vsel %vm1031_vm2, %v1063_v63, %v1065_v31  ;;  %v952_v63 = vld [vmem:[%s5816_s20 + $0x90] sm:$0xff] }
 0x18c   : > { %v1193_v43 = vadd.f32 %v1066_v61, %v950_v33  ;;  %v2552_v24 = vsel %vm1031_vm2, %v2549_v35, %v2551_v23 }
 0x18d   : > { %v2202_v36 = vadd.f32 %v6134_v26, %v1669_v52 }
 0x18f   : > { %v2678_v42 = vadd.f32 %v2550_v25, %v2202_v36  ;;  %v1329_v22 = vpop.f32.mrf.mxu2 }
 0x190   : > { %v1542_v41 = vrot.slane %v1329_v22, 2  ;;  %v855_v45 = vpop.f32.mrf.mxu1  ;;  %v6247_v26 = vpop.f32.mrf.mxu3 }
 0x191   : > { %2726 = vst [vmem:[%s5816_s20 + $0x78] sm:$0xff] %v2678_v42  ;;  %v1067_v37 = vrot.slane %v855_v45, 1  ;;  %v2342_v8 = vpop.f32.mrf.mxu0 }
 0x192   : > { %v1543_v38 = vsel %vm1508_vm3, %v1540_v28, %v1542_v41  ;;  %v5551_v28 = vld [vmem:[%s5665_s27 + $0x90] sm:$0xff] }
 0x193   : > { %v1670_v11 = vadd.f32 %v1543_v38, %v1193_v43  ;;  %4966 = vmatmul.msk.bf16.gmra.mxu1 %vm440_vm1, %v5550_v6  ;;  %v1068_v13 = vsel %vm1031_vm2, %v1065_v31, %v1067_v37 }
 0x194   : > { %4992 = vmatmul.msk.bf16.gmra.mxu2 %vm440_vm1, %v5550_v6  ;;  %5189 = vmatmul.msk.bf16.gmra.mxu0 %vm440_vm1, %v6166_v12  ;;  %v1194_v57 = vadd.f32 %v1068_v13, %v951_v46  ;;  %v2553_v12 = vrot.slane %v2342_v8, 1  ;;  %v6302_v46 = vld [vmem:[%s5665_s27 + $0xbc] sm:$0xff] }
 0x195   : > { %v2203_v17 = vadd.f32 %v6154_v18, %v1670_v11  ;;  %5166 = vmatmul.msk.bf16.gmra.mxu3 %vm440_vm1, %v6250_v7 }
 0x196   : > { %v2554_v40 = vsel %vm1031_vm2, %v2551_v23, %v2553_v12  ;;  %v954_v23 = vld [vmem:[%s5816_s20 + $0xa0] sm:$0xff] }
 0x197   : > { %v2679_v51 = vadd.f32 %v2552_v24, %v2203_v17  ;;  %v1332_v44 = vpop.f32.mrf.mxu2 }
 0x198   : > { %v1544_v53 = vrot.slane %v1332_v44, 2  ;;  %v857_v49 = vpop.f32.mrf.mxu1  ;;  %v6265_v60 = vpop.f32.mrf.mxu3 }
 0x199   : > { %2727 = vst [vmem:[%s5816_s20 + $0x80] sm:$0xff] %v2679_v51  ;;  %v1069_v48 = vrot.slane %v857_v49, 1  ;;  %v2344_v59 = vpop.f32.mrf.mxu0 }
 0x19a   : > { %v1545_v18 = vsel %vm1508_vm3, %v1542_v41, %v1544_v53  ;;  %v2555_v9 = vrot.slane %v2344_v59, 1  ;;  %v955_v59 = vld [vmem:[%s5816_s20 + $0xa8] sm:$0xff] }
 0x19b   : > { %v1671_v1 = vadd.f32 %v1545_v18, %v1194_v57  ;;  %v1070_v62 = vsel %vm1031_vm2, %v1067_v37, %v1069_v48 }
 0x19c   : > { %v1195_v5 = vadd.f32 %v1070_v62, %v952_v63  ;;  %v2556_v21 = vsel %vm1031_vm2, %v2553_v12, %v2555_v9 }
 0x19d   : > { %v2204_v32 = vadd.f32 %v6163_v16, %v1671_v1 }
 0x19f   : > { %v2680_v3 = vadd.f32 %v2554_v40, %v2204_v32  ;;  %v1334_v15 = vpop.f32.mrf.mxu2 }
 0x1a0   : > { %v1546_v55 = vrot.slane %v1334_v15, 2  ;;  %v860_v34 = vpop.f32.mrf.mxu1  ;;  %v6273_v16 = vpop.f32.mrf.mxu3 }
 0x1a1   : > { %2728 = vst [vmem:[%s5816_s20 + $0x88] sm:$0xff] %v2680_v3  ;;  %v1071_v14 = vrot.slane %v860_v34, 1  ;;  %v2347_v47 = vpop.f32.mrf.mxu0 }
 0x1a2   : > { %v1547_v10 = vsel %vm1508_vm3, %v1544_v53, %v1546_v55  ;;  %v5552_v53 = vld [vmem:[%s5665_s27 + $0x98] sm:$0xff] }
 0x1a3   : > { %v1672_v4 = vadd.f32 %v1547_v10, %v1195_v5  ;;  %4967 = vmatmul.msk.bf16.gmra.mxu1 %vm440_vm1, %v5551_v28  ;;  %v1072_v19 = vsel %vm1031_vm2, %v1069_v48, %v1071_v14 }
 0x1a4   : > { %4993 = vmatmul.msk.bf16.gmra.mxu2 %vm440_vm1, %v5551_v28  ;;  %5190 = vmatmul.msk.bf16.gmra.mxu0 %vm440_vm1, %v6195_v54  ;;  %v1196_v36 = vadd.f32 %v1072_v19, %v953_v20  ;;  %v2557_v54 = vrot.slane %v2347_v47, 1  ;;  %v6328_v20 = vld [vmem:[%s5665_s27 + $0xc4] sm:$0xff] }
 0x1a5   : > { %v2205_v56 = vadd.f32 %v6183_v50, %v1672_v4  ;;  %5167 = vmatmul.msk.bf16.gmra.mxu3 %vm440_vm1, %v6276_v0 }
 0x1a6   : > { %v2558_v45 = vsel %vm1031_vm2, %v2555_v9, %v2557_v54  ;;  %v956_v9 = vld [vmem:[%s5816_s20 + $0xb0] sm:$0xff] }
 0x1a7   : > { %v2681_v31 = vadd.f32 %v2556_v21, %v2205_v56  ;;  %v1337_v35 = vpop.f32.mrf.mxu2 }
 0x1a8   : > { %v1548_v52 = vrot.slane %v1337_v35, 2  ;;  %v862_v61 = vpop.f32.mrf.mxu1  ;;  %v6291_v22 = vpop.f32.mrf.mxu3 }
 0x1a9   : > { %2729 = vst [vmem:[%s5816_s20 + $0x90] sm:$0xff] %v2681_v31  ;;  %v1073_v25 = vrot.slane %v862_v61, 1  ;;  %v2349_v42 = vpop.f32.mrf.mxu0 }
 0x1aa   : > { %v1549_v50 = vsel %vm1508_vm3, %v1546_v55, %v1548_v52  ;;  %v2559_v24 = vrot.slane %v2349_v42, 1  ;;  %v957_v42 = vld [vmem:[%s5816_s20 + $0xb8] sm:$0xff] }
 0x1ab   : > { %v1673_v33 = vadd.f32 %v1549_v50, %v1196_v36  ;;  %v1074_v43 = vsel %vm1031_vm2, %v1071_v14, %v1073_v25 }
 0x1ac   : > { %v1197_v11 = vadd.f32 %v1074_v43, %v954_v23  ;;  %v2560_v18 = vsel %vm1031_vm2, %v2557_v54, %v2559_v24 }
 0x1ad   : > { %v2206_v41 = vadd.f32 %v6192_v39, %v1673_v33 }
 0x1af   : > { %v2682_v38 = vadd.f32 %v2558_v45, %v2206_v41  ;;  %v1339_v37 = vpop.f32.mrf.mxu2 }
 0x1b0   : > { %v1550_v8 = vrot.slane %v1339_v37, 2  ;;  %v865_v6 = vpop.f32.mrf.mxu1  ;;  %v6299_v39 = vpop.f32.mrf.mxu3 }
 0x1b1   : > { %2730 = vst [vmem:[%s5816_s20 + $0x98] sm:$0xff] %v2682_v38  ;;  %v1075_v13 = vrot.slane %v865_v6, 1  ;;  %v2352_v51 = vpop.f32.mrf.mxu0 }
 0x1b2   : > { %v1551_v17 = vsel %vm1508_vm3, %v1548_v52, %v1550_v8  ;;  %v5553_v52 = vld [vmem:[%s5665_s27 + $0xa0] sm:$0xff] }
 0x1b3   : > { %v1674_v44 = vadd.f32 %v1551_v17, %v1197_v11  ;;  %4968 = vmatmul.msk.bf16.gmra.mxu1 %vm440_vm1, %v5552_v53  ;;  %v1076_v49 = vsel %vm1031_vm2, %v1073_v25, %v1075_v13 }
 0x1b4   : > { %4994 = vmatmul.msk.bf16.gmra.mxu2 %vm440_vm1, %v5552_v53  ;;  %5191 = vmatmul.msk.bf16.gmra.mxu0 %vm440_vm1, %v6223_v2  ;;  %v1198_v32 = vadd.f32 %v1076_v49, %v955_v59  ;;  %v2561_v2 = vrot.slane %v2352_v51, 1 }
 0x1b5   : > { %v2207_v57 = vadd.f32 %v6212_v58, %v1674_v44  ;;  %5168 = vmatmul.msk.bf16.gmra.mxu3 %vm440_vm1, %v6302_v46  ;;  %v5048_v44 = vld [vmem:[%s5665_s27 + $0xcc] sm:$0x1] }
 0x1b6   : > { %v2562_v34 = vsel %vm1031_vm2, %v2559_v24, %v2561_v2  ;;  %v958_v24 = vld [vmem:[%s5816_s20 + $0xc0] sm:$0xff]  ;;  %v1903_v49 = vunpack.c.l.b16 %v5048_v44 }
 0x1b7   : > { %v2683_v48 = vadd.f32 %v2560_v18, %v2207_v57  ;;  %v1342_v12 = vpop.f32.mrf.mxu2 }
 0x1b8   : > { %v1552_v1 = vrot.slane %v1342_v12, 2  ;;  %v867_v62 = vpop.f32.mrf.mxu1  ;;  %v6317_v15 = vpop.f32.mrf.mxu3 }
 0x1b9   : > { %2731 = vst [vmem:[%s5816_s20 + $0xa0] sm:$0xff] %v2683_v48  ;;  %v1077_v40 = vrot.slane %v867_v62, 1  ;;  %v2354_v3 = vpop.f32.mrf.mxu0  ;;  %v5554_v62 = vld [vmem:[%s5665_s27 + $0xa8] sm:$0xff] }
 0x1ba   : > { %v1553_v58 = vsel %vm1508_vm3, %v1550_v8, %v1552_v1  ;;  %v2563_v21 = vrot.slane %v2354_v3, 1 }
 0x1bb   : > { %v1675_v63 = vadd.f32 %v1553_v58, %v1198_v32  ;;  %v1078_v5 = vsel %vm1031_vm2, %v1075_v13, %v1077_v40  ;;  %v6354_v32 = vpack.c.b16 %v1903_v49, %v1903_v49 }
 0x1bc   : > { %v1199_v4 = vadd.f32 %v1078_v5, %v956_v9  ;;  %v2564_v50 = vsel %vm1031_vm2, %v2561_v2, %v2563_v21 }
 0x1bd   : > { %v2208_v55 = vadd.f32 %v6220_v30, %v1675_v63 }
 0x1bf   : > { %v2684_v10 = vadd.f32 %v2562_v34, %v2208_v55  ;;  %v1344_v14 = vpop.f32.mrf.mxu2  ;;  %v959_v55 = vld [vmem:[%s5816_s20 + $0xc8] sm:$0xff] }
 0x1c0   : > { %v1554_v47 = vrot.slane %v1344_v14, 2  ;;  %v870_v28 = vpop.f32.mrf.mxu1  ;;  %v6325_v30 = vpop.f32.mrf.mxu3 }
 0x1c1   : > { %2732 = vst [vmem:[%s5816_s20 + $0xa8] sm:$0xff] %v2684_v10  ;;  %v1079_v19 = vrot.slane %v870_v28, 1  ;;  %v2357_v31 = vpop.f32.mrf.mxu0 }
 0x1c2   : > { %v1555_v56 = vsel %vm1508_vm3, %v1552_v1, %v1554_v47  ;;  %v2565_v45 = vrot.slane %v2357_v31, 1 }
 0x1c3   : > { %v1676_v35 = vadd.f32 %v1555_v56, %v1199_v4  ;;  %4969 = vmatmul.msk.bf16.gmra.mxu1 %vm440_vm1, %v5553_v52  ;;  %v1080_v61 = vsel %vm1031_vm2, %v1077_v40, %v1079_v19 }
 0x1c4   : > { %4995 = vmatmul.msk.bf16.gmra.mxu2 %vm440_vm1, %v5553_v52  ;;  %5192 = vmatmul.msk.bf16.gmra.mxu0 %vm440_vm1, %v6250_v7  ;;  %v1200_v41 = vadd.f32 %v1080_v61, %v957_v42  ;;  %v2566_v6 = vsel %vm1031_vm2, %v2563_v21, %v2565_v45 }
 0x1c5   : > { %v2209_v36 = vadd.f32 %v6239_v29, %v1676_v35  ;;  %5169 = vmatmul.msk.bf16.gmra.mxu3 %vm440_vm1, %v6328_v20  ;;  %v960_v35 = vld [vmem:[%s5816_s20 + $0xd0] sm:$0xff] }
 0x1c7   : > { %v2685_v25 = vadd.f32 %v2564_v50, %v2209_v36  ;;  %v1347_v54 = vpop.f32.mrf.mxu2 }
 0x1c8   : > { %v1556_v33 = vrot.slane %v1347_v54, 2  ;;  %v872_v43 = vpop.f32.mrf.mxu1  ;;  %v6343_v37 = vpop.f32.mrf.mxu3 }
 0x1c9   : > { %2733 = vst [vmem:[%s5816_s20 + $0xb0] sm:$0xff] %v2685_v25  ;;  %v1081_v7 = vrot.slane %v872_v43, 1  ;;  %v2359_v38 = vpop.f32.mrf.mxu0  ;;  %v5555_v43 = vld [vmem:[%s5665_s27 + $0xb0] sm:$0xff] }
 0x1ca   : > { %v1557_v29 = vsel %vm1508_vm3, %v1554_v47, %v1556_v33  ;;  %v2567_v12 = vrot.slane %v2359_v38, 1 }
 0x1cb   : > { %v1677_v23 = vadd.f32 %v1557_v29, %v1200_v41  ;;  %v1082_v11 = vsel %vm1031_vm2, %v1079_v19, %v1081_v7  ;;  %v6380_v41 = vld [vmem:[%s5665_s27 + $0x18] sm:$0xff] }
 0x1cc   : > { %v1201_v53 = vadd.f32 %v1082_v11, %v958_v24  ;;  %v2568_v2 = vsel %vm1031_vm2, %v2565_v45, %v2567_v12 }
 0x1cd   : > { %v2210_v8 = vadd.f32 %v6247_v26, %v1677_v23 }
 0x1cf   : > { %v2686_v17 = vadd.f32 %v2566_v6, %v2210_v8  ;;  %v1349_v13 = vpop.f32.mrf.mxu2  ;;  %v961_v8 = vld [vmem:[%s5816_s20 + $0xd8] sm:$0xff] }
 0x1d0   : > { %v1558_v51 = vrot.slane %v1349_v13, 2  ;;  %v875_v57 = vpop.f32.mrf.mxu1  ;;  %v6352_v59 = vpop.f32.mrf.mxu3 }
 0x1d1   : > { %2734 = vst [vmem:[%s5816_s20 + $0xb8] sm:$0xff] %v2686_v17  ;;  %v1083_v48 = vrot.slane %v875_v57, 1  ;;  %v2362_v26 = vpop.f32.mrf.mxu0 }
 0x1d2   : > { %v1559_v18 = vsel %vm1508_vm3, %v1556_v33, %v1558_v51 }
 0x1d3   : > { %v1678_v1 = vadd.f32 %v1559_v18, %v1201_v53  ;;  %4970 = vmatmul.msk.bf16.gmra.mxu1 %vm440_vm1, %v5554_v62  ;;  %v1084_v40 = vsel %vm1031_vm2, %v1081_v7, %v1083_v48 }
 0x1d4   : > { %4996 = vmatmul.msk.bf16.gmra.mxu2 %vm440_vm1, %v5554_v62  ;;  %5193 = vmatmul.msk.bf16.gmra.mxu0 %vm440_vm1, %v6276_v0  ;;  %v1202_v34 = vadd.f32 %v1084_v40, %v959_v55  ;;  %v2569_v0 = vrot.slane %v2362_v26, 1  ;;  %v6406_v55 = vld [vmem:[%s5665_s27 + $0x20] sm:$0xff] }
 0x1d5   : > { %v2211_v58 = vadd.f32 %v6265_v60, %v1678_v1  ;;  %5170 = vmatmul.msk.bf16.gmra.mxu3 %vm440_vm1, %v6354_v32 }
 0x1d6   : > { %v2570_v19 = vsel %vm1031_vm2, %v2567_v12, %v2569_v0  ;;  %v962_v12 = vld [vmem:[%s5816_s20 + $0xe0] sm:$0xff] }
 0x1d7   : > { %v2687_v3 = vadd.f32 %v2568_v2, %v2211_v58  ;;  %v1352_v63 = vpop.f32.mrf.mxu2 }
 0x1d8   : > { %v1560_v5 = vrot.slane %v1352_v63, 2  ;;  %v877_v10 = vpop.f32.mrf.mxu1  ;;  %v6369_v47 = vpop.f32.mrf.mxu3 }
 0x1d9   : > { %2735 = vst [vmem:[%s5816_s20 + $0xc0] sm:$0xff] %v2687_v3  ;;  %v1085_v14 = vrot.slane %v877_v10, 1  ;;  %v2364_v9 = vpop.f32.mrf.mxu0 }
 0x1da   : > { %v1561_v60 = vsel %vm1508_vm3, %v1558_v51, %v1560_v5  ;;  %v2571_v54 = vrot.slane %v2364_v9, 1  ;;  %v963_v9 = vld [vmem:[%s5816_s20 + $0xe8] sm:$0xff] }
 0x1db   : > { %v1679_v4 = vadd.f32 %v1561_v60, %v1202_v34  ;;  %v1086_v56 = vsel %vm1031_vm2, %v1083_v48, %v1085_v14 }
 0x1dc   : > { %v1203_v36 = vadd.f32 %v1086_v56, %v960_v35  ;;  %v2572_v45 = vsel %vm1031_vm2, %v2569_v0, %v2571_v54 }
 0x1dd   : > { %v2212_v28 = vadd.f32 %v6273_v16, %v1679_v4 }
 0x1df   : > { %v2688_v21 = vadd.f32 %v2570_v19, %v2212_v28  ;;  %v1354_v31 = vpop.f32.mrf.mxu2 }
 0x1e0   : > { %v1562_v52 = vrot.slane %v1354_v31, 2  ;;  %v880_v61 = vpop.f32.mrf.mxu1  ;;  %v6377_v16 = vpop.f32.mrf.mxu3 }
 0x1e1   : > { %2736 = vst [vmem:[%s5816_s20 + $0xc8] sm:$0xff] %v2688_v21  ;;  %v1087_v25 = vrot.slane %v880_v61, 1  ;;  %v2367_v42 = vpop.f32.mrf.mxu0 }
 0x1e2   : > { %v1563_v50 = vsel %vm1508_vm3, %v1560_v5, %v1562_v52  ;;  %v5556_v5 = vld [vmem:[%s5665_s27 + $0xb8] sm:$0xff] }
 0x1e3   : > { %v1680_v33 = vadd.f32 %v1563_v50, %v1203_v36  ;;  %4971 = vmatmul.msk.bf16.gmra.mxu1 %vm440_vm1, %v5555_v43  ;;  %v1088_v7 = vsel %vm1031_vm2, %v1085_v14, %v1087_v25 }
 0x1e4   : > { %4997 = vmatmul.msk.bf16.gmra.mxu2 %vm440_vm1, %v5555_v43  ;;  %5194 = vmatmul.msk.bf16.gmra.mxu0 %vm440_vm1, %v6302_v46  ;;  %v1204_v6 = vadd.f32 %v1088_v7, %v961_v8  ;;  %v2573_v46 = vrot.slane %v2367_v42, 1  ;;  %v6432_v8 = vld [vmem:[%s5665_s27 + $0x28] sm:$0xff] }
 0x1e5   : > { %v2213_v29 = vadd.f32 %v6291_v22, %v1680_v33  ;;  %5395 = vmatmul.msk.bf16.vlgmr.msra.gmra.mxu3 %vm440_vm1, %v6380_v41 }
 0x1e6   : > { %v2574_v49 = vsel %vm1031_vm2, %v2571_v54, %v2573_v46  ;;  %v964_v54 = vld [vmem:[%s5816_s20 + $0xf0] sm:$0xff] }
 0x1e7   : > { %v2689_v38 = vadd.f32 %v2572_v45, %v2213_v29  ;;  %v1357_v23 = vpop.f32.mrf.mxu2 }
 0x1e8   : > { %v1564_v11 = vrot.slane %v1357_v23, 2  ;;  %v882_v17 = vpop.f32.mrf.mxu1  ;;  %v6395_v51 = vpop.f32.mrf.mxu3 }
 0x1e9   : > { %2737 = vst [vmem:[%s5816_s20 + $0xd0] sm:$0xff] %v2689_v38  ;;  %v1089_v13 = vrot.slane %v882_v17, 1  ;;  %v2369_v24 = vpop.f32.mrf.mxu0 }
 0x1ea   : > { %v1565_v22 = vsel %vm1508_vm3, %v1562_v52, %v1564_v11  ;;  %v2575_v2 = vrot.slane %v2369_v24, 1 }
 0x1eb   : > { %v1681_v44 = vadd.f32 %v1565_v22, %v1204_v6  ;;  %v1090_v57 = vsel %vm1031_vm2, %v1087_v25, %v1089_v13 }
 0x1ec   : > { %v1205_v1 = vadd.f32 %v1090_v57, %v962_v12  ;;  %v2576_v60 = vsel %vm1031_vm2, %v2573_v46, %v2575_v2  ;;  %v965_v46 = vld [vmem:[%s5816_s20 + $0xf8] sm:$0xff] }
 0x1ed   : > { %v2214_v53 = vadd.f32 %v6299_v39, %v1681_v44 }
 0x1ef   : > { %v2690_v18 = vadd.f32 %v2574_v49, %v2214_v53  ;;  %v1359_v48 = vpop.f32.mrf.mxu2 }
 0x1f0   : > { %v1566_v26 = vrot.slane %v1359_v48, 2  ;;  %v885_v62 = vpop.f32.mrf.mxu1  ;;  %v6403_v39 = vpop.f32.mrf.mxu3 }
 0x1f1   : > { %2738 = vst [vmem:[%s5816_s20 + $0xd8] sm:$0xff] %v2690_v18  ;;  %v1091_v40 = vrot.slane %v885_v62, 1  ;;  %v2372_v3 = vpop.f32.mrf.mxu0 }
 0x1f2   : > { %v1567_v58 = vsel %vm1508_vm3, %v1564_v11, %v1566_v26 }
 0x1f3   : > { %v1682_v63 = vadd.f32 %v1567_v58, %v1205_v1  ;;  %4972 = vmatmul.msk.bf16.gmra.mxu1 %vm440_vm1, %v5556_v5  ;;  %v1092_v10 = vsel %vm1031_vm2, %v1089_v13, %v1091_v40 }
 0x1f4   : > { %4998 = vmatmul.msk.bf16.gmra.mxu2 %vm440_vm1, %v5556_v5  ;;  %5195 = vmatmul.msk.bf16.gmra.mxu0 %vm440_vm1, %v6328_v20  ;;  %v1206_v28 = vadd.f32 %v1092_v10, %v963_v9  ;;  %v2577_v20 = vrot.slane %v2372_v3, 1  ;;  %v5557_v9 = vld [vmem:[%s5665_s27 + $0xc] sm:$0xff] }
 0x1f5   : > { %v2215_v34 = vadd.f32 %v6317_v15, %v1682_v63  ;;  %5396 = vmatmul.msk.bf16.gmra.mxu3 %vm440_vm1, %v6406_v55 }
 0x1f6   : > { %v2578_v61 = vsel %vm1031_vm2, %v2575_v2, %v2577_v20 }
 0x1f7   : > { %v2691_v14 = vadd.f32 %v2576_v60, %v2215_v34  ;;  %v1362_v0 = vpop.f32.mrf.mxu2 }
 0x1f8   : > { %v1568_v4 = vrot.slane %v1362_v0, 2  ;;  %v887_v56 = vpop.f32.mrf.mxu1  ;;  %v6421_v31 = vpop.f32.mrf.mxu3  ;;  %v6459_v0 = vld [vmem:[%s5665_s27 + $0x30] sm:$0xff] }
 0x1f9   : > { %2739 = vst [vmem:[%s5816_s20 + $0xe0] sm:$0xff] %v2691_v14  ;;  %v1093_v19 = vrot.slane %v887_v56, 1  ;;  %v2374_v21 = vpop.f32.mrf.mxu0 }
 0x1fa   : > { %v1569_v15 = vsel %vm1508_vm3, %v1566_v26, %v1568_v4  ;;  %v2579_v45 = vrot.slane %v2374_v21, 1 }
 0x1fb   : > { %v1683_v35 = vadd.f32 %v1569_v15, %v1206_v28  ;;  %v1094_v36 = vsel %vm1031_vm2, %v1091_v40, %v1093_v19  ;;  %v966_v40 = vld [vmem:[%s5816_s20 + $0x100] sm:$0xff] }
 0x1fc   : > { %v1207_v33 = vadd.f32 %v1094_v36, %v964_v54  ;;  %v2580_v17 = vsel %vm1031_vm2, %v2577_v20, %v2579_v45  ;;  %v967_v20 = vld [vmem:[%s5816_s20 + $0x108] sm:$0xff] }
 0x1fd   : > { %v2216_v52 = vadd.f32 %v6325_v30, %v1683_v35 }
 0x1ff   : > { %v2692_v50 = vadd.f32 %v2578_v61, %v2216_v52  ;;  %v1364_v25 = vpop.f32.mrf.mxu2 }
 0x200   : > { %v1570_v42 = vrot.slane %v1364_v25, 2  ;;  %v890_v43 = vpop.f32.mrf.mxu1  ;;  %v6429_v30 = vpop.f32.mrf.mxu3 }
 0x201   : > { %2740 = vst [vmem:[%s5816_s20 + $0xe8] sm:$0xff] %v2692_v50  ;;  %v1095_v7 = vrot.slane %v890_v43, 1  ;;  %v2377_v38 = vpop.f32.mrf.mxu0 }
 0x202   : > { %v1571_v29 = vsel %vm1508_vm3, %v1568_v4, %v1570_v42  ;;  %v2581_v57 = vrot.slane %v2377_v38, 1 }
 0x203   : > { %v1684_v23 = vadd.f32 %v1571_v29, %v1207_v33  ;;  %4973 = vmatmul.msk.bf16.gmra.mxu1 %vm440_vm1, %v5730_v27  ;;  %v1096_v6 = vsel %vm1031_vm2, %v1093_v19, %v1095_v7 }
 0x204   : > { %4999 = vmatmul.msk.bf16.gmra.mxu2 %vm440_vm1, %v5730_v27  ;;  %5196 = vmatmul.msk.bf16.gmra.mxu0 %vm440_vm1, %v6354_v32  ;;  %v1208_v44 = vadd.f32 %v1096_v6, %v965_v46  ;;  %v2582_v1 = vsel %vm1031_vm2, %v2579_v45, %v2581_v57  ;;  %v6486_v46 = vld [vmem:[%s5665_s27 + $0x38] sm:$0xff] }
 0x205   : > { %v2217_v11 = vadd.f32 %v6343_v37, %v1684_v23  ;;  %5397 = vmatmul.msk.bf16.gmra.mxu3 %vm440_vm1, %v6432_v8 }
 0x207   : > { %v2693_v22 = vadd.f32 %v2580_v17, %v2217_v11  ;;  %v1367_v13 = vpop.f32.mrf.mxu2 }
 0x208   : > { %v1572_v24 = vrot.slane %v1367_v13, 2  ;;  %v892_v27 = vpop.f32.mrf.mxu1  ;;  %v6448_v18 = vpop.f32.mrf.mxu3 }
 0x209   : > { %2741 = vst [vmem:[%s5816_s20 + $0xf0] sm:$0xff] %v2693_v22  ;;  %v1097_v53 = vrot.slane %v892_v27, 1  ;;  %v2379_v49 = vpop.f32.mrf.mxu0 }
 0x20a   : > { %v1573_v37 = vsel %vm1508_vm3, %v1570_v42, %v1572_v24  ;;  %v2583_v10 = vrot.slane %v2379_v49, 1  ;;  %v969_v49 = vld [vmem:[%s5816_s20 + $0x118] sm:$0xff] }
 0x20b   : > { %v1685_v48 = vadd.f32 %v1573_v37, %v1208_v44  ;;  %v1098_v26 = vsel %vm1031_vm2, %v1095_v7, %v1097_v53  ;;  %v968_v7 = vld [vmem:[%s5816_s20 + $0x110] sm:$0xff] }
 0x20c   : > { %v1209_v3 = vadd.f32 %v1098_v26, %v966_v40  ;;  %v2584_v56 = vsel %vm1031_vm2, %v2581_v57, %v2583_v10 }
 0x20d   : > { %v2218_v12 = vadd.f32 %v6352_v59, %v1685_v48 }
 0x20f   : > { %v2694_v62 = vadd.f32 %v2582_v1, %v2218_v12  ;;  %v1369_v58 = vpop.f32.mrf.mxu2 }
 0x210   : > { %v1574_v2 = vrot.slane %v1369_v58, 2  ;;  %v895_v63 = vpop.f32.mrf.mxu1  ;;  %v6456_v59 = vpop.f32.mrf.mxu3 }
 0x211   : > { %2742 = vst [vmem:[%s5816_s20 + $0xf8] sm:$0xff] %v2694_v62  ;;  %v1099_v34 = vrot.slane %v895_v63, 1  ;;  %v2382_v60 = vpop.f32.mrf.mxu0 }
 0x212   : > { %v1575_v5 = vsel %vm1508_vm3, %v1572_v24, %v1574_v2  ;;  %v5558_v24 = vld [vmem:[%s5665_s27 + $0x14] sm:$0xff] }
 0x213   : > { %v1686_v14 = vadd.f32 %v1575_v5, %v1209_v3  ;;  %5198 = vmatmul.msk.bf16.vlgmr.msra.gmra.mxu1 %vm440_vm1, %v5557_v9  ;;  %v1100_v28 = vsel %vm1031_vm2, %v1097_v53, %v1099_v34 }
 0x214   : > { %5369 = vmatmul.msk.bf16.vlgmr.msra.gmra.mxu2 %vm440_vm1, %v6380_v41  ;;  %5421 = vmatmul.msk.bf16.vlgmr.msra.gmra.mxu0 %vm440_vm1, %v6380_v41  ;;  %v1210_v35 = vadd.f32 %v1100_v28, %v967_v20  ;;  %v2585_v41 = vrot.slane %v2382_v60, 1  ;;  %v6513_v20 = vld [vmem:[%s5665_s27 + $0x40] sm:$0xff] }
 0x215   : > { %v2219_v4 = vadd.f32 %v6369_v47, %v1686_v14  ;;  %5398 = vmatmul.msk.bf16.gmra.mxu3 %vm440_vm1, %v6459_v0 }
 0x216   : > { %v2586_v33 = vsel %vm1031_vm2, %v2583_v10, %v2585_v41  ;;  %v970_v10 = vld [vmem:[%s5816_s20 + $0x120] sm:$0xff] }
 0x217   : > { %v2695_v15 = vadd.f32 %v2584_v56, %v2219_v4  ;;  %v1372_v19 = vpop.f32.mrf.mxu2 }
 0x218   : > { %v1576_v21 = vrot.slane %v1372_v19, 2  ;;  %v897_v52 = vpop.f32.mrf.mxu1  ;;  %v6475_v50 = vpop.f32.mrf.mxu3 }
 0x219   : > { %2743 = vst [vmem:[%s5816_s20 + $0x100] sm:$0xff] %v2695_v15  ;;  %v1101_v36 = vrot.slane %v897_v52, 1  ;;  %v2384_v61 = vpop.f32.mrf.mxu0 }
 0x21a   : > { %v1577_v47 = vsel %vm1508_vm3, %v1574_v2, %v1576_v21  ;;  %v2587_v17 = vrot.slane %v2384_v61, 1  ;;  %v971_v61 = vld [vmem:[%s5816_s20 + $0x128] sm:$0xff] }
 0x21b   : > { %v1687_v25 = vadd.f32 %v1577_v47, %v1210_v35  ;;  %v1102_v42 = vsel %vm1031_vm2, %v1099_v34, %v1101_v36 }
 0x21c   : > { %v1211_v38 = vadd.f32 %v1102_v42, %v968_v7  ;;  %v2588_v37 = vsel %vm1031_vm2, %v2585_v41, %v2587_v17 }
 0x21d   : > { %v2220_v54 = vadd.f32 %v6377_v16, %v1687_v25 }
 0x21f   : > { %v2696_v43 = vadd.f32 %v2586_v33, %v2220_v54  ;;  %v1374_v29 = vpop.f32.mrf.mxu2 }
 0x220   : > { %v1578_v45 = vrot.slane %v1374_v29, 2  ;;  %v900_v23 = vpop.f32.mrf.mxu1  ;;  %v6483_v16 = vpop.f32.mrf.mxu3 }
 0x221   : > { %2744 = vst [vmem:[%s5816_s20 + $0x108] sm:$0xff] %v2696_v43  ;;  %v1103_v6 = vrot.slane %v900_v23, 1  ;;  %v2387_v22 = vpop.f32.mrf.mxu0 }
 0x222   : > { %v1579_v11 = vsel %vm1508_vm3, %v1576_v21, %v1578_v45  ;;  %v5559_v21 = vld [vmem:[%s5665_s27 + $0x1c] sm:$0xff] }
 0x223   : > { %v1688_v13 = vadd.f32 %v1579_v11, %v1211_v38  ;;  %5199 = vmatmul.msk.bf16.gmra.mxu1 %vm440_vm1, %v5558_v24  ;;  %v1104_v27 = vsel %vm1031_vm2, %v1101_v36, %v1103_v6 }
 0x224   : > { %5370 = vmatmul.msk.bf16.gmra.mxu2 %vm440_vm1, %v6406_v55  ;;  %5422 = vmatmul.msk.bf16.gmra.mxu0 %vm440_vm1, %v6406_v55  ;;  %v1212_v12 = vadd.f32 %v1104_v27, %v969_v49  ;;  %v2589_v55 = vrot.slane %v2387_v22, 1  ;;  %v6540_v49 = vld [vmem:[%s5665_s27 + $0x48] sm:$0xff] }
 0x225   : > { %v2221_v44 = vadd.f32 %v6395_v51, %v1688_v13  ;;  %5399 = vmatmul.msk.bf16.gmra.mxu3 %vm440_vm1, %v6486_v46 }
 0x226   : > { %v2590_v63 = vsel %vm1031_vm2, %v2587_v17, %v2589_v55  ;;  %v972_v17 = vld [vmem:[%s5816_s20 + $0x130] sm:$0xff] }
 0x227   : > { %v2697_v53 = vadd.f32 %v2588_v37, %v2221_v44  ;;  %v1377_v57 = vpop.f32.mrf.mxu2 }
 0x228   : > { %v1580_v48 = vrot.slane %v1377_v57, 2  ;;  %v902_v26 = vpop.f32.mrf.mxu1  ;;  %v6502_v58 = vpop.f32.mrf.mxu3 }
 0x229   : > { %2745 = vst [vmem:[%s5816_s20 + $0x110] sm:$0xff] %v2697_v53  ;;  %v1105_v1 = vrot.slane %v902_v26, 1  ;;  %v2389_v62 = vpop.f32.mrf.mxu0 }
 0x22a   : > { %v1581_v51 = vsel %vm1508_vm3, %v1578_v45, %v1580_v48  ;;  %v2591_v56 = vrot.slane %v2389_v62, 1  ;;  %v973_v62 = vld [vmem:[%s5816_s20 + $0x138] sm:$0xff] }
 0x22b   : > { %v1689_v40 = vadd.f32 %v1581_v51, %v1212_v12  ;;  %v1106_v3 = vsel %vm1031_vm2, %v1103_v6, %v1105_v1 }
 0x22c   : > { %v1213_v14 = vadd.f32 %v1106_v3, %v970_v10  ;;  %v2592_v47 = vsel %vm1031_vm2, %v2589_v55, %v2591_v56 }
 0x22d   : > { %v2222_v2 = vadd.f32 %v6403_v39, %v1689_v40 }
 0x22f   : > { %v2698_v5 = vadd.f32 %v2590_v63, %v2222_v2  ;;  %v1379_v34 = vpop.f32.mrf.mxu2 }
 0x230   : > { %v1582_v60 = vrot.slane %v1379_v34, 2  ;;  %v905_v9 = vpop.f32.mrf.mxu1  ;;  %v6510_v39 = vpop.f32.mrf.mxu3 }
 0x231   : > { %2746 = vst [vmem:[%s5816_s20 + $0x118] sm:$0xff] %v2698_v5  ;;  %v1107_v28 = vrot.slane %v905_v9, 1  ;;  %v2392_v15 = vpop.f32.mrf.mxu0 }
 0x232   : > { %v1583_v4 = vsel %vm1508_vm3, %v1580_v48, %v1582_v60  ;;  %v5560_v48 = vld [vmem:[%s5665_s27 + $0x24] sm:$0xff] }
 0x233   : > { %v1690_v19 = vadd.f32 %v1583_v4, %v1213_v14  ;;  %5200 = vmatmul.msk.bf16.gmra.mxu1 %vm440_vm1, %v5559_v21  ;;  %v1108_v52 = vsel %vm1031_vm2, %v1105_v1, %v1107_v28 }
 0x234   : > { %5371 = vmatmul.msk.bf16.gmra.mxu2 %vm440_vm1, %v6432_v8  ;;  %5423 = vmatmul.msk.bf16.gmra.mxu0 %vm440_vm1, %v6432_v8  ;;  %v1214_v54 = vadd.f32 %v1108_v52, %v971_v61  ;;  %v2593_v8 = vrot.slane %v2392_v15, 1  ;;  %v6567_v61 = vld [vmem:[%s5665_s27 + $0x50] sm:$0xff] }
 0x235   : > { %v2223_v35 = vadd.f32 %v6421_v31, %v1690_v19  ;;  %5400 = vmatmul.msk.bf16.gmra.mxu3 %vm440_vm1, %v6513_v20 }
 0x236   : > { %v2594_v23 = vsel %vm1031_vm2, %v2591_v56, %v2593_v8  ;;  %v974_v56 = vld [vmem:[%s5816_s20 + $0x140] sm:$0xff] }
 0x237   : > { %v2699_v36 = vadd.f32 %v2592_v47, %v2223_v35  ;;  %v1382_v41 = vpop.f32.mrf.mxu2 }
 0x238   : > { %v1584_v25 = vrot.slane %v1382_v41, 2  ;;  %v907_v42 = vpop.f32.mrf.mxu1  ;;  %v6529_v29 = vpop.f32.mrf.mxu3 }
 0x239   : > { %2747 = vst [vmem:[%s5816_s20 + $0x120] sm:$0xff] %v2699_v36  ;;  %v1109_v33 = vrot.slane %v907_v42, 1  ;;  %v2394_v43 = vpop.f32.mrf.mxu0 }
 0x23a   : > { %v1585_v31 = vsel %vm1508_vm3, %v1582_v60, %v1584_v25  ;;  %v2595_v37 = vrot.slane %v2394_v43, 1  ;;  %v975_v43 = vld [vmem:[%s5816_s20 + $0x148] sm:$0xff] }
 0x23b   : > { %v1691_v7 = vadd.f32 %v1585_v31, %v1214_v54  ;;  %v1110_v38 = vsel %vm1031_vm2, %v1107_v28, %v1109_v33 }
 0x23c   : > { %v1215_v13 = vadd.f32 %v1110_v38, %v972_v17  ;;  %v2596_v51 = vsel %vm1031_vm2, %v2593_v8, %v2595_v37 }
 0x23d   : > { %v2224_v45 = vadd.f32 %v6429_v30, %v1691_v7 }
 0x23f   : > { %v2700_v11 = vadd.f32 %v2594_v23, %v2224_v45  ;;  %v1384_v6 = vpop.f32.mrf.mxu2 }
 0x240   : > { %v1586_v22 = vrot.slane %v1384_v6, 2  ;;  %v910_v24 = vpop.f32.mrf.mxu1  ;;  %v6537_v30 = vpop.f32.mrf.mxu3 }
 0x241   : > { %2748 = vst [vmem:[%s5816_s20 + $0x128] sm:$0xff] %v2700_v11  ;;  %v1111_v27 = vrot.slane %v910_v24, 1  ;;  %v2397_v53 = vpop.f32.mrf.mxu0 }
 0x242   : > { %v1587_v44 = vsel %vm1508_vm3, %v1584_v25, %v1586_v22  ;;  %v5561_v25 = vld [vmem:[%s5665_s27 + $0x2c] sm:$0xff] }
 0x243   : > { %v1692_v57 = vadd.f32 %v1587_v44, %v1215_v13  ;;  %5201 = vmatmul.msk.bf16.gmra.mxu1 %vm440_vm1, %v5560_v48  ;;  %v1112_v26 = vsel %vm1031_vm2, %v1109_v33, %v1111_v27 }
 0x244   : > { %5372 = vmatmul.msk.bf16.gmra.mxu2 %vm440_vm1, %v6459_v0  ;;  %5424 = vmatmul.msk.bf16.gmra.mxu0 %vm440_vm1, %v6459_v0  ;;  %v1216_v2 = vadd.f32 %v1112_v26, %v973_v62  ;;  %v2597_v0 = vrot.slane %v2397_v53, 1  ;;  %v6590_v62 = vld [vmem:[%s5665_s27 + $0x58] sm:$0xff] }
 0x245   : > { %v2225_v12 = vadd.f32 %v6448_v18, %v1692_v57  ;;  %5401 = vmatmul.msk.bf16.gmra.mxu3 %vm440_vm1, %v6540_v49 }
 0x246   : > { %v2598_v9 = vsel %vm1031_vm2, %v2595_v37, %v2597_v0  ;;  %v976_v37 = vld [vmem:[%s5816_s20 + $0x150] sm:$0xff] }
 0x247   : > { %v2701_v1 = vadd.f32 %v2596_v51, %v2225_v12  ;;  %v1387_v55 = vpop.f32.mrf.mxu2 }
 0x248   : > { %v1588_v40 = vrot.slane %v1387_v55, 2  ;;  %v912_v3 = vpop.f32.mrf.mxu1  ;;  %v6556_v34 = vpop.f32.mrf.mxu3 }
 0x249   : > { %2749 = vst [vmem:[%s5816_s20 + $0x130] sm:$0xff] %v2701_v1  ;;  %v1113_v63 = vrot.slane %v912_v3, 1  ;;  %v2399_v5 = vpop.f32.mrf.mxu0 }
 0x24a   : > { %v1589_v18 = vsel %vm1508_vm3, %v1586_v22, %v1588_v40  ;;  %v2599_v47 = vrot.slane %v2399_v5, 1  ;;  %v977_v5 = vld [vmem:[%s5816_s20 + $0x158] sm:$0xff] }
 0x24b   : > { %v1693_v10 = vadd.f32 %v1589_v18, %v1216_v2  ;;  %v1114_v14 = vsel %vm1031_vm2, %v1111_v27, %v1113_v63 }
 0x24c   : > { %v1217_v19 = vadd.f32 %v1114_v14, %v974_v56  ;;  %v2600_v31 = vsel %vm1031_vm2, %v2597_v0, %v2599_v47 }
 0x24d   : > { %v2226_v60 = vadd.f32 %v6456_v59, %v1693_v10 }
 0x24f   : > { %v2702_v4 = vadd.f32 %v2598_v9, %v2226_v60  ;;  %v1389_v28 = vpop.f32.mrf.mxu2 }
 0x250   : > { %v1590_v15 = vrot.slane %v1389_v28, 2  ;;  %v915_v21 = vpop.f32.mrf.mxu1  ;;  %v6564_v59 = vpop.f32.mrf.mxu3 }
 0x251   : > { %2750 = vst [vmem:[%s5816_s20 + $0x138] sm:$0xff] %v2702_v4  ;;  %v1115_v52 = vrot.slane %v915_v21, 1  ;;  %v2402_v36 = vpop.f32.mrf.mxu0 }
 0x252   : > { %v1591_v35 = vsel %vm1508_vm3, %v1588_v40, %v1590_v15  ;;  %v5562_v40 = vld [vmem:[%s5665_s27 + $0x34] sm:$0xff] }
 0x253   : > { %v1694_v41 = vadd.f32 %v1591_v35, %v1217_v19  ;;  %5202 = vmatmul.msk.bf16.gmra.mxu1 %vm440_vm1, %v5561_v25  ;;  %v1116_v42 = vsel %vm1031_vm2, %v1113_v63, %v1115_v52 }
 0x254   : > { %5373 = vmatmul.msk.bf16.gmra.mxu2 %vm440_vm1, %v6486_v46  ;;  %5425 = vmatmul.msk.bf16.gmra.mxu0 %vm440_vm1, %v6486_v46  ;;  %v1218_v45 = vadd.f32 %v1116_v42, %v975_v43  ;;  %v2601_v46 = vrot.slane %v2402_v36, 1  ;;  %v6617_v43 = vld [vmem:[%s5665_s27 + $0x60] sm:$0xff] }
 0x255   : > { %v2227_v54 = vadd.f32 %v6475_v50, %v1694_v41  ;;  %5402 = vmatmul.msk.bf16.gmra.mxu3 %vm440_vm1, %v6567_v61 }
 0x256   : > { %v2602_v24 = vsel %vm1031_vm2, %v2599_v47, %v2601_v46  ;;  %v978_v47 = vld [vmem:[%s5816_s20 + $0x160] sm:$0xff] }
 0x257   : > { %v2703_v33 = vadd.f32 %v2600_v31, %v2227_v54  ;;  %v1392_v8 = vpop.f32.mrf.mxu2 }
 0x258   : > { %v1592_v7 = vrot.slane %v1392_v8, 2  ;;  %v917_v38 = vpop.f32.mrf.mxu1  ;;  %v2136_v6 = vpop.f32.mrf.mxu3 }
 0x259   : > { %2751 = vst [vmem:[%s5816_s20 + $0x140] sm:$0xff] %v2703_v33  ;;  %v1117_v23 = vrot.slane %v917_v38, 1  ;;  %v2404_v11 = vpop.f32.mrf.mxu0 }
 0x25a   : > { %v1593_v50 = vsel %vm1508_vm3, %v1590_v15, %v1592_v7  ;;  %v2603_v51 = vrot.slane %v2404_v11, 1  ;;  %v979_v11 = vld [vmem:[%s5816_s20 + $0x168] sm:$0xff] }
 0x25b   : > { %v1695_v17 = vadd.f32 %v1593_v50, %v1218_v45  ;;  %v1118_v13 = vsel %vm1031_vm2, %v1115_v52, %v1117_v23 }
 0x25c   : > { %v1219_v57 = vadd.f32 %v1118_v13, %v976_v37  ;;  %v2604_v18 = vsel %vm1031_vm2, %v2601_v46, %v2603_v51 }
 0x25d   : > { %v2228_v22 = vadd.f32 %v6483_v16, %v1695_v17 }
 0x25f   : > { %v2704_v44 = vadd.f32 %v2602_v24, %v2228_v22  ;;  %v1394_v27 = vpop.f32.mrf.mxu2 }
 0x260   : > { %v1594_v53 = vrot.slane %v1394_v27, 2  ;;  %v920_v48 = vpop.f32.mrf.mxu1  ;;  %v2137_v16 = vpop.f32.mrf.mxu3 }
 0x261   : > { %2752 = vst [vmem:[%s5816_s20 + $0x148] sm:$0xff] %v2704_v44  ;;  %v1119_v26 = vrot.slane %v920_v48, 1  ;;  %v2407_v1 = vpop.f32.mrf.mxu0 }
 0x262   : > { %v1595_v12 = vsel %vm1508_vm3, %v1592_v7, %v1594_v53  ;;  %v5563_v7 = vld [vmem:[%s5665_s27 + $0x3c] sm:$0xff] }
 0x263   : > { %v1696_v55 = vadd.f32 %v1595_v12, %v1219_v57  ;;  %5203 = vmatmul.msk.bf16.gmra.mxu1 %vm440_vm1, %v5562_v40  ;;  %v1120_v3 = vsel %vm1031_vm2, %v1117_v23, %v1119_v26 }
 0x264   : > { %5374 = vmatmul.msk.bf16.gmra.mxu2 %vm440_vm1, %v6513_v20  ;;  %5426 = vmatmul.msk.bf16.gmra.mxu0 %vm440_vm1, %v6513_v20  ;;  %v1220_v60 = vadd.f32 %v1120_v3, %v977_v5  ;;  %v2605_v20 = vrot.slane %v2407_v1, 1 }
 0x265   : > { %v2229_v2 = vadd.f32 %v6502_v58, %v1696_v55  ;;  %5403 = vmatmul.msk.bf16.gmra.mxu3 %vm440_vm1, %v6590_v62 }
 0x266   : > { %v2606_v21 = vsel %vm1031_vm2, %v2603_v51, %v2605_v20 }
 0x267   : > { %v2705_v63 = vadd.f32 %v2604_v18, %v2229_v2  ;;  %v1397_v0 = vpop.f32.mrf.mxu2 }
 0x268   : > { %v1596_v10 = vrot.slane %v1397_v0, 2  ;;  %v922_v14 = vpop.f32.mrf.mxu1  ;;  %v6606_v28 = vpop.f32.mrf.mxu3  ;;  %v5564_v0 = vld [vmem:[%s5665_s27 + $0x44] sm:$0xff] }
 0x269   : > { %2753 = vst [vmem:[%s5816_s20 + $0x150] sm:$0xff] %v2705_v63  ;;  %v1121_v9 = vrot.slane %v922_v14, 1  ;;  %v2409_v4 = vpop.f32.mrf.mxu0  ;;  %v6644_v63 = vld [vmem:[%s5665_s27 + $0x68] sm:$0xff] }
 0x26a   : > { %v1597_v58 = vsel %vm1508_vm3, %v1594_v53, %v1596_v10  ;;  %v2607_v31 = vrot.slane %v2409_v4, 1 }
 0x26b   : > { %v1697_v56 = vadd.f32 %v1597_v58, %v1220_v60  ;;  %v1122_v19 = vsel %vm1031_vm2, %v1119_v26, %v1121_v9  ;;  %v980_v26 = vld [vmem:[%s5816_s20 + $0x170] sm:$0xff] }
 0x26c   : > { %v1221_v41 = vadd.f32 %v1122_v19, %v978_v47  ;;  %v2608_v50 = vsel %vm1031_vm2, %v2605_v20, %v2607_v31 }
 0x26d   : > { %v2230_v15 = vadd.f32 %v6510_v39, %v1697_v56 }
 0x26f   : > { %v2706_v35 = vadd.f32 %v2606_v21, %v2230_v15  ;;  %v1399_v52 = vpop.f32.mrf.mxu2 }
 0x270   : > { %v1598_v36 = vrot.slane %v1399_v52, 2  ;;  %v925_v25 = vpop.f32.mrf.mxu1  ;;  %v6614_v39 = vpop.f32.mrf.mxu3 }
 0x271   : > { %2754 = vst [vmem:[%s5816_s20 + $0x158] sm:$0xff] %v2706_v35  ;;  %v1123_v42 = vrot.slane %v925_v25, 1  ;;  %v2412_v33 = vpop.f32.mrf.mxu0 }
 0x272   : > { %v1599_v54 = vsel %vm1508_vm3, %v1596_v10, %v1598_v36 }
 0x273   : > { %v1698_v8 = vadd.f32 %v1599_v54, %v1221_v41  ;;  %5204 = vmatmul.msk.bf16.gmra.mxu1 %vm440_vm1, %v5563_v7  ;;  %v1124_v38 = vsel %vm1031_vm2, %v1121_v9, %v1123_v42  ;;  %v981_v9 = vld [vmem:[%s5816_s20 + $0x178] sm:$0xff] }
 0x274   : > { %5375 = vmatmul.msk.bf16.gmra.mxu2 %vm440_vm1, %v6540_v49  ;;  %5427 = vmatmul.msk.bf16.gmra.mxu0 %vm440_vm1, %v6540_v49  ;;  %v1222_v17 = vadd.f32 %v1124_v38, %v979_v11  ;;  %v2609_v49 = vrot.slane %v2412_v33, 1  ;;  %v4004_v11 = vrot.slane %v6614_v39, 1  ;;  %v2898_v39 = vld [vmem:[%s5816_s20 + $0x8] sm:$0xff] }
 0x275   : > { %v2231_v45 = vadd.f32 %v6529_v29, %v1698_v8  ;;  %5404 = vmatmul.msk.bf16.gmra.mxu3 %vm440_vm1, %v6617_v43 }
 0x276   : > { %v2610_v57 = vsel %vm1031_vm2, %v2607_v31, %v2609_v49  ;;  %v5565_v31 = vld [vmem:[%s5665_s27 + $0x4c] sm:$0xff] }
 0x277   : > { %v2707_v23 = vadd.f32 %v2608_v50, %v2231_v45  ;;  %v1402_v46 = vpop.f32.mrf.mxu2  ;;  %v4003_v50 = vrot.slane %v6606_v28, 1 }
 0x278   : > { %v1600_v6 = vrot.slane %v1402_v46, 2  ;;  %v927_v22 = vpop.f32.mrf.mxu1  ;;  %v6633_v44 = vpop.f32.mrf.mxu3 }
 0x279   : > { %2755 = vst [vmem:[%s5816_s20 + $0x160] sm:$0xff] %v2707_v23  ;;  %v1125_v13 = vrot.slane %v927_v22, 1  ;;  %v2414_v24 = vpop.f32.mrf.mxu0  ;;  %v2897_v23 = vld [vmem:[%s5816_s20] sm:$0xff] }
 0x27a   : > { %v1601_v29 = vsel %vm1508_vm3, %v1598_v36, %v1600_v6  ;;  %v2611_v2 = vrot.slane %v2414_v24, 1 }
 0x27b   : > { %v1699_v27 = vadd.f32 %v1601_v29, %v1222_v17  ;;  %v1126_v53 = vsel %vm1031_vm2, %v1123_v42, %v1125_v13  ;;  %v6668_v42 = vld [vmem:[%s5665_s27 + $0x70] sm:$0xff]  ;;  %v4005_v29 = vsel %vm1031_vm2, %v4003_v50, %v4004_v11 }
 0x27c   : > { %v1223_v1 = vadd.f32 %v1126_v53, %v980_v26  ;;  %v2612_v60 = vsel %vm1031_vm2, %v2609_v49, %v2611_v2  ;;  %v5566_v26 = vld [vmem:[%s5665_s27 + $0x54] sm:$0xff] }
 0x27d   : > { %v2232_v37 = vadd.f32 %v6537_v30, %v1699_v27 }
 0x27f   : > { %v2708_v48 = vadd.f32 %v2610_v57, %v2232_v37  ;;  %v1404_v12 = vpop.f32.mrf.mxu2 }
 0x280   : > { %v1602_v51 = vrot.slane %v1404_v12, 2  ;;  %v930_v16 = vpop.f32.mrf.mxu1  ;;  %v6641_v30 = vpop.f32.mrf.mxu3 }
 0x281   : > { %2756 = vst [vmem:[%s5816_s20 + $0x168] sm:$0xff] %v2708_v48  ;;  %v1127_v40 = vrot.slane %v930_v16, 1  ;;  %v2417_v3 = vpop.f32.mrf.mxu0  ;;  %v6689_v48 = vld [vmem:[%s5665_s27 + $0x78] sm:$0xff] }
 0x282   : > { %v1603_v55 = vsel %vm1508_vm3, %v1600_v6, %v1602_v51 }
 0x283   : > { %v1700_v18 = vadd.f32 %v1603_v55, %v1223_v1  ;;  %5205 = vmatmul.msk.bf16.gmra.mxu1 %vm440_vm1, %v5564_v0  ;;  %v1128_v10 = vsel %vm1031_vm2, %v1125_v13, %v1127_v40 }
 0x284   : > { %5376 = vmatmul.msk.bf16.gmra.mxu2 %vm440_vm1, %v6567_v61  ;;  %5428 = vmatmul.msk.bf16.gmra.mxu0 %vm440_vm1, %v6567_v61  ;;  %v1224_v4 = vadd.f32 %v1128_v10, %v981_v9  ;;  %v2613_v61 = vrot.slane %v2417_v3, 1 }
 0x285   : > { %v2233_v5 = vadd.f32 %v6556_v34, %v1700_v18  ;;  %5405 = vmatmul.msk.bf16.gmra.mxu3 %vm440_vm1, %v6644_v63 }
 0x286   : > { %v2614_v52 = vsel %vm1031_vm2, %v2611_v2, %v2613_v61 }
 0x287   : > { %v2709_v14 = vadd.f32 %v2612_v60, %v2233_v5  ;;  %v1407_v58 = vpop.f32.mrf.mxu2 }
 0x288   : > { %v1604_v20 = vrot.slane %v1407_v58, 2  ;;  %v932_v34 = vpop.f32.mrf.mxu1  ;;  %v6660_v19 = vpop.f32.mrf.mxu3  ;;  %v4008_v58 = vrot.slane %v6641_v30, 1  ;;  %v2900_v30 = vld [vmem:[%s5816_s20 + $0x18] sm:$0xff] }
 0x289   : > { %2757 = vst [vmem:[%s5816_s20 + $0x170] sm:$0xff] %v2709_v14  ;;  %v2419_v15 = vpop.f32.mrf.mxu0  ;;  %v2899_v14 = vld [vmem:[%s5816_s20 + $0x10] sm:$0xff] }
 0x28a   : > { %v1605_v56 = vsel %vm1508_vm3, %v1602_v51, %v1604_v20  ;;  %v4006_v51 = vrot.slane %v6633_v44, 1 }
 0x28b   : > { %v1701_v21 = vadd.f32 %v1605_v56, %v1224_v4 }
 0x28c   : > { %v4007_v2 = vsel %vm1031_vm2, %v4004_v11, %v4006_v51  ;;  %v4009_v56 = vsel %vm1031_vm2, %v4006_v51, %v4008_v58 }
 0x28d   : > { %v2234_v35 = vadd.f32 %v6564_v59, %v1701_v21 }
 0x28f   : > { %v2710_v47 = vadd.f32 %v2614_v52, %v2234_v35  ;;  %v1409_v36 = vpop.f32.mrf.mxu2 }
 0x290   : > { %v2773_v41 = vpop.f32.mrf.mxu1  ;;  %v6665_v54 = vpop.f32.mrf.mxu3 }
 0x291   : > { %2758 = vst [vmem:[%s5816_s20 + $0x178] sm:$0xff] %v2710_v47  ;;  %v4258_v25 = vpop.f32.mrf.mxu0  ;;  %v2994_v8 = vrot.slane %v2773_v41, 2  ;;  %v6716_v41 = vld [vmem:[%s5665_s27 + $0x80] sm:$0xff] }
 0x292   : > { %v4479_v13 = vrot.slane %v4258_v25, 2 }
 0x293   : > { %5206 = vmatmul.msk.bf16.gmra.mxu1 %vm440_vm1, %v5565_v31  ;;  %v5567_v31 = vld [vmem:[%s5665_s27 + $0x5c] sm:$0xff] }
 0x294   : > { %5377 = vmatmul.msk.bf16.gmra.mxu2 %vm440_vm1, %v6590_v62  ;;  %5429 = vmatmul.msk.bf16.gmra.mxu0 %vm440_vm1, %v6590_v62 }
 0x295   : > { %5406 = vmatmul.msk.bf16.gmra.mxu3 %vm440_vm1, %v6668_v42 }
 0x297   : > { %v3501_v59 = vpop.f32.mrf.mxu2 }
 0x298   : > { %v2775_v33 = vpop.f32.mrf.mxu1  ;;  %v6678_v38 = vpop.f32.mrf.mxu3 }
 0x299   : > { %v2995_v7 = vrot.slane %v2775_v33, 2  ;;  %v4260_v45 = vpop.f32.mrf.mxu0 }
 0x29a   : > { %v4480_v6 = vrot.slane %v4260_v45, 2 }
 0x29b   : > { %v2996_v46 = vsel %vm1508_vm3, %v2994_v8, %v2995_v7 }
 0x29c   : > { %v3139_v62 = vadd.f32 %v2996_v46, %v2897_v23  ;;  %v4481_v28 = vsel %vm1508_vm3, %v4479_v13, %v4480_v6 }
 0x29e   : > { %v3672_v17 = vadd.f32 %v3501_v59, %v3139_v62  ;;  %v4010_v59 = vrot.slane %v6660_v19, 1 }
 0x29f   : > { %v3503_v22 = vpop.f32.mrf.mxu2 }
 0x2a0   : > { %v4148_v49 = vadd.f32 %v4005_v29, %v3672_v17  ;;  %v2778_v24 = vpop.f32.mrf.mxu1  ;;  %v6686_v53 = vpop.f32.mrf.mxu3  ;;  %v4011_v50 = vsel %vm1031_vm2, %v4008_v58, %v4010_v59  ;;  %v4012_v29 = vrot.slane %v6665_v54, 1  ;;  %v2902_v54 = vld [vmem:[%s5816_s20 + $0x28] sm:$0xff] }
 0x2a1   : > { %v2997_v27 = vrot.slane %v2778_v24, 2  ;;  %v4263_v37 = vpop.f32.mrf.mxu0 }
 0x2a2   : > { %v4624_v57 = vadd.f32 %v4481_v28, %v4148_v49  ;;  %v4482_v16 = vrot.slane %v4263_v37, 2  ;;  %v4013_v28 = vsel %vm1031_vm2, %v4010_v59, %v4012_v29 }
 0x2a3   : > { %v2998_v12 = vsel %vm1508_vm3, %v2995_v7, %v2997_v27  ;;  %5207 = vmatmul.msk.bf16.gmra.mxu1 %vm440_vm1, %v5566_v26 }
 0x2a4   : > { %5378 = vmatmul.msk.bf16.gmra.mxu2 %vm440_vm1, %v6617_v43  ;;  %v3140_v1 = vadd.f32 %v2998_v12, %v2898_v39  ;;  %4672 = vst [vmem:[%s5816_s20] sm:$0xff] %v4624_v57  ;;  %5430 = vmatmul.msk.bf16.gmra.mxu0 %vm440_vm1, %v6617_v43  ;;  %v4483_v0 = vsel %vm1508_vm3, %v4480_v6, %v4482_v16 }
 0x2a5   : > { %5407 = vmatmul.msk.bf16.gmra.mxu3 %vm440_vm1, %v6689_v48 }
 0x2a6   : > { %v3673_v55 = vadd.f32 %v3503_v22, %v3140_v1  ;;  %v2901_v22 = vld [vmem:[%s5816_s20 + $0x20] sm:$0xff] }
 0x2a7   : > { %v3506_v40 = vpop.f32.mrf.mxu2 }
 0x2a8   : > { %v4149_v3 = vadd.f32 %v4007_v2, %v3673_v55  ;;  %v2780_v44 = vpop.f32.mrf.mxu1  ;;  %v6705_v10 = vpop.f32.mrf.mxu3  ;;  %v4014_v2 = vrot.slane %v6678_v38, 1 }
 0x2a9   : > { %v2999_v18 = vrot.slane %v2780_v44, 2  ;;  %v4265_v5 = vpop.f32.mrf.mxu0 }
 0x2aa   : > { %v4625_v60 = vadd.f32 %v4483_v0, %v4149_v3  ;;  %v4484_v20 = vrot.slane %v4265_v5, 2  ;;  %v4015_v5 = vsel %vm1031_vm2, %v4012_v29, %v4014_v2 }
 0x2ab   : > { %v3000_v43 = vsel %vm1508_vm3, %v2997_v27, %v2999_v18 }
 0x2ac   : > { %v3141_v9 = vadd.f32 %v3000_v43, %v2899_v14  ;;  %4673 = vst [vmem:[%s5816_s20 + $0x8] sm:$0xff] %v4625_v60  ;;  %v4485_v35 = vsel %vm1508_vm3, %v4482_v16, %v4484_v20  ;;  %v6743_v16 = vld [vmem:[%s5665_s27 + $0x88] sm:$0xff] }
 0x2ae   : > { %v3674_v4 = vadd.f32 %v3506_v40, %v3141_v9  ;;  %v5568_v40 = vld [vmem:[%s5665_s27 + $0x64] sm:$0xff] }
 0x2af   : > { %v3508_v34 = vpop.f32.mrf.mxu2 }
 0x2b0   : > { %v4150_v61 = vadd.f32 %v4009_v56, %v3674_v4  ;;  %v2783_v15 = vpop.f32.mrf.mxu1  ;;  %v6713_v47 = vpop.f32.mrf.mxu3  ;;  %v2903_v4 = vld [vmem:[%s5816_s20 + $0x30] sm:$0xff] }
 0x2b1   : > { %v3001_v21 = vrot.slane %v2783_v15, 2  ;;  %v4268_v52 = vpop.f32.mrf.mxu0 }
 0x2b2   : > { %v4626_v36 = vadd.f32 %v4485_v35, %v4150_v61  ;;  %v4486_v8 = vrot.slane %v4268_v52, 2 }
 0x2b3   : > { %v3002_v25 = vsel %vm1508_vm3, %v2999_v18, %v3001_v21  ;;  %5208 = vmatmul.msk.bf16.gmra.mxu1 %vm440_vm1, %v5567_v31 }
 0x2b4   : > { %5379 = vmatmul.msk.bf16.gmra.mxu2 %vm440_vm1, %v6644_v63  ;;  %v3142_v33 = vadd.f32 %v3002_v25, %v2900_v30  ;;  %4674 = vst [vmem:[%s5816_s20 + $0x10] sm:$0xff] %v4626_v36  ;;  %5431 = vmatmul.msk.bf16.gmra.mxu0 %vm440_vm1, %v6644_v63  ;;  %v4487_v11 = vsel %vm1508_vm3, %v4484_v20, %v4486_v8 }
 0x2b5   : > { %5408 = vmatmul.msk.bf16.gmra.mxu3 %vm440_vm1, %v6716_v41 }
 0x2b6   : > { %v3675_v7 = vadd.f32 %v3508_v34, %v3142_v33  ;;  %v4016_v34 = vrot.slane %v6686_v53, 1  ;;  %v2904_v53 = vld [vmem:[%s5816_s20 + $0x38] sm:$0xff] }
 0x2b7   : > { %v3511_v45 = vpop.f32.mrf.mxu2 }
 0x2b8   : > { %v4151_v23 = vadd.f32 %v4011_v50, %v3675_v7  ;;  %v2785_v19 = vpop.f32.mrf.mxu1  ;;  %v6732_v6 = vpop.f32.mrf.mxu3  ;;  %v4017_v35 = vsel %vm1031_vm2, %v4014_v2, %v4016_v34  ;;  %v4018_v50 = vrot.slane %v6705_v10, 1 }
 0x2b9   : > { %v3003_v46 = vrot.slane %v2785_v19, 2  ;;  %v4270_v62 = vpop.f32.mrf.mxu0 }
 0x2ba   : > { %v4627_v17 = vadd.f32 %v4487_v11, %v4151_v23  ;;  %v4488_v49 = vrot.slane %v4270_v62, 2  ;;  %v4019_v62 = vsel %vm1031_vm2, %v4016_v34, %v4018_v50 }
 0x2bb   : > { %v3004_v63 = vsel %vm1508_vm3, %v3001_v21, %v3003_v46 }
 0x2bc   : > { %v3143_v13 = vadd.f32 %v3004_v63, %v2901_v22  ;;  %4675 = vst [vmem:[%s5816_s20 + $0x18] sm:$0xff] %v4627_v17  ;;  %v4489_v12 = vsel %vm1508_vm3, %v4486_v8, %v4488_v49  ;;  %v6770_v8 = vld [vmem:[%s5665_s27 + $0x90] sm:$0xff] }
 0x2be   : > { %v3676_v24 = vadd.f32 %v3511_v45, %v3143_v13  ;;  %v5569_v45 = vld [vmem:[%s5665_s27 + $0x6c] sm:$0xff] }
 0x2bf   : > { %v3513_v27 = vpop.f32.mrf.mxu2 }
 0x2c0   : > { %v4152_v37 = vadd.f32 %v4013_v28, %v3676_v24  ;;  %v2788_v57 = vpop.f32.mrf.mxu1  ;;  %v6740_v51 = vpop.f32.mrf.mxu3  ;;  %v2905_v24 = vld [vmem:[%s5816_s20 + $0x40] sm:$0xff] }
 0x2c1   : > { %v3005_v39 = vrot.slane %v2788_v57, 2  ;;  %v4273_v26 = vpop.f32.mrf.mxu0 }
 0x2c2   : > { %v4628_v1 = vadd.f32 %v4489_v12, %v4152_v37  ;;  %v4490_v44 = vrot.slane %v4273_v26, 2 }
 0x2c3   : > { %v3006_v55 = vsel %vm1508_vm3, %v3003_v46, %v3005_v39  ;;  %5209 = vmatmul.msk.bf16.gmra.mxu1 %vm440_vm1, %v5568_v40 }
 0x2c4   : > { %5380 = vmatmul.msk.bf16.gmra.mxu2 %vm440_vm1, %v6668_v42  ;;  %v3144_v3 = vadd.f32 %v3006_v55, %v2902_v54  ;;  %4676 = vst [vmem:[%s5816_s20 + $0x20] sm:$0xff] %v4628_v1  ;;  %5432 = vmatmul.msk.bf16.gmra.mxu0 %vm440_vm1, %v6668_v42  ;;  %v4491_v43 = vsel %vm1508_vm3, %v4488_v49, %v4490_v44 }
 0x2c5   : > { %5409 = vmatmul.msk.bf16.gmra.mxu3 %vm440_vm1, %v6743_v16 }
 0x2c6   : > { %v3677_v18 = vadd.f32 %v3513_v27, %v3144_v3  ;;  %v4020_v27 = vrot.slane %v6713_v47, 1  ;;  %v2906_v47 = vld [vmem:[%s5816_s20 + $0x48] sm:$0xff] }
 0x2c7   : > { %v3516_v0 = vpop.f32.mrf.mxu2 }
 0x2c8   : > { %v4153_v60 = vadd.f32 %v4015_v5, %v3677_v18  ;;  %v2790_v38 = vpop.f32.mrf.mxu1  ;;  %v6759_v9 = vpop.f32.mrf.mxu3  ;;  %v4021_v12 = vsel %vm1031_vm2, %v4018_v50, %v4020_v27  ;;  %v4022_v5 = vrot.slane %v6732_v6, 1 }
 0x2c9   : > { %v3007_v14 = vrot.slane %v2790_v38, 2  ;;  %v4275_v58 = vpop.f32.mrf.mxu0 }
 0x2ca   : > { %v4629_v20 = vadd.f32 %v4491_v43, %v4153_v60  ;;  %v4492_v61 = vrot.slane %v4275_v58, 2  ;;  %v4023_v58 = vsel %vm1031_vm2, %v4020_v27, %v4022_v5 }
 0x2cb   : > { %v3008_v42 = vsel %vm1508_vm3, %v3005_v39, %v3007_v14 }
 0x2cc   : > { %v3145_v56 = vadd.f32 %v3008_v42, %v2903_v4  ;;  %4677 = vst [vmem:[%s5816_s20 + $0x28] sm:$0xff] %v4629_v20  ;;  %v4493_v25 = vsel %vm1508_vm3, %v4490_v44, %v4492_v61  ;;  %v6797_v44 = vld [vmem:[%s5665_s27 + $0x98] sm:$0xff] }
 0x2ce   : > { %v3678_v15 = vadd.f32 %v3516_v0, %v3145_v56  ;;  %v5570_v0 = vld [vmem:[%s5665_s27 + $0x74] sm:$0xff] }
 0x2cf   : > { %v3518_v21 = vpop.f32.mrf.mxu2 }
 0x2d0   : > { %v4154_v52 = vadd.f32 %v4017_v35, %v3678_v15  ;;  %v2793_v36 = vpop.f32.mrf.mxu1  ;;  %v6767_v59 = vpop.f32.mrf.mxu3  ;;  %v2907_v15 = vld [vmem:[%s5816_s20 + $0x50] sm:$0xff] }
 0x2d1   : > { %v3009_v30 = vrot.slane %v2793_v36, 2  ;;  %v4278_v31 = vpop.f32.mrf.mxu0 }
 0x2d2   : > { %v4630_v33 = vadd.f32 %v4493_v25, %v4154_v52  ;;  %v4494_v19 = vrot.slane %v4278_v31, 2 }
 0x2d3   : > { %v3010_v7 = vsel %vm1508_vm3, %v3007_v14, %v3009_v30  ;;  %5210 = vmatmul.msk.bf16.gmra.mxu1 %vm440_vm1, %v5569_v45 }
 0x2d4   : > { %5381 = vmatmul.msk.bf16.gmra.mxu2 %vm440_vm1, %v6689_v48  ;;  %v3146_v23 = vadd.f32 %v3010_v7, %v2904_v53  ;;  %4678 = vst [vmem:[%s5816_s20 + $0x30] sm:$0xff] %v4630_v33  ;;  %5433 = vmatmul.msk.bf16.gmra.mxu0 %vm440_vm1, %v6689_v48  ;;  %v4495_v63 = vsel %vm1508_vm3, %v4492_v61, %v4494_v19 }
 0x2d5   : > { %5410 = vmatmul.msk.bf16.gmra.mxu3 %vm440_vm1, %v6770_v8 }
 0x2d6   : > { %v3679_v46 = vadd.f32 %v3518_v21, %v3146_v23  ;;  %v4024_v21 = vrot.slane %v6740_v51, 1  ;;  %v2908_v51 = vld [vmem:[%s5816_s20 + $0x58] sm:$0xff] }
 0x2d7   : > { %v3521_v11 = vpop.f32.mrf.mxu2 }
 0x2d8   : > { %v4155_v17 = vadd.f32 %v4019_v62, %v3679_v46  ;;  %v2795_v10 = vpop.f32.mrf.mxu1  ;;  %v6786_v13 = vpop.f32.mrf.mxu3  ;;  %v4025_v25 = vsel %vm1031_vm2, %v4022_v5, %v4024_v21  ;;  %v4026_v62 = vrot.slane %v6759_v9, 1 }
 0x2d9   : > { %v3011_v22 = vrot.slane %v2795_v10, 2  ;;  %v4280_v29 = vpop.f32.mrf.mxu0 }
 0x2da   : > { %v4631_v49 = vadd.f32 %v4495_v63, %v4155_v17  ;;  %v4496_v37 = vrot.slane %v4280_v29, 2  ;;  %v4027_v29 = vsel %vm1031_vm2, %v4024_v21, %v4026_v62 }
 0x2db   : > { %v3012_v48 = vsel %vm1508_vm3, %v3009_v30, %v3011_v22 }
 0x2dc   : > { %v3147_v28 = vadd.f32 %v3012_v48, %v2905_v24  ;;  %4679 = vst [vmem:[%s5816_s20 + $0x38] sm:$0xff] %v4631_v49  ;;  %v4497_v55 = vsel %vm1508_vm3, %v4494_v19, %v4496_v37  ;;  %v6824_v19 = vld [vmem:[%s5665_s27 + $0xa0] sm:$0xff] }
 0x2de   : > { %v3680_v57 = vadd.f32 %v3521_v11, %v3147_v28  ;;  %v5571_v11 = vld [vmem:[%s5665_s27 + $0x7c] sm:$0xff] }
 0x2df   : > { %v3523_v39 = vpop.f32.mrf.mxu2 }
 0x2e0   : > { %v4156_v26 = vadd.f32 %v4021_v12, %v3680_v57  ;;  %v2798_v1 = vpop.f32.mrf.mxu1  ;;  %v6794_v2 = vpop.f32.mrf.mxu3  ;;  %v2909_v57 = vld [vmem:[%s5816_s20 + $0x60] sm:$0xff] }
 0x2e1   : > { %v3013_v54 = vrot.slane %v2798_v1, 2  ;;  %v4283_v40 = vpop.f32.mrf.mxu0 }
 0x2e2   : > { %v4632_v3 = vadd.f32 %v4497_v55, %v4156_v26  ;;  %v4498_v38 = vrot.slane %v4283_v40, 2 }
 0x2e3   : > { %v3014_v18 = vsel %vm1508_vm3, %v3011_v22, %v3013_v54  ;;  %5211 = vmatmul.msk.bf16.gmra.mxu1 %vm440_vm1, %v5570_v0 }
 0x2e4   : > { %5382 = vmatmul.msk.bf16.gmra.mxu2 %vm440_vm1, %v6716_v41  ;;  %v3148_v60 = vadd.f32 %v3014_v18, %v2906_v47  ;;  %4680 = vst [vmem:[%s5816_s20 + $0x40] sm:$0xff] %v4632_v3  ;;  %5434 = vmatmul.msk.bf16.gmra.mxu0 %vm440_vm1, %v6716_v41  ;;  %v4499_v42 = vsel %vm1508_vm3, %v4496_v37, %v4498_v38 }
 0x2e5   : > { %5411 = vmatmul.msk.bf16.gmra.mxu3 %vm440_vm1, %v6797_v44 }
 0x2e6   : > { %v3681_v14 = vadd.f32 %v3523_v39, %v3148_v60  ;;  %v4028_v39 = vrot.slane %v6767_v59, 1  ;;  %v2910_v59 = vld [vmem:[%s5816_s20 + $0x68] sm:$0xff] }
 0x2e7   : > { %v3526_v43 = vpop.f32.mrf.mxu2 }
 0x2e8   : > { %v4157_v20 = vadd.f32 %v4023_v58, %v3681_v14  ;;  %v2800_v6 = vpop.f32.mrf.mxu1  ;;  %v6813_v56 = vpop.f32.mrf.mxu3  ;;  %v4029_v55 = vsel %vm1031_vm2, %v4026_v62, %v4028_v39  ;;  %v4030_v58 = vrot.slane %v6786_v13, 1 }
 0x2e9   : > { %v3015_v4 = vrot.slane %v2800_v6, 2  ;;  %v4285_v34 = vpop.f32.mrf.mxu0 }
 0x2ea   : > { %v4633_v61 = vadd.f32 %v4499_v42, %v4157_v20  ;;  %v4500_v52 = vrot.slane %v4285_v34, 2  ;;  %v4031_v34 = vsel %vm1031_vm2, %v4028_v39, %v4030_v58 }
 0x2eb   : > { %v3016_v41 = vsel %vm1508_vm3, %v3013_v54, %v3015_v4 }
 0x2ec   : > { %v3149_v35 = vadd.f32 %v3016_v41, %v2907_v15  ;;  %4681 = vst [vmem:[%s5816_s20 + $0x48] sm:$0xff] %v4633_v61  ;;  %v4501_v7 = vsel %vm1508_vm3, %v4498_v38, %v4500_v52  ;;  %v6851_v38 = vld [vmem:[%s5665_s27 + $0xa8] sm:$0xff] }
 0x2ee   : > { %v3682_v36 = vadd.f32 %v3526_v43, %v3149_v35  ;;  %v5572_v43 = vld [vmem:[%s5665_s27 + $0x84] sm:$0xff] }
 0x2ef   : > { %v3528_v30 = vpop.f32.mrf.mxu2 }
 0x2f0   : > { %v4158_v31 = vadd.f32 %v4025_v25, %v3682_v36  ;;  %v2803_v33 = vpop.f32.mrf.mxu1  ;;  %v6821_v50 = vpop.f32.mrf.mxu3  ;;  %v2911_v36 = vld [vmem:[%s5816_s20 + $0x70] sm:$0xff] }
 0x2f1   : > { %v3017_v53 = vrot.slane %v2803_v33, 2  ;;  %v4288_v45 = vpop.f32.mrf.mxu0 }
 0x2f2   : > { %v4634_v23 = vadd.f32 %v4501_v7, %v4158_v31  ;;  %v4502_v10 = vrot.slane %v4288_v45, 2 }
 0x2f3   : > { %v3018_v46 = vsel %vm1508_vm3, %v3015_v4, %v3017_v53  ;;  %5212 = vmatmul.msk.bf16.gmra.mxu1 %vm440_vm1, %v5571_v11 }
 0x2f4   : > { %5383 = vmatmul.msk.bf16.gmra.mxu2 %vm440_vm1, %v6743_v16  ;;  %v3150_v17 = vadd.f32 %v3018_v46, %v2908_v51  ;;  %4682 = vst [vmem:[%s5816_s20 + $0x50] sm:$0xff] %v4634_v23  ;;  %5435 = vmatmul.msk.bf16.gmra.mxu0 %vm440_vm1, %v6743_v16  ;;  %v4503_v48 = vsel %vm1508_vm3, %v4500_v52, %v4502_v10 }
 0x2f5   : > { %5412 = vmatmul.msk.bf16.gmra.mxu3 %vm440_vm1, %v6824_v19 }
 0x2f6   : > { %v3683_v22 = vadd.f32 %v3528_v30, %v3150_v17  ;;  %v4032_v30 = vrot.slane %v6794_v2, 1  ;;  %v2912_v2 = vld [vmem:[%s5816_s20 + $0x78] sm:$0xff] }
 0x2f7   : > { %v3531_v63 = vpop.f32.mrf.mxu2 }
 0x2f8   : > { %v4159_v49 = vadd.f32 %v4027_v29, %v3683_v22  ;;  %v2805_v9 = vpop.f32.mrf.mxu1  ;;  %v6840_v28 = vpop.f32.mrf.mxu3  ;;  %v4033_v7 = vsel %vm1031_vm2, %v4030_v58, %v4032_v30  ;;  %v4034_v29 = vrot.slane %v6813_v56, 1 }
 0x2f9   : > { %v3019_v24 = vrot.slane %v2805_v9, 2  ;;  %v4290_v27 = vpop.f32.mrf.mxu0 }
 0x2fa   : > { %v4635_v37 = vadd.f32 %v4503_v48, %v4159_v49  ;;  %v4504_v26 = vrot.slane %v4290_v27, 2  ;;  %v4035_v27 = vsel %vm1031_vm2, %v4032_v30, %v4034_v29 }
 0x2fb   : > { %v3020_v16 = vsel %vm1508_vm3, %v3017_v53, %v3019_v24 }
 0x2fc   : > { %v3151_v12 = vadd.f32 %v3020_v16, %v2909_v57  ;;  %4683 = vst [vmem:[%s5816_s20 + $0x58] sm:$0xff] %v4635_v37  ;;  %v4505_v18 = vsel %vm1508_vm3, %v4502_v10, %v4504_v26  ;;  %v6878_v10 = vld [vmem:[%s5665_s27 + $0xb0] sm:$0xff] }
 0x2fe   : > { %v3684_v1 = vadd.f32 %v3531_v63, %v3151_v12  ;;  %v5573_v63 = vld [vmem:[%s5665_s27 + $0x8c] sm:$0xff] }
 0x2ff   : > { %v3533_v54 = vpop.f32.mrf.mxu2 }
 0x300   : > { %v4160_v40 = vadd.f32 %v4029_v55, %v3684_v1  ;;  %v2808_v3 = vpop.f32.mrf.mxu1  ;;  %v6848_v5 = vpop.f32.mrf.mxu3  ;;  %v2913_v1 = vld [vmem:[%s5816_s20 + $0x80] sm:$0xff] }
 0x301   : > { %v3021_v47 = vrot.slane %v2808_v3, 2  ;;  %v4293_v0 = vpop.f32.mrf.mxu0 }
 0x302   : > { %v4636_v60 = vadd.f32 %v4505_v18, %v4160_v40  ;;  %v4506_v6 = vrot.slane %v4293_v0, 2 }
 0x303   : > { %v3022_v14 = vsel %vm1508_vm3, %v3019_v24, %v3021_v47  ;;  %5213 = vmatmul.msk.bf16.gmra.mxu1 %vm440_vm1, %v5572_v43 }
 0x304   : > { %5384 = vmatmul.msk.bf16.gmra.mxu2 %vm440_vm1, %v6770_v8  ;;  %v3152_v20 = vadd.f32 %v3022_v14, %v2910_v59  ;;  %4684 = vst [vmem:[%s5816_s20 + $0x60] sm:$0xff] %v4636_v60  ;;  %5436 = vmatmul.msk.bf16.gmra.mxu0 %vm440_vm1, %v6770_v8  ;;  %v4507_v41 = vsel %vm1508_vm3, %v4504_v26, %v4506_v6 }
 0x305   : > { %5413 = vmatmul.msk.bf16.gmra.mxu3 %vm440_vm1, %v6851_v38 }
 0x306   : > { %v3685_v4 = vadd.f32 %v3533_v54, %v3152_v20  ;;  %v4036_v54 = vrot.slane %v6821_v50, 1  ;;  %v2914_v50 = vld [vmem:[%s5816_s20 + $0x88] sm:$0xff] }
 0x307   : > { %v3536_v42 = vpop.f32.mrf.mxu2 }
 0x308   : > { %v4161_v61 = vadd.f32 %v4031_v34, %v3685_v4  ;;  %v2810_v13 = vpop.f32.mrf.mxu1  ;;  %v6867_v35 = vpop.f32.mrf.mxu3  ;;  %v4037_v18 = vsel %vm1031_vm2, %v4034_v29, %v4036_v54  ;;  %v4038_v34 = vrot.slane %v6840_v28, 1 }
 0x309   : > { %v3023_v15 = vrot.slane %v2810_v13, 2  ;;  %v4295_v21 = vpop.f32.mrf.mxu0 }
 0x30a   : > { %v4637_v52 = vadd.f32 %v4507_v41, %v4161_v61  ;;  %v4508_v31 = vrot.slane %v4295_v21, 2  ;;  %v4039_v21 = vsel %vm1031_vm2, %v4036_v54, %v4038_v34 }
 0x30b   : > { %v3024_v8 = vsel %vm1508_vm3, %v3021_v47, %v3023_v15 }
 0x30c   : > { %v3153_v25 = vadd.f32 %v3024_v8, %v2911_v36  ;;  %4685 = vst [vmem:[%s5816_s20 + $0x68] sm:$0xff] %v4637_v52  ;;  %v4509_v46 = vsel %vm1508_vm3, %v4506_v6, %v4508_v31  ;;  %v6905_v6 = vld [vmem:[%s5665_s27 + $0xb8] sm:$0xff] }
 0x30e   : > { %v3686_v33 = vadd.f32 %v3536_v42, %v3153_v25  ;;  %v5574_v42 = vld [vmem:[%s5665_s27 + $0x94] sm:$0xff] }
 0x30f   : > { %v3538_v53 = vpop.f32.mrf.mxu2 }
 0x310   : > { %v4162_v45 = vadd.f32 %v4033_v7, %v3686_v33  ;;  %v2813_v23 = vpop.f32.mrf.mxu1  ;;  %v6875_v62 = vpop.f32.mrf.mxu3  ;;  %v2915_v33 = vld [vmem:[%s5816_s20 + $0x90] sm:$0xff] }
 0x311   : > { %v3025_v51 = vrot.slane %v2813_v23, 2  ;;  %v4298_v11 = vpop.f32.mrf.mxu0 }
 0x312   : > { %v4638_v17 = vadd.f32 %v4509_v46, %v4162_v45  ;;  %v4510_v9 = vrot.slane %v4298_v11, 2 }
 0x313   : > { %v3026_v22 = vsel %vm1508_vm3, %v3023_v15, %v3025_v51  ;;  %5214 = vmatmul.msk.bf16.gmra.mxu1 %vm440_vm1, %v5573_v63 }
 0x314   : > { %5385 = vmatmul.msk.bf16.gmra.mxu2 %vm440_vm1, %v6797_v44  ;;  %v3154_v49 = vadd.f32 %v3026_v22, %v2912_v2  ;;  %4686 = vst [vmem:[%s5816_s20 + $0x70] sm:$0xff] %v4638_v17  ;;  %5437 = vmatmul.msk.bf16.gmra.mxu0 %vm440_vm1, %v6797_v44  ;;  %v4511_v16 = vsel %vm1508_vm3, %v4508_v31, %v4510_v9 }
 0x315   : > { %5414 = vmatmul.msk.bf16.gmra.mxu3 %vm440_vm1, %v6878_v10 }
 0x316   : > { %v3687_v24 = vadd.f32 %v3538_v53, %v3154_v49  ;;  %v4040_v53 = vrot.slane %v6848_v5, 1  ;;  %v2916_v5 = vld [vmem:[%s5816_s20 + $0x98] sm:$0xff] }
 0x317   : > { %v3541_v48 = vpop.f32.mrf.mxu2 }
 0x318   : > { %v4163_v37 = vadd.f32 %v4035_v27, %v3687_v24  ;;  %v2815_v56 = vpop.f32.mrf.mxu1  ;;  %v6894_v12 = vpop.f32.mrf.mxu3  ;;  %v4041_v46 = vsel %vm1031_vm2, %v4038_v34, %v4040_v53  ;;  %v4042_v27 = vrot.slane %v6867_v35, 1 }
 0x319   : > { %v3027_v57 = vrot.slane %v2815_v56, 2  ;;  %v4300_v39 = vpop.f32.mrf.mxu0 }
 0x31a   : > { %v4639_v26 = vadd.f32 %v4511_v16, %v4163_v37  ;;  %v4512_v40 = vrot.slane %v4300_v39, 2  ;;  %v4043_v39 = vsel %vm1031_vm2, %v4040_v53, %v4042_v27 }
 0x31b   : > { %v3028_v44 = vsel %vm1508_vm3, %v3025_v51, %v3027_v57 }
 0x31c   : > { %v3155_v55 = vadd.f32 %v3028_v44, %v2913_v1  ;;  %4687 = vst [vmem:[%s5816_s20 + $0x78] sm:$0xff] %v4639_v26  ;;  %v4513_v14 = vsel %vm1508_vm3, %v4510_v9, %v4512_v40  ;;  %v6932_v9 = vld [vmem:[%s5665_s27 + $0xc0] sm:$0xff] }
 0x31e   : > { %v3688_v3 = vadd.f32 %v3541_v48, %v3155_v55  ;;  %v5575_v48 = vld [vmem:[%s5665_s27 + $0x9c] sm:$0xff] }
 0x31f   : > { %v3543_v47 = vpop.f32.mrf.mxu2 }
 0x320   : > { %v4164_v0 = vadd.f32 %v4037_v18, %v3688_v3  ;;  %v2818_v60 = vpop.f32.mrf.mxu1  ;;  %v6902_v58 = vpop.f32.mrf.mxu3  ;;  %v2917_v3 = vld [vmem:[%s5816_s20 + $0xa0] sm:$0xff] }
 0x321   : > { %v3029_v59 = vrot.slane %v2818_v60, 2  ;;  %v4303_v43 = vpop.f32.mrf.mxu0 }
 0x322   : > { %v4640_v20 = vadd.f32 %v4513_v14, %v4164_v0  ;;  %v4514_v13 = vrot.slane %v4303_v43, 2 }
 0x323   : > { %v3030_v4 = vsel %vm1508_vm3, %v3027_v57, %v3029_v59  ;;  %5215 = vmatmul.msk.bf16.gmra.mxu1 %vm440_vm1, %v5574_v42 }
 0x324   : > { %5386 = vmatmul.msk.bf16.gmra.mxu2 %vm440_vm1, %v6824_v19  ;;  %v3156_v61 = vadd.f32 %v3030_v4, %v2914_v50  ;;  %4688 = vst [vmem:[%s5816_s20 + $0x80] sm:$0xff] %v4640_v20  ;;  %5438 = vmatmul.msk.bf16.gmra.mxu0 %vm440_vm1, %v6824_v19  ;;  %v4515_v8 = vsel %vm1508_vm3, %v4512_v40, %v4514_v13 }
 0x325   : > { %5415 = vmatmul.msk.bf16.gmra.mxu3 %vm440_vm1, %v6905_v6 }
 0x326   : > { %v3689_v15 = vadd.f32 %v3543_v47, %v3156_v61  ;;  %v4044_v47 = vrot.slane %v6875_v62, 1  ;;  %v2918_v62 = vld [vmem:[%s5816_s20 + $0xa8] sm:$0xff] }
 0x327   : > { %v3546_v41 = vpop.f32.mrf.mxu2 }
 0x328   : > { %v4165_v52 = vadd.f32 %v4039_v21, %v3689_v15  ;;  %v2820_v28 = vpop.f32.mrf.mxu1  ;;  %v6921_v25 = vpop.f32.mrf.mxu3  ;;  %v4045_v14 = vsel %vm1031_vm2, %v4042_v27, %v4044_v47  ;;  %v4046_v21 = vrot.slane %v6894_v12, 1 }
 0x329   : > { %v3031_v36 = vrot.slane %v2820_v28, 2  ;;  %v4305_v30 = vpop.f32.mrf.mxu0 }
 0x32a   : > { %v4641_v31 = vadd.f32 %v4515_v8, %v4165_v52  ;;  %v4516_v45 = vrot.slane %v4305_v30, 2  ;;  %v4047_v30 = vsel %vm1031_vm2, %v4044_v47, %v4046_v21 }
 0x32b   : > { %v3032_v19 = vsel %vm1508_vm3, %v3029_v59, %v3031_v36 }
 0x32c   : > { %v3157_v7 = vadd.f32 %v3032_v19, %v2915_v33  ;;  %4689 = vst [vmem:[%s5816_s20 + $0x88] sm:$0xff] %v4641_v31  ;;  %v4517_v22 = vsel %vm1508_vm3, %v4514_v13, %v4516_v45  ;;  %v6959_v13 = vld [vmem:[%s5665_s27 + $0xc8] sm:$0xff] }
 0x32e   : > { %v3690_v23 = vadd.f32 %v3546_v41, %v3157_v7  ;;  %v5576_v41 = vld [vmem:[%s5665_s27 + $0xa4] sm:$0xff] }
 0x32f   : > { %v3548_v51 = vpop.f32.mrf.mxu2 }
 0x330   : > { %v4166_v11 = vadd.f32 %v4041_v46, %v3690_v23  ;;  %v2823_v17 = vpop.f32.mrf.mxu1  ;;  %v6929_v29 = vpop.f32.mrf.mxu3  ;;  %v2919_v23 = vld [vmem:[%s5816_s20 + $0xb0] sm:$0xff] }
 0x331   : > { %v3033_v2 = vrot.slane %v2823_v17, 2  ;;  %v4308_v63 = vpop.f32.mrf.mxu0 }
 0x332   : > { %v4642_v49 = vadd.f32 %v4517_v22, %v4166_v11  ;;  %v4518_v56 = vrot.slane %v4308_v63, 2 }
 0x333   : > { %v3034_v24 = vsel %vm1508_vm3, %v3031_v36, %v3033_v2  ;;  %5216 = vmatmul.msk.bf16.gmra.mxu1 %vm440_vm1, %v5575_v48 }
 0x334   : > { %5387 = vmatmul.msk.bf16.gmra.mxu2 %vm440_vm1, %v6851_v38  ;;  %v3158_v37 = vadd.f32 %v3034_v24, %v2916_v5  ;;  %4690 = vst [vmem:[%s5816_s20 + $0x90] sm:$0xff] %v4642_v49  ;;  %5439 = vmatmul.msk.bf16.gmra.mxu0 %vm440_vm1, %v6851_v38  ;;  %v4519_v44 = vsel %vm1508_vm3, %v4516_v45, %v4518_v56 }
 0x335   : > { %5416 = vmatmul.msk.bf16.gmra.mxu3 %vm440_vm1, %v6932_v9 }
 0x336   : > { %v3691_v57 = vadd.f32 %v3548_v51, %v3158_v37  ;;  %v4048_v51 = vrot.slane %v6902_v58, 1  ;;  %v2920_v58 = vld [vmem:[%s5816_s20 + $0xb8] sm:$0xff] }
 0x337   : > { %v3551_v16 = vpop.f32.mrf.mxu2 }
 0x338   : > { %v4167_v26 = vadd.f32 %v4043_v39, %v3691_v57  ;;  %v2825_v35 = vpop.f32.mrf.mxu1  ;;  %v6948_v55 = vpop.f32.mrf.mxu3  ;;  %v4049_v22 = vsel %vm1031_vm2, %v4046_v21, %v4048_v51  ;;  %v4050_v39 = vrot.slane %v6921_v25, 1 }
 0x339   : > { %v3035_v1 = vrot.slane %v2825_v35, 2  ;;  %v4310_v54 = vpop.f32.mrf.mxu0 }
 0x33a   : > { %v4643_v40 = vadd.f32 %v4519_v44, %v4167_v26  ;;  %v4520_v0 = vrot.slane %v4310_v54, 2  ;;  %v4051_v54 = vsel %vm1031_vm2, %v4048_v51, %v4050_v39 }
 0x33b   : > { %v3036_v38 = vsel %vm1508_vm3, %v3033_v2, %v3035_v1 }
 0x33c   : > { %v3159_v18 = vadd.f32 %v3036_v38, %v2917_v3  ;;  %4691 = vst [vmem:[%s5816_s20 + $0x98] sm:$0xff] %v4643_v40  ;;  %v4521_v4 = vsel %vm1508_vm3, %v4518_v56, %v4520_v0  ;;  %v6986_v56 = vld [vmem:[%s5665_s27 + $0xd0] sm:$0xff] }
 0x33e   : > { %v3692_v60 = vadd.f32 %v3551_v16, %v3159_v18  ;;  %v5577_v16 = vld [vmem:[%s5665_s27 + $0xac] sm:$0xff] }
 0x33f   : > { %v3553_v59 = vpop.f32.mrf.mxu2 }
 0x340   : > { %v4168_v43 = vadd.f32 %v4045_v14, %v3692_v60  ;;  %v2828_v20 = vpop.f32.mrf.mxu1  ;;  %v6956_v34 = vpop.f32.mrf.mxu3 }
 0x341   : > { %v3037_v50 = vrot.slane %v2828_v20, 2  ;;  %v4313_v42 = vpop.f32.mrf.mxu0 }
 0x342   : > { %v4644_v61 = vadd.f32 %v4521_v4, %v4168_v43  ;;  %v4522_v28 = vrot.slane %v4313_v42, 2  ;;  %v5271_v42 = vld [vmem:[%s5665_s27 + $0xd8] sm:$0x1] }
 0x343   : > { %v3038_v15 = vsel %vm1508_vm3, %v3035_v1, %v3037_v50  ;;  %5217 = vmatmul.msk.bf16.gmra.mxu1 %vm440_vm1, %v5576_v41 }
 0x344   : > { %5388 = vmatmul.msk.bf16.gmra.mxu2 %vm440_vm1, %v6878_v10  ;;  %v3160_v52 = vadd.f32 %v3038_v15, %v2918_v62  ;;  %4692 = vst [vmem:[%s5816_s20 + $0xa0] sm:$0xff] %v4644_v61  ;;  %5440 = vmatmul.msk.bf16.gmra.mxu0 %vm440_vm1, %v6878_v10  ;;  %v4523_v19 = vsel %vm1508_vm3, %v4520_v0, %v4522_v28  ;;  %v3388_v15 = vunpack.c.l.b16 %v5271_v42 }
 0x345   : > { %5417 = vmatmul.msk.bf16.gmra.mxu3 %vm440_vm1, %v6959_v13 }
 0x346   : > { %v3693_v36 = vadd.f32 %v3553_v59, %v3160_v52  ;;  %v4052_v59 = vrot.slane %v6929_v29, 1 }
 0x347   : > { %v3556_v8 = vpop.f32.mrf.mxu2 }
 0x348   : > { %v4169_v31 = vadd.f32 %v4047_v30, %v3693_v36  ;;  %v2830_v12 = vpop.f32.mrf.mxu1  ;;  %v6975_v7 = vpop.f32.mrf.mxu3  ;;  %v4053_v4 = vsel %vm1031_vm2, %v4050_v39, %v4052_v59  ;;  %v7013_v36 = vpack.c.b16 %v3388_v15, %v3388_v15 }
 0x349   : > { %v3039_v33 = vrot.slane %v2830_v12, 2  ;;  %v4315_v53 = vpop.f32.mrf.mxu0  ;;  %v4054_v12 = vrot.slane %v6948_v55, 1 }
 0x34a   : > { %v4645_v45 = vadd.f32 %v4523_v19, %v4169_v31  ;;  %v4524_v11 = vrot.slane %v4315_v53, 2  ;;  %v5578_v31 = vld [vmem:[%s5665_s27 + $0xb4] sm:$0xff] }
 0x34b   : > { %v3040_v10 = vsel %vm1508_vm3, %v3037_v50, %v3039_v33 }
 0x34c   : > { %v3161_v46 = vadd.f32 %v3040_v10, %v2919_v23  ;;  %4693 = vst [vmem:[%s5816_s20 + $0xa8] sm:$0xff] %v4645_v45  ;;  %v4525_v24 = vsel %vm1508_vm3, %v4522_v28, %v4524_v11  ;;  %v4055_v23 = vsel %vm1031_vm2, %v4052_v59, %v4054_v12 }
 0x34e   : > { %v3694_v17 = vadd.f32 %v3556_v8, %v3161_v46  ;;  %v2922_v8 = vld [vmem:[%s5816_s20 + $0xc8] sm:$0xff] }
 0x34f   : > { %v3558_v2 = vpop.f32.mrf.mxu2 }
 0x350   : > { %v4170_v63 = vadd.f32 %v4049_v22, %v3694_v17  ;;  %v2833_v49 = vpop.f32.mrf.mxu1  ;;  %v6983_v27 = vpop.f32.mrf.mxu3  ;;  %v2923_v22 = vld [vmem:[%s5816_s20 + $0xd0] sm:$0xff] }
 0x351   : > { %v3041_v5 = vrot.slane %v2833_v49, 2  ;;  %v4318_v48 = vpop.f32.mrf.mxu0 }
 0x352   : > { %v4646_v37 = vadd.f32 %v4525_v24, %v4170_v63  ;;  %v4526_v35 = vrot.slane %v4318_v48, 2  ;;  %v4056_v63 = vrot.slane %v6956_v34, 1 }
 0x353   : > { %v3042_v57 = vsel %vm1508_vm3, %v3039_v33, %v3041_v5  ;;  %5218 = vmatmul.msk.bf16.gmra.mxu1 %vm440_vm1, %v5577_v16 }
 0x354   : > { %5389 = vmatmul.msk.bf16.gmra.mxu2 %vm440_vm1, %v6905_v6  ;;  %v3162_v26 = vadd.f32 %v3042_v57, %v2920_v58  ;;  %4694 = vst [vmem:[%s5816_s20 + $0xb0] sm:$0xff] %v4646_v37  ;;  %5441 = vmatmul.msk.bf16.gmra.mxu0 %vm440_vm1, %v6905_v6  ;;  %v4527_v38 = vsel %vm1508_vm3, %v4524_v11, %v4526_v35  ;;  %v2921_v6 = vld [vmem:[%s5816_s20 + $0xc0] sm:$0xff] }
 0x355   : > { %5418 = vmatmul.msk.bf16.gmra.mxu3 %vm440_vm1, %v6986_v56  ;;  %v4057_v37 = vsel %vm1031_vm2, %v4054_v12, %v4056_v63 }
 0x356   : > { %v3695_v1 = vadd.f32 %v3558_v2, %v3162_v26 }
 0x357   : > { %v3561_v44 = vpop.f32.mrf.mxu2 }
 0x358   : > { %v4171_v40 = vadd.f32 %v4051_v54, %v3695_v1  ;;  %v2835_v25 = vpop.f32.mrf.mxu1  ;;  %v7002_v18 = vpop.f32.mrf.mxu3  ;;  %v5579_v54 = vld [vmem:[%s5665_s27 + $0xbc] sm:$0xff] }
 0x359   : > { %v3043_v3 = vrot.slane %v2835_v25, 2  ;;  %v4320_v47 = vpop.f32.mrf.mxu0 }
 0x35a   : > { %v4647_v0 = vadd.f32 %v4527_v38, %v4171_v40  ;;  %v4528_v43 = vrot.slane %v4320_v47, 2  ;;  %v4058_v40 = vrot.slane %v6975_v7, 1 }
 0x35b   : > { %v3044_v60 = vsel %vm1508_vm3, %v3041_v5, %v3043_v3 }
 0x35c   : > { %v3163_v14 = vadd.f32 %v3044_v60, %v2921_v6  ;;  %4695 = vst [vmem:[%s5816_s20 + $0xb8] sm:$0xff] %v4647_v0  ;;  %v4529_v21 = vsel %vm1508_vm3, %v4526_v35, %v4528_v43  ;;  %v4059_v0 = vsel %vm1031_vm2, %v4056_v63, %v4058_v40 }
 0x35e   : > { %v3696_v20 = vadd.f32 %v3561_v44, %v3163_v14  ;;  %v2924_v44 = vld [vmem:[%s5816_s20 + $0xd8] sm:$0xff] }
 0x35f   : > { %v3563_v50 = vpop.f32.mrf.mxu2 }
 0x360   : > { %v4172_v61 = vadd.f32 %v4053_v4, %v3696_v20  ;;  %v2838_v62 = vpop.f32.mrf.mxu1  ;;  %v7011_v28 = vpop.f32.mrf.mxu3 }
 0x361   : > { %v3045_v41 = vrot.slane %v2838_v62, 2  ;;  %v4323_v52 = vpop.f32.mrf.mxu0 }
 0x362   : > { %v4648_v29 = vadd.f32 %v4529_v21, %v4172_v61  ;;  %v4530_v19 = vrot.slane %v4323_v52, 2 }
 0x363   : > { %v3046_v30 = vsel %vm1508_vm3, %v3043_v3, %v3045_v41  ;;  %5219 = vmatmul.msk.bf16.gmra.mxu1 %vm440_vm1, %v5578_v31 }
 0x364   : > { %5390 = vmatmul.msk.bf16.gmra.mxu2 %vm440_vm1, %v6932_v9  ;;  %v3164_v33 = vadd.f32 %v3046_v30, %v2922_v8  ;;  %4696 = vst [vmem:[%s5816_s20 + $0xc0] sm:$0xff] %v4648_v29  ;;  %5442 = vmatmul.msk.bf16.gmra.mxu0 %vm440_vm1, %v6932_v9  ;;  %v4531_v46 = vsel %vm1508_vm3, %v4528_v43, %v4530_v19 }
 0x365   : > { %5419 = vmatmul.msk.bf16.gmra.mxu3 %vm440_vm1, %v7013_v36 }
 0x366   : > { %v3697_v53 = vadd.f32 %v3563_v50, %v3164_v33  ;;  %v2925_v50 = vld [vmem:[%s5816_s20 + $0xe0] sm:$0xff]  ;;  %v2926_v33 = vld [vmem:[%s5816_s20 + $0xe8] sm:$0xff] }
 0x367   : > { %v3566_v45 = vpop.f32.mrf.mxu2 }
 0x368   : > { %v4173_v10 = vadd.f32 %v4055_v23, %v3697_v53  ;;  %v2840_v55 = vpop.f32.mrf.mxu1  ;;  %v7029_v17 = vpop.f32.mrf.mxu3  ;;  %v4062_v53 = vrot.slane %v7002_v18, 1 }
 0x369   : > { %v3047_v51 = vrot.slane %v2840_v55, 2  ;;  %v4325_v11 = vpop.f32.mrf.mxu0 }
 0x36a   : > { %v4649_v2 = vadd.f32 %v4531_v46, %v4173_v10  ;;  %v4532_v5 = vrot.slane %v4325_v11, 2 }
 0x36b   : > { %v3048_v9 = vsel %vm1508_vm3, %v3045_v41, %v3047_v51 }
 0x36c   : > { %v3165_v49 = vadd.f32 %v3048_v9, %v2923_v22  ;;  %4697 = vst [vmem:[%s5816_s20 + $0xc8] sm:$0xff] %v4649_v2  ;;  %v4533_v39 = vsel %vm1508_vm3, %v4530_v19, %v4532_v5  ;;  %v5580_v19 = vld [vmem:[%s5665_s27 + $0xc4] sm:$0xff] }
 0x36e   : > { %v3698_v24 = vadd.f32 %v3566_v45, %v3165_v49  ;;  %v2927_v49 = vld [vmem:[%s5816_s20 + $0xf0] sm:$0xff] }
 0x36f   : > { %v3568_v48 = vpop.f32.mrf.mxu2 }
 0x370   : > { %v4174_v58 = vadd.f32 %v4057_v37, %v3698_v24  ;;  %v2843_v57 = vpop.f32.mrf.mxu1  ;;  %v7037_v35 = vpop.f32.mrf.mxu3 }
 0x371   : > { %v3049_v16 = vrot.slane %v2843_v57, 2  ;;  %v4328_v26 = vpop.f32.mrf.mxu0 }
 0x372   : > { %v4650_v1 = vadd.f32 %v4533_v39, %v4174_v58  ;;  %v4534_v3 = vrot.slane %v4328_v26, 2 }
 0x373   : > { %v3050_v34 = vsel %vm1508_vm3, %v3047_v51, %v3049_v16  ;;  %5220 = vmatmul.msk.bf16.gmra.mxu1 %vm440_vm1, %v5579_v54 }
 0x374   : > { %5391 = vmatmul.msk.bf16.gmra.mxu2 %vm440_vm1, %v6959_v13  ;;  %v3166_v25 = vadd.f32 %v3050_v34, %v2924_v44  ;;  %4698 = vst [vmem:[%s5816_s20 + $0xd0] sm:$0xff] %v4650_v1  ;;  %5443 = vmatmul.msk.bf16.gmra.mxu0 %vm440_vm1, %v6959_v13  ;;  %v4535_v7 = vsel %vm1508_vm3, %v4532_v5, %v4534_v3  ;;  %v4060_v13 = vrot.slane %v6983_v27, 1 }
 0x376   : > { %v3699_v38 = vadd.f32 %v3568_v48, %v3166_v25  ;;  %v4061_v41 = vsel %vm1031_vm2, %v4058_v40, %v4060_v13  ;;  %v4063_v51 = vsel %vm1031_vm2, %v4060_v13, %v4062_v53  ;;  %v2928_v40 = vld [vmem:[%s5816_s20 + $0xf8] sm:$0xff]  ;;  %v4066_v25 = vrot.slane %v7029_v17, 1 }
 0x377   : > { %v3571_v47 = vpop.f32.mrf.mxu2 }
 0x378   : > { %v4175_v6 = vadd.f32 %v4059_v0, %v3699_v38  ;;  %v2845_v60 = vpop.f32.mrf.mxu1  ;;  %v7051_v43 = vpop.f32.mrf.mxu3 }
 0x379   : > { %v3051_v59 = vrot.slane %v2845_v60, 2  ;;  %v4330_v14 = vpop.f32.mrf.mxu0 }
 0x37a   : > { %v4651_v20 = vadd.f32 %v4535_v7, %v4175_v6  ;;  %v4536_v61 = vrot.slane %v4330_v14, 2 }
 0x37b   : > { %v3052_v4 = vsel %vm1508_vm3, %v3049_v16, %v3051_v59 }
 0x37c   : > { %v3167_v42 = vadd.f32 %v3052_v4, %v2925_v50  ;;  %4699 = vst [vmem:[%s5816_s20 + $0xd8] sm:$0xff] %v4651_v20  ;;  %v4537_v8 = vsel %vm1508_vm3, %v4534_v3, %v4536_v61  ;;  %v2929_v50 = vld [vmem:[%s5816_s20 + $0x100] sm:$0xff] }
 0x37e   : > { %v3700_v62 = vadd.f32 %v3571_v47, %v3167_v42 }
 0x37f   : > { %v3573_v15 = vpop.f32.mrf.mxu2 }
 0x380   : > { %v4176_v21 = vadd.f32 %v4061_v41, %v3700_v62  ;;  %v2848_v52 = vpop.f32.mrf.mxu1  ;;  %v7059_v31 = vpop.f32.mrf.mxu3 }
 0x381   : > { %v3053_v29 = vrot.slane %v2848_v52, 2  ;;  %v4333_v30 = vpop.f32.mrf.mxu0 }
 0x382   : > { %v4652_v12 = vadd.f32 %v4537_v8, %v4176_v21  ;;  %v4538_v23 = vrot.slane %v4333_v30, 2 }
 0x383   : > { %v3054_v27 = vsel %vm1508_vm3, %v3051_v59, %v3053_v29  ;;  %5221 = vmatmul.msk.bf16.gmra.mxu1 %vm440_vm1, %v5580_v19 }
 0x384   : > { %5392 = vmatmul.msk.bf16.gmra.mxu2 %vm440_vm1, %v6986_v56  ;;  %v3168_v45 = vadd.f32 %v3054_v27, %v2926_v33  ;;  %4700 = vst [vmem:[%s5816_s20 + $0xe0] sm:$0xff] %v4652_v12  ;;  %5444 = vmatmul.msk.bf16.gmra.mxu0 %vm440_vm1, %v6986_v56  ;;  %v4539_v18 = vsel %vm1508_vm3, %v4536_v61, %v4538_v23  ;;  %v4064_v56 = vrot.slane %v7011_v28, 1  ;;  %v2930_v33 = vld [vmem:[%s5816_s20 + $0x108] sm:$0xff]  ;;  %v4070_v27 = vrot.slane %v7051_v43, 1 }
 0x386   : > { %v3701_v10 = vadd.f32 %v3573_v15, %v3168_v45  ;;  %v4065_v57 = vsel %vm1031_vm2, %v4062_v53, %v4064_v56  ;;  %v4067_v6 = vsel %vm1031_vm2, %v4064_v56, %v4066_v25 }
 0x387   : > { %v3576_v55 = vpop.f32.mrf.mxu2 }
 0x388   : > { %v4177_v46 = vadd.f32 %v4063_v51, %v3701_v10  ;;  %v2850_v11 = vpop.f32.mrf.mxu1  ;;  %v7073_v9 = vpop.f32.mrf.mxu3 }
 0x389   : > { %v3055_v2 = vrot.slane %v2850_v11, 2  ;;  %v4335_v22 = vpop.f32.mrf.mxu0 }
 0x38a   : > { %v4653_v63 = vadd.f32 %v4539_v18, %v4177_v46  ;;  %v4540_v48 = vrot.slane %v4335_v22, 2 }
 0x38b   : > { %v3056_v5 = vsel %vm1508_vm3, %v3053_v29, %v3055_v2 }
 0x38c   : > { %v3169_v24 = vadd.f32 %v3056_v5, %v2927_v49  ;;  %4701 = vst [vmem:[%s5816_s20 + $0xe8] sm:$0xff] %v4653_v63  ;;  %v4541_v1 = vsel %vm1508_vm3, %v4538_v23, %v4540_v48  ;;  %v2931_v63 = vld [vmem:[%s5816_s20 + $0x110] sm:$0xff]  ;;  %v4072_v49 = vrot.slane %v7059_v31, 1 }
 0x38e   : > { %v3702_v37 = vadd.f32 %v3576_v55, %v3169_v24 }
 0x38f   : > { %v3578_v58 = vpop.f32.mrf.mxu2 }
 0x390   : > { %v4178_v16 = vadd.f32 %v4065_v57, %v3702_v37  ;;  %v2853_v39 = vpop.f32.mrf.mxu1  ;;  %v7081_v34 = vpop.f32.mrf.mxu3  ;;  %v4073_v37 = vsel %vm1031_vm2, %v4070_v27, %v4072_v49 }
 0x391   : > { %v3057_v26 = vrot.slane %v2853_v39, 2  ;;  %v4338_v44 = vpop.f32.mrf.mxu0 }
 0x392   : > { %v4654_v54 = vadd.f32 %v4541_v1, %v4178_v16  ;;  %v4542_v38 = vrot.slane %v4338_v44, 2 }
 0x393   : > { %v3058_v28 = vsel %vm1508_vm3, %v3055_v2, %v3057_v26  ;;  %5222 = vmatmul.msk.bf16.gmra.mxu1 %vm440_vm1, %v6354_v32 }
 0x394   : > { %5393 = vmatmul.msk.bf16.gmra.mxu2 %vm440_vm1, %v7013_v36  ;;  %v3170_v3 = vadd.f32 %v3058_v28, %v2928_v40  ;;  %4702 = vst [vmem:[%s5816_s20 + $0xf0] sm:$0xff] %v4654_v54  ;;  %5445 = vmatmul.msk.bf16.gmra.mxu0 %vm440_vm1, %v7013_v36  ;;  %v4543_v17 = vsel %vm1508_vm3, %v4540_v48, %v4542_v38  ;;  %v4068_v36 = vrot.slane %v7037_v35, 1  ;;  %v2932_v54 = vld [vmem:[%s5816_s20 + $0x118] sm:$0xff]  ;;  %v4074_v40 = vrot.slane %v7073_v9, 1 }
 0x396   : > { %v3703_v47 = vadd.f32 %v3578_v58, %v3170_v3  ;;  %v4069_v15 = vsel %vm1031_vm2, %v4066_v25, %v4068_v36  ;;  %v4071_v10 = vsel %vm1031_vm2, %v4068_v36, %v4070_v27 }
 0x397   : > { %v3581_v0 = vpop.f32.mrf.mxu2 }
 0x398   : > { %v4179_v60 = vadd.f32 %v4067_v6, %v3703_v47  ;;  %v2855_v59 = vpop.f32.mrf.mxu1  ;;  %v7095_v14 = vpop.f32.mrf.mxu3  ;;  %v4075_v47 = vsel %vm1031_vm2, %v4072_v49, %v4074_v40 }
 0x399   : > { %v3059_v32 = vrot.slane %v2855_v59, 2  ;;  %v4340_v7 = vpop.f32.mrf.mxu0 }
 0x39a   : > { %v4655_v20 = vadd.f32 %v4543_v17, %v4179_v60  ;;  %v4544_v42 = vrot.slane %v4340_v7, 2 }
 0x39b   : > { %v3060_v4 = vsel %vm1508_vm3, %v3057_v26, %v3059_v32 }
 0x39c   : > { %v3171_v13 = vadd.f32 %v3060_v4, %v2929_v50  ;;  %4703 = vst [vmem:[%s5816_s20 + $0xf8] sm:$0xff] %v4655_v20  ;;  %v4545_v29 = vsel %vm1508_vm3, %v4542_v38, %v4544_v42  ;;  %v2933_v20 = vld [vmem:[%s5816_s20 + $0x120] sm:$0xff]  ;;  %v4076_v50 = vrot.slane %v7081_v34, 1 }
 0x39e   : > { %v3704_v61 = vadd.f32 %v3581_v0, %v3171_v13 }
 0x39f   : > { %v3583_v62 = vpop.f32.mrf.mxu2 }
 0x3a0   : > { %v4180_v41 = vadd.f32 %v4069_v15, %v3704_v61  ;;  %v2858_v21 = vpop.f32.mrf.mxu1  ;;  %v7103_v30 = vpop.f32.mrf.mxu3  ;;  %v4077_v61 = vsel %vm1031_vm2, %v4074_v40, %v4076_v50 }
 0x3a1   : > { %v3061_v52 = vrot.slane %v2858_v21, 2  ;;  %v4343_v8 = vpop.f32.mrf.mxu0 }
 0x3a2   : > { %v4656_v12 = vadd.f32 %v4545_v29, %v4180_v41  ;;  %v4546_v53 = vrot.slane %v4343_v8, 2 }
 0x3a3   : > { %v3062_v35 = vsel %vm1508_vm3, %v3059_v32, %v3061_v52 }
 0x3a4   : > { %v3172_v19 = vadd.f32 %v3062_v35, %v2930_v33  ;;  %4704 = vst [vmem:[%s5816_s20 + $0x100] sm:$0xff] %v4656_v12  ;;  %v4547_v11 = vsel %vm1508_vm3, %v4544_v42, %v4546_v53  ;;  %v2934_v12 = vld [vmem:[%s5816_s20 + $0x128] sm:$0xff]  ;;  %v4078_v33 = vrot.slane %v7095_v14, 1 }
 0x3a6   : > { %v3705_v45 = vadd.f32 %v3583_v62, %v3172_v19 }
 0x3a7   : > { %v3586_v23 = vpop.f32.mrf.mxu2 }
 0x3a8   : > { %v4181_v55 = vadd.f32 %v4071_v10, %v3705_v45  ;;  %v2860_v51 = vpop.f32.mrf.mxu1  ;;  %v7111_v18 = vpop.f32.mrf.mxu3  ;;  %v4079_v45 = vsel %vm1031_vm2, %v4076_v50, %v4078_v33 }
 0x3a9   : > { %v3063_v46 = vrot.slane %v2860_v51, 2  ;;  %v4345_v2 = vpop.f32.mrf.mxu0 }
 0x3aa   : > { %v4657_v22 = vadd.f32 %v4547_v11, %v4181_v55  ;;  %v4548_v56 = vrot.slane %v4345_v2, 2 }
 0x3ab   : > { %v3064_v43 = vsel %vm1508_vm3, %v3061_v52, %v3063_v46 }
 0x3ac   : > { %v3173_v5 = vadd.f32 %v3064_v43, %v2931_v63  ;;  %4705 = vst [vmem:[%s5816_s20 + $0x108] sm:$0xff] %v4657_v22  ;;  %v4549_v39 = vsel %vm1508_vm3, %v4546_v53, %v4548_v56  ;;  %v2935_v22 = vld [vmem:[%s5816_s20 + $0x130] sm:$0xff]  ;;  %v4080_v63 = vrot.slane %v7103_v30, 1 }
 0x3ae   : > { %v3706_v24 = vadd.f32 %v3586_v23, %v3173_v5 }
 0x3af   : > { %v3588_v48 = vpop.f32.mrf.mxu2 }
 0x3b0   : > { %v4182_v58 = vadd.f32 %v4073_v37, %v3706_v24  ;;  %v2863_v57 = vpop.f32.mrf.mxu1  ;;  %v7119_v1 = vpop.f32.mrf.mxu3  ;;  %v4081_v24 = vsel %vm1031_vm2, %v4078_v33, %v4080_v63 }
 0x3b1   : > { %v3065_v16 = vrot.slane %v2863_v57, 2  ;;  %v4348_v26 = vpop.f32.mrf.mxu0 }
 0x3b2   : > { %v4658_v44 = vadd.f32 %v4549_v39, %v4182_v58  ;;  %v4550_v25 = vrot.slane %v4348_v26, 2 }
 0x3b3   : > { %v3066_v31 = vsel %vm1508_vm3, %v3063_v46, %v3065_v16 }
 0x3b4   : > { %v3174_v28 = vadd.f32 %v3066_v31, %v2932_v54  ;;  %4706 = vst [vmem:[%s5816_s20 + $0x110] sm:$0xff] %v4658_v44  ;;  %v4551_v59 = vsel %vm1508_vm3, %v4548_v56, %v4550_v25  ;;  %v2936_v44 = vld [vmem:[%s5816_s20 + $0x138] sm:$0xff]  ;;  %v4082_v54 = vrot.slane %v7111_v18, 1 }
 0x3b6   : > { %v3707_v3 = vadd.f32 %v3588_v48, %v3174_v28 }
 0x3b7   : > { %v3591_v38 = vpop.f32.mrf.mxu2 }
 0x3b8   : > { %v4183_v0 = vadd.f32 %v4075_v47, %v3707_v3  ;;  %v2865_v6 = vpop.f32.mrf.mxu1  ;;  %v7127_v17 = vpop.f32.mrf.mxu3  ;;  %v4083_v3 = vsel %vm1031_vm2, %v4080_v63, %v4082_v54 }
 0x3b9   : > { %v3067_v60 = vrot.slane %v2865_v6, 2  ;;  %v4350_v32 = vpop.f32.mrf.mxu0 }
 0x3ba   : > { %v4659_v7 = vadd.f32 %v4551_v59, %v4183_v0  ;;  %v4552_v36 = vrot.slane %v4350_v32, 2 }
 0x3bb   : > { %v3068_v9 = vsel %vm1508_vm3, %v3065_v16, %v3067_v60 }
 0x3bc   : > { %v3175_v4 = vadd.f32 %v3068_v9, %v2933_v20  ;;  %4707 = vst [vmem:[%s5816_s20 + $0x118] sm:$0xff] %v4659_v7  ;;  %v4553_v21 = vsel %vm1508_vm3, %v4550_v25, %v4552_v36  ;;  %v2937_v7 = vld [vmem:[%s5816_s20 + $0x140] sm:$0xff]  ;;  %v4084_v20 = vrot.slane %v7119_v1, 1 }
 0x3be   : > { %v3708_v13 = vadd.f32 %v3591_v38, %v3175_v4 }
 0x3bf   : > { %v3593_v42 = vpop.f32.mrf.mxu2 }
 0x3c0   : > { %v4184_v62 = vadd.f32 %v4077_v61, %v3708_v13  ;;  %v2868_v15 = vpop.f32.mrf.mxu1  ;;  %v7135_v29 = vpop.f32.mrf.mxu3  ;;  %v4085_v13 = vsel %vm1031_vm2, %v4082_v54, %v4084_v20 }
 0x3c1   : > { %v3069_v41 = vrot.slane %v2868_v15, 2  ;;  %v4353_v52 = vpop.f32.mrf.mxu0 }
 0x3c2   : > { %v4660_v8 = vadd.f32 %v4553_v21, %v4184_v62  ;;  %v4554_v27 = vrot.slane %v4353_v52, 2 }
 0x3c3   : > { %v3070_v34 = vsel %vm1508_vm3, %v3067_v60, %v3069_v41 }
 0x3c4   : > { %v3176_v35 = vadd.f32 %v3070_v34, %v2934_v12  ;;  %4708 = vst [vmem:[%s5816_s20 + $0x120] sm:$0xff] %v4660_v8  ;;  %v4555_v51 = vsel %vm1508_vm3, %v4552_v36, %v4554_v27  ;;  %v2938_v8 = vld [vmem:[%s5816_s20 + $0x148] sm:$0xff]  ;;  %v4086_v12 = vrot.slane %v7127_v17, 1 }
 0x3c6   : > { %v3709_v19 = vadd.f32 %v3593_v42, %v3176_v35 }
 0x3c7   : > { %v3596_v53 = vpop.f32.mrf.mxu2 }
 0x3c8   : > { %v4185_v23 = vadd.f32 %v4079_v45, %v3709_v19  ;;  %v2870_v10 = vpop.f32.mrf.mxu1  ;;  %v7143_v11 = vpop.f32.mrf.mxu3  ;;  %v4087_v19 = vsel %vm1031_vm2, %v4084_v20, %v4086_v12 }
 0x3c9   : > { %v3071_v55 = vrot.slane %v2870_v10, 2  ;;  %v4355_v46 = vpop.f32.mrf.mxu0 }
 0x3ca   : > { %v4661_v2 = vadd.f32 %v4555_v51, %v4185_v23  ;;  %v4556_v49 = vrot.slane %v4355_v46, 2 }
 0x3cb   : > { %v3072_v14 = vsel %vm1508_vm3, %v3069_v41, %v3071_v55 }
 0x3cc   : > { %v3177_v43 = vadd.f32 %v3072_v14, %v2935_v22  ;;  %4709 = vst [vmem:[%s5816_s20 + $0x128] sm:$0xff] %v4661_v2  ;;  %v4557_v57 = vsel %vm1508_vm3, %v4554_v27, %v4556_v49  ;;  %v2939_v2 = vld [vmem:[%s5816_s20 + $0x150] sm:$0xff]  ;;  %v4088_v22 = vrot.slane %v7135_v29, 1 }
 0x3ce   : > { %v3710_v5 = vadd.f32 %v3596_v53, %v3177_v43 }
 0x3cf   : > { %v3598_v56 = vpop.f32.mrf.mxu2 }
 0x3d0   : > { %v4186_v48 = vadd.f32 %v4081_v24, %v3710_v5  ;;  %v2873_v37 = vpop.f32.mrf.mxu1  ;;  %v7151_v39 = vpop.f32.mrf.mxu3  ;;  %v4089_v5 = vsel %vm1031_vm2, %v4086_v12, %v4088_v22 }
 0x3d1   : > { %v3073_v58 = vrot.slane %v2873_v37, 2  ;;  %v4358_v16 = vpop.f32.mrf.mxu0 }
 0x3d2   : > { %v4662_v26 = vadd.f32 %v4557_v57, %v4186_v48  ;;  %v4558_v40 = vrot.slane %v4358_v16, 2 }
 0x3d3   : > { %v3074_v30 = vsel %vm1508_vm3, %v3071_v55, %v3073_v58 }
 0x3d4   : > { %v3178_v31 = vadd.f32 %v3074_v30, %v2936_v44  ;;  %4710 = vst [vmem:[%s5816_s20 + $0x130] sm:$0xff] %v4662_v26  ;;  %v4559_v6 = vsel %vm1508_vm3, %v4556_v49, %v4558_v40  ;;  %v2940_v26 = vld [vmem:[%s5816_s20 + $0x158] sm:$0xff]  ;;  %v4090_v44 = vrot.slane %v7143_v11, 1  ;;  %v4092_v11 = vrot.slane %v7151_v39, 1 }
 0x3d6   : > { %v3711_v28 = vadd.f32 %v3598_v56, %v3178_v31 }
 0x3d7   : > { %v3601_v25 = vpop.f32.mrf.mxu2 }
 0x3d8   : > { %v4187_v38 = vadd.f32 %v4083_v3, %v3711_v28  ;;  %v2875_v47 = vpop.f32.mrf.mxu1  ;;  %v7159_v59 = vpop.f32.mrf.mxu3  ;;  %v4091_v28 = vsel %vm1031_vm2, %v4088_v22, %v4090_v44 }
 0x3d9   : > { %v3075_v0 = vrot.slane %v2875_v47, 2  ;;  %v4360_v60 = vpop.f32.mrf.mxu0  ;;  %v4094_v39 = vrot.slane %v7159_v59, 1 }
 0x3da   : > { %v4663_v32 = vadd.f32 %v4559_v6, %v4187_v38  ;;  %v4560_v50 = vrot.slane %v4360_v60, 2  ;;  %v2941_v60 = vld [vmem:[%s5816_s20 + $0x160] sm:$0xff] }
 0x3db   : > { %v3076_v18 = vsel %vm1508_vm3, %v3073_v58, %v3075_v0 }
 0x3dc   : > { %v3179_v9 = vadd.f32 %v3076_v18, %v2937_v7  ;;  %4711 = vst [vmem:[%s5816_s20 + $0x138] sm:$0xff] %v4663_v32  ;;  %v4561_v15 = vsel %vm1508_vm3, %v4558_v40, %v4560_v50 }
 0x3de   : > { %v3712_v4 = vadd.f32 %v3601_v25, %v3179_v9 }
 0x3df   : > { %v3603_v36 = vpop.f32.mrf.mxu2 }
 0x3e0   : > { %v4188_v42 = vadd.f32 %v4085_v13, %v3712_v4  ;;  %v2878_v61 = vpop.f32.mrf.mxu1  ;;  %v7167_v21 = vpop.f32.mrf.mxu3 }
 0x3e1   : > { %v3077_v62 = vrot.slane %v2878_v61, 2  ;;  %v4363_v41 = vpop.f32.mrf.mxu0  ;;  %v4096_v59 = vrot.slane %v7167_v21, 1 }
 0x3e2   : > { %v4664_v52 = vadd.f32 %v4561_v15, %v4188_v42  ;;  %v4562_v33 = vrot.slane %v4363_v41, 2  ;;  %v2942_v15 = vld [vmem:[%s5816_s20 + $0x168] sm:$0xff] }
 0x3e3   : > { %v3078_v1 = vsel %vm1508_vm3, %v3075_v0, %v3077_v62  ;;  %v4097_v22 = vsel %vm1031_vm2, %v4094_v39, %v4096_v59 }
 0x3e4   : > { %v3180_v34 = vadd.f32 %v3078_v1, %v2938_v8  ;;  %4712 = vst [vmem:[%s5816_s20 + $0x140] sm:$0xff] %v4664_v52  ;;  %v4563_v10 = vsel %vm1508_vm3, %v4560_v50, %v4562_v33  ;;  %v4093_v50 = vsel %vm1031_vm2, %v4090_v44, %v4092_v11 }
 0x3e6   : > { %v3713_v35 = vadd.f32 %v3603_v36, %v3180_v34  ;;  %v4095_v34 = vsel %vm1031_vm2, %v4092_v11, %v4094_v39 }
 0x3e7   : > { %v3606_v27 = vpop.f32.mrf.mxu2 }
 0x3e8   : > { %v4189_v53 = vadd.f32 %v4087_v19, %v3713_v35  ;;  %v2880_v45 = vpop.f32.mrf.mxu1  ;;  %v7175_v51 = vpop.f32.mrf.mxu3 }
 0x3e9   : > { %v3079_v23 = vrot.slane %v2880_v45, 2  ;;  %v4365_v55 = vpop.f32.mrf.mxu0  ;;  %v4098_v21 = vrot.slane %v7175_v51, 1 }
 0x3ea   : > { %v4665_v46 = vadd.f32 %v4563_v10, %v4189_v53  ;;  %v4564_v63 = vrot.slane %v4365_v55, 2 }
 0x3eb   : > { %v3080_v17 = vsel %vm1508_vm3, %v3077_v62, %v3079_v23 }
 0x3ec   : > { %v3181_v14 = vadd.f32 %v3080_v17, %v2939_v2  ;;  %4713 = vst [vmem:[%s5816_s20 + $0x148] sm:$0xff] %v4665_v46  ;;  %v4565_v37 = vsel %vm1508_vm3, %v4562_v33, %v4564_v63 }
 0x3ee   : > { %v3714_v43 = vadd.f32 %v3606_v27, %v3181_v14 }
 0x3ef   : > { %v3608_v49 = vpop.f32.mrf.mxu2 }
 0x3f0   : > { %v4190_v56 = vadd.f32 %v4089_v5, %v3714_v43  ;;  %v2883_v24 = vpop.f32.mrf.mxu1  ;;  %v3904_v57 = vpop.f32.mrf.mxu3 }
 0x3f1   : > { %v3081_v48 = vrot.slane %v2883_v24, 2  ;;  %v4368_v58 = vpop.f32.mrf.mxu0  ;;  %v2944_v24 = vld [vmem:[%s5816_s20 + $0x178] sm:$0xff] }
 0x3f2   : > { %v4666_v16 = vadd.f32 %v4565_v37, %v4190_v56  ;;  %v4566_v54 = vrot.slane %v4368_v58, 2 }
 0x3f3   : > { %v3082_v29 = vsel %vm1508_vm3, %v3079_v23, %v3081_v48  ;;  %v2943_v23 = vld [vmem:[%s5816_s20 + $0x170] sm:$0xff] }
 0x3f4   : > { %v3182_v30 = vadd.f32 %v3082_v29, %v2940_v26  ;;  %4714 = vst [vmem:[%s5816_s20 + $0x150] sm:$0xff] %v4666_v16  ;;  %v4567_v47 = vsel %vm1508_vm3, %v4564_v63, %v4566_v54  ;;  %v4099_v26 = vsel %vm1031_vm2, %v4096_v59, %v4098_v21 }
 0x3f6   : > { %v3715_v31 = vadd.f32 %v3608_v49, %v3182_v30 }
 0x3f7   : > { %v3611_v40 = vpop.f32.mrf.mxu2 }
 0x3f8   : > { %v4191_v25 = vadd.f32 %v4091_v28, %v3715_v31  ;;  %v2885_v3 = vpop.f32.mrf.mxu1 }
 0x3f9   : > { %v3083_v38 = vrot.slane %v2885_v3, 2  ;;  %v4370_v0 = vpop.f32.mrf.mxu0 }
 0x3fa   : > { %v4667_v6 = vadd.f32 %v4567_v47, %v4191_v25  ;;  %v4568_v18 = vrot.slane %v4370_v0, 2 }
 0x3fb   : > { %v3084_v32 = vsel %vm1508_vm3, %v3081_v48, %v3083_v38 }
 0x3fc   : > { %v3183_v7 = vadd.f32 %v3084_v32, %v2941_v60  ;;  %4715 = vst [vmem:[%s5816_s20 + $0x158] sm:$0xff] %v4667_v6  ;;  %v4569_v42 = vsel %vm1508_vm3, %v4566_v54, %v4568_v18 }
 0x3fe   : > { %v3716_v20 = vadd.f32 %v3611_v40, %v3183_v7 }
 0x3ff   : > { %v3613_v9 = vpop.f32.mrf.mxu2 }
 0x400   : > { %v4192_v4 = vadd.f32 %v4093_v50, %v3716_v20  ;;  %v2888_v36 = vpop.f32.mrf.mxu1 }
 0x401   : > { %v3085_v13 = vrot.slane %v2888_v36, 2  ;;  %v4373_v61 = vpop.f32.mrf.mxu0 }
 0x402   : > { %v4668_v62 = vadd.f32 %v4569_v42, %v4192_v4  ;;  %v4570_v8 = vrot.slane %v4373_v61, 2 }
 0x403   : > { %v3086_v41 = vsel %vm1508_vm3, %v3083_v38, %v3085_v13 }
 0x404   : > { %v3184_v52 = vadd.f32 %v3086_v41, %v2942_v15  ;;  %4716 = vst [vmem:[%s5816_s20 + $0x160] sm:$0xff] %v4668_v62  ;;  %v4571_v19 = vsel %vm1508_vm3, %v4568_v18, %v4570_v8 }
 0x406   : > { %v3717_v1 = vadd.f32 %v3613_v9, %v3184_v52 }
 0x407   : > { %v3616_v12 = vpop.f32.mrf.mxu2 }
 0x408   : > { %v4193_v33 = vadd.f32 %v4095_v34, %v3717_v1  ;;  %v2890_v35 = vpop.f32.mrf.mxu1 }
 0x409   : > { %v3087_v27 = vrot.slane %v2890_v35, 2  ;;  %v4375_v53 = vpop.f32.mrf.mxu0 }
 0x40a   : > { %v4669_v45 = vadd.f32 %v4571_v19, %v4193_v33  ;;  %v4572_v46 = vrot.slane %v4375_v53, 2 }
 0x40b   : > { %v3088_v10 = vsel %vm1508_vm3, %v3085_v13, %v3087_v27 }
 0x40c   : > { %v3185_v55 = vadd.f32 %v3088_v10, %v2943_v23  ;;  %4717 = vst [vmem:[%s5816_s20 + $0x168] sm:$0xff] %v4669_v45  ;;  %v4573_v49 = vsel %vm1508_vm3, %v4570_v8, %v4572_v46 }
 0x40e   : > { %v3718_v2 = vadd.f32 %v3616_v12, %v3185_v55 }
 0x40f   : > { %v3618_v17 = vpop.f32.mrf.mxu2 }
 0x410   : > { %v4194_v14 = vadd.f32 %v4097_v22, %v3718_v2  ;;  %v2893_v63 = vpop.f32.mrf.mxu1 }
 0x411   : > { %v3089_v43 = vrot.slane %v2893_v63, 2  ;;  %v4378_v5 = vpop.f32.mrf.mxu0 }
 0x412   : > { %v4670_v56 = vadd.f32 %v4573_v49, %v4194_v14  ;;  %v4574_v58 = vrot.slane %v4378_v5, 2 }
 0x413   : > { %v3090_v48 = vsel %vm1508_vm3, %v3087_v27, %v3089_v43 }
 0x414   : > { %v3186_v37 = vadd.f32 %v3090_v48, %v2944_v24  ;;  %4718 = vst [vmem:[%s5816_s20 + $0x170] sm:$0xff] %v4670_v56  ;;  %v4575_v30 = vsel %vm1508_vm3, %v4572_v46, %v4574_v58 }
 0x416   : > { %v3719_v57 = vadd.f32 %v3618_v17, %v3186_v37 }
 0x417   : > { %v3621_v16 = vpop.f32.mrf.mxu2 }
 0x418   : > { %v4195_v29 = vadd.f32 %v4099_v26, %v3719_v57  ;;  %v2895_v44 = vpop.f32.mrf.mxu1 }
 0x419   : > { %v4380_v54 = vpop.f32.mrf.mxu0 }
 0x41a   : > { %v4671_v31 = vadd.f32 %v4575_v30, %v4195_v29 }
 0x41c   : > { %4719 = vst [vmem:[%s5816_s20 + $0x178] sm:$0xff] %v4671_v31 }
 0x41f   : > { %v3622_v40 = vpop.f32.mrf.mxu2 }
 0x420 PF: > { %s13_s14 = sadd.s32 1, %s5603_s14   ;;  %s7227_s12 = smov %s5599_s13 }
 0x421   : > { %p10_p5 = scmp.ge.s32.totalorder %s13_s14, 4   ;;  %s7228_s13 = smov %s7230_s15 }
 0x423   :  { %12 = sbr.rel (!%p10_p5) target bundleno = 2 (0x2), region = 73 }

</bundles_post_ra>
